<compile_context>
chip_gen: v7x
topology: tpu7x:2x2x1
jax: 0.10.0
libtpu: 0.0.40
codegen_flags: <defaults>
</compile_context>

<pallas_src>
import functools

import jax
import jax.numpy as jnp
from jax.experimental import pallas as pl
from jax.experimental.pallas import tpu as pltpu

EMBED_DIM = 768
NUM_KERNELS = 128
KERNEL_SIZES = (3, 4, 5)
NUM_SHIFTS = sum(KERNEL_SIZES)                 # 12
FUSED_N = NUM_SHIFTS * NUM_KERNELS             # 1536
FC_INP_DIM = NUM_KERNELS * len(KERNEL_SIZES)   # 384
HIDDEN = 64
HIDDEN_PAD = 128                               # pad classifier hidden to lane width
NUM_LABELS = 4                                 # config.num_labels (small synthetic value)
OUT_PAD = 128                                  # pad logits to lane width, slice after
HALO_PAD = 8                                   # >= max(k)-1 and 8-aligned (sublane tile)

# column offset of each conv's block of shift-weights inside the fused weight matrix
_CONV_BASE = []
_off = 0
for _k in KERNEL_SIZES:
    _CONV_BASE.append(_off)
    _off += _k * NUM_KERNELS


def _round_up(x, m):
    return (x + m - 1) // m * m


def _vmem_capacity_bytes():
    """Per-core VMEM capacity (generation-dependent); conservative fallback."""
    try:
        info = pltpu.get_tpu_info()
    except Exception:
        return 64 * 1024 * 1024
    for name in ("vmem_capacity_bytes", "vmem_size_bytes", "vmem_bytes"):
        v = getattr(info, name, None)
        if isinstance(v, int) and v > 0:
            return v
    return 64 * 1024 * 1024


def _choose_tiles(B, L, budget_bytes):
    """Pick (batch tile, L-chunk length, #chunks, padded kernel L) from the VMEM budget."""
    TL = min(_round_up(max(L, 8), 8), 256)       # conv rows produced per MXU pass
    n_chunks = pl.cdiv(L, TL)
    L_kern = n_chunks * TL + HALO_PAD            # f32 input rows resident per batch element
    LC = TL + HALO_PAD                           # input rows fed to the MXU per chunk
    # rough VMEM per batch element: double-buffered f32 input + f32 chunk matmul output
    # (1536 wide) + elementwise temps of comparable size
    per_elem = 2 * L_kern * EMBED_DIM * 4 + 3 * LC * FUSED_N * 4
    fixed = 8 * 1024 * 1024                      # fused + classifier weights (x2 bufs), slack
    tb_cap = max(1, (budget_bytes - fixed) // per_elem)
    if B <= tb_cap:
        TB = B
        # prefer >= 2 grid steps (megacore / v7x dual-TC) when each step still feeds the
        # MXU with >= 512 rows
        half = _round_up((B + 1) // 2, 8)
        if B >= 16 and half < B and half * LC >= 512:
            TB = half
    else:
        # tiling over batch: keep the output block sublane-aligned (multiple of 8)
        TB = min(tb_cap, 1024)
        TB = max(8, TB - TB % 8)
    # TODO(synk): for very long L (where even TB=8 of full-L f32 rows overflows VMEM),
    # add an L grid axis with a (k-1) halo and a running-max scratch instead.
    return TB, TL, n_chunks, L_kern


def cnn_forward_kernel(x_ref, w_all_ref, b_all_ref,
                       wc1_ref, bc1_ref, wc2_ref, bc2_ref,
                       out_ref, *, L, TL, n_chunks):
    TB = x_ref.shape[0]
    LC = TL + HALO_PAD                 # rows fed to the MXU per chunk (halo included)
    n_rows = TB * LC                   # multiple of 8 (TL, HALO_PAD are 8-aligned)

    w_all = w_all_ref[...]             # (768, 1536) bf16, resident across chunks

    # local (within-chunk) time index of every sublane row; rows >= TL are halo rows
    # that are recomputed as the head of the next chunk (or zero padding).
    local_t = jax.lax.broadcasted_iota(jnp.int32, (LC, NUM_KERNELS), 0)
    in_chunk = local_t < TL

    def chunk_body(c, running_max):
        if n_chunks == 1:
            x_chunk = x_ref[...]                                       # (TB, LC, 768) f32
        else:
            start = pl.multiple_of(c * TL, 8)
            x_chunk = x_ref[:, pl.ds(start, LC), :]
        x_chunk = x_chunk.astype(jnp.bfloat16)                         # cast after the DMA

        # One wide MXU pass: every shift-weight of every conv at once.
        y = jnp.dot(x_chunk.reshape(n_rows, EMBED_DIM), w_all,
                    preferred_element_type=jnp.float32)                # (n_rows, 1536) f32

        t_glob = local_t + c * TL
        feats = []
        for ksize, base in zip(KERNEL_SIZES, _CONV_BASE):
            # conv[t] = sum_i y_i[t + i]: shift the narrow 128-wide outputs with the XLU
            # (pltpu.roll == jnp.roll semantics; shift = n_rows - i => row t reads row t+i).
            acc = y[:, base:base + NUM_KERNELS]
            for i in range(1, ksize):                                  # static unrolled
                col = base + i * NUM_KERNELS
                acc = acc + pltpu.roll(y[:, col:col + NUM_KERNELS],
                                       shift=n_rows - i, axis=0)
            acc = acc.reshape(TB, LC, NUM_KERNELS)                     # layout no-op (LC%8==0)
            # mask halo / wrapped / out-of-range positions before the global max-pool
            valid = in_chunk & (t_glob <= (L - ksize))
            acc = jnp.where(valid, acc, -jnp.inf)
            feats.append(jnp.max(acc, axis=1))                         # (TB, 128)
        return jnp.maximum(running_max, jnp.concatenate(feats, axis=1))

    init = jnp.full((TB, FC_INP_DIM), -jnp.inf, dtype=jnp.float32)
    if n_chunks == 1:
        feat_max = chunk_body(0, init)
    else:
        feat_max = jax.lax.fori_loop(0, n_chunks, chunk_body, init)

    # bias-add + ReLU folded past the max-pool (bias is t-invariant, relu is monotone).
    feat = jnp.maximum(feat_max + b_all_ref[...], 0.0)                 # (TB, 384) f32

    # classifier: Dropout (identity in eval) -> Linear(384,64) -> ReLU -> Linear(64,labels)
    # TODO(synk): nn.Dropout omitted -- identity under eval/inference semantics.
    h = jnp.dot(feat.astype(jnp.bfloat16), wc1_ref[...],
                preferred_element_type=jnp.float32) + bc1_ref[...]
    h = jnp.maximum(h, 0.0)
    out = jnp.dot(h.astype(jnp.bfloat16), wc2_ref[...],
                  preferred_element_type=jnp.float32) + bc2_ref[...]
    out_ref[...] = out.astype(out_ref.dtype)                           # (TB, 128) lane-dense


@jax.jit
def cnn_model_forward(x, params):
    B, L, D = x.shape
    if D != EMBED_DIM:
        raise ValueError(f"embed dim must be {EMBED_DIM}")
    if L < max(KERNEL_SIZES):
        raise ValueError(f"sequence length must be >= {max(KERNEL_SIZES)}")

    # generation-aware VMEM budget: ~48 MiB on v7x (64 MiB/TC), ~96 MiB on v5e/v6e (128 MiB)
    budget = min(_vmem_capacity_bytes() * 3 // 4, 112 * 1024 * 1024)
    TB, TL, n_chunks, L_kern = _choose_tiles(B, L, budget)
    B_pad = pl.cdiv(B, TB) * TB

    # pad batch to the tile and L to the 8-aligned chunked length (+halo); padded rows are
    # zeros and every conv position that could touch them is masked inside the kernel.
    pad_b, pad_l = B_pad - B, L_kern - L
    if pad_b or pad_l:
        x = jnp.pad(x, ((0, pad_b), (0, pad_l), (0, 0)))
    # NOTE: x stays f32 (no wrapper-side HBM cast pass); it is cast to bf16 in-kernel.

    # Fuse conv weights: columns ordered [w3[0..2], w4[0..3], w5[0..4]] x 128 channels.
    w_all = jnp.concatenate(
        [params[f"w{k}"].transpose(1, 0, 2).reshape(EMBED_DIM, k * NUM_KERNELS)
         for k in KERNEL_SIZES], axis=1).astype(jnp.bfloat16)          # (768, 1536)
    b_all = jnp.concatenate([params[f"b{k}"] for k in KERNEL_SIZES],
                            axis=1).astype(jnp.float32)                # (1, 384)

    # Pad classifier weights to lane width 128 (extra rows/cols are zeros -> no effect).
    wc1 = jnp.zeros((FC_INP_DIM, HIDDEN_PAD), jnp.bfloat16)
    wc1 = wc1.at[:, :HIDDEN].set(params["wc1"].astype(jnp.bfloat16))
    bc1 = jnp.zeros((1, HIDDEN_PAD), jnp.float32).at[:, :HIDDEN].set(params["bc1"])
    wc2 = jnp.zeros((HIDDEN_PAD, OUT_PAD), jnp.bfloat16)
    wc2 = wc2.at[:HIDDEN, :NUM_LABELS].set(params["wc2"].astype(jnp.bfloat16))
    bc2 = jnp.zeros((1, OUT_PAD), jnp.float32).at[:, :NUM_LABELS].set(params["bc2"])

    # NOTE: the weight operands are grid-invariant; pipeline_mode=pl.Buffered(1) would
    # save their second pipeline buffer (~2.3 MiB) but is left at the default for
    # portability across jax versions.
    def full_spec(shape):
        nd = len(shape)
        return pl.BlockSpec(shape, lambda i, _nd=nd: (0,) * _nd)

    kernel = functools.partial(cnn_forward_kernel, L=L, TL=TL, n_chunks=n_chunks)

    out = pl.pallas_call(
        kernel,
        out_shape=jax.ShapeDtypeStruct((B_pad, OUT_PAD), jnp.float32),
        grid=(B_pad // TB,),
        in_specs=[
            pl.BlockSpec((TB, L_kern, EMBED_DIM), lambda i: (i, 0, 0)),  # x tiled over batch
            full_spec((EMBED_DIM, FUSED_N)),                             # fused conv weight
            full_spec((1, FC_INP_DIM)),                                  # packed conv biases
            full_spec((FC_INP_DIM, HIDDEN_PAD)),
            full_spec((1, HIDDEN_PAD)),
            full_spec((HIDDEN_PAD, OUT_PAD)),
            full_spec((1, OUT_PAD)),
        ],
        out_specs=pl.BlockSpec((TB, OUT_PAD), lambda i: (i, 0)),
        compiler_params=pltpu.CompilerParams(
            dimension_semantics=("parallel",),        # megacore / v7x dual-TC batch split
            vmem_limit_bytes=int(budget),
        ),
    )(x, w_all, b_all, wc1, bc1, wc2, bc2)

    return out[:B, :NUM_LABELS]


def init_params(key):
    """Deterministic synthetic parameters matching the module's shapes.

    PyTorch Conv2d weight (128, 1, k, 768) is stored transposed as (k, 768, 128);
    Linear weights (out, in) are stored as (in, out) so the kernel does x @ W."""
    ks = jax.random.split(key, 10)

    def norm(k, shape, scale=0.02):
        return scale * jax.random.normal(k, shape, dtype=jnp.float32)

    params = {}
    for idx, ksize in enumerate(KERNEL_SIZES):
        params[f"w{ksize}"] = norm(ks[idx], (ksize, EMBED_DIM, NUM_KERNELS))
        params[f"b{ksize}"] = norm(ks[idx + 3], (1, NUM_KERNELS))
    params["wc1"] = norm(ks[6], (FC_INP_DIM, HIDDEN))
    params["bc1"] = norm(ks[7], (1, HIDDEN))
    params["wc2"] = norm(ks[8], (HIDDEN, NUM_LABELS))
    params["bc2"] = norm(ks[9], (1, NUM_LABELS))
    return params


def reference_forward(x, params):
    """Pure-JAX f32 reference matching the PyTorch forward (eval mode)."""
    feats = []
    L = x.shape[1]
    for ksize in KERNEL_SIZES:
        w, b = params[f"w{ksize}"], params[f"b{ksize}"]
        T = L - ksize + 1
        acc = jnp.zeros((x.shape[0], T, NUM_KERNELS), jnp.float32)
        for i in range(ksize):
            acc = acc + jnp.einsum("btd,dc->btc", x[:, i:i + T, :], w[i])
        acc = acc + b[None]
        feats.append(jnp.max(jax.nn.relu(acc), axis=1))
    feat = jnp.concatenate(feats, axis=1)
    h = jax.nn.relu(feat @ params["wc1"] + params["bc1"])
    return h @ params["wc2"] + params["bc2"]


if __name__ == "__main__":
    key = jax.random.PRNGKey(0)
    pkey, xkey = jax.random.split(key)
    params = init_params(pkey)

    B, L = 2, 16                                 # small batch / sequence length
    x = jax.random.normal(xkey, (B, L, EMBED_DIM), dtype=jnp.float32)

    out = cnn_model_forward(x, params)
    jax.block_until_ready(out)

    ref = reference_forward(x, params)
    assert out.shape == (B, NUM_LABELS), out.shape
    # bf16 matmul path -> relaxed tolerance vs the f32 reference
    max_err = float(jnp.max(jnp.abs(out - ref)))
    assert max_err < 2e-2, f"Pallas kernel mismatch vs reference (max abs err {max_err})"

    print("KERNEL_OK")
</pallas_src>

<mosaic_0001>
module attributes {stable_mosaic.version = 11 : i64} {
  func.func @cnn_forward_kernel(%arg0: i32, %arg1: memref<2x24x768xf32, #tpu.memory_space<vmem>>, %arg2: memref<768x1536xbf16, #tpu.memory_space<vmem>>, %arg3: memref<1x384xf32, #tpu.memory_space<vmem>>, %arg4: memref<384x128xbf16, #tpu.memory_space<vmem>>, %arg5: memref<1x128xf32, #tpu.memory_space<vmem>>, %arg6: memref<128x128xbf16, #tpu.memory_space<vmem>>, %arg7: memref<1x128xf32, #tpu.memory_space<vmem>>, %arg8: memref<2x128xf32, #tpu.memory_space<vmem>>) attributes {dimension_semantics = [#tpu.dimension_semantics<parallel>], iteration_bounds = array<i64: 1>, scalar_prefetch = 0 : i64, scratch_operands = 0 : i64, tpu.core_type = #tpu.core_type<tc>, window_params = [{transform_indices = @transform_0, window_bounds = array<i64: 2, 24, 768>}, {pipeline_mode = #tpu.pipeline_mode<synchronous>, transform_indices = @transform_1, window_bounds = array<i64: 768, 1536>}, {pipeline_mode = #tpu.pipeline_mode<synchronous>, transform_indices = @transform_2, window_bounds = array<i64: 1, 384>}, {pipeline_mode = #tpu.pipeline_mode<synchronous>, transform_indices = @transform_3, window_bounds = array<i64: 384, 128>}, {pipeline_mode = #tpu.pipeline_mode<synchronous>, transform_indices = @transform_4, window_bounds = array<i64: 1, 128>}, {pipeline_mode = #tpu.pipeline_mode<synchronous>, transform_indices = @transform_5, window_bounds = array<i64: 128, 128>}, {pipeline_mode = #tpu.pipeline_mode<synchronous>, transform_indices = @transform_6, window_bounds = array<i64: 1, 128>}, {transform_indices = @transform_7, window_bounds = array<i64: 2, 128>}]} {
    %c0 = arith.constant 0 : index
    %c0_0 = arith.constant 0 : index
    %0 = vector.load %arg2[%c0, %c0_0] : memref<768x1536xbf16, #tpu.memory_space<vmem>>, vector<768x1536xbf16>
    %1 = tpu.iota {dimensions = array<i32: 0>} : vector<24x128xi32>
    %c16_i32 = arith.constant 16 : i32
    %2 = vector.broadcast %c16_i32 : i32 to vector<24x128xi32>
    %3 = arith.cmpi slt, %1, %2 : vector<24x128xi32>
    %cst = arith.constant 0xFF800000 : f32
    %4 = vector.broadcast %cst : f32 to vector<2x384xf32>
    %c0_1 = arith.constant 0 : index
    %c0_2 = arith.constant 0 : index
    %c0_3 = arith.constant 0 : index
    %5 = vector.load %arg1[%c0_1, %c0_2, %c0_3] : memref<2x24x768xf32, #tpu.memory_space<vmem>>, vector<2x24x768xf32>
    %6 = arith.truncf %5 : vector<2x24x768xf32> to vector<2x24x768xbf16>
    %7 = vector.shape_cast %6 : vector<2x24x768xbf16> to vector<48x768xbf16>
    %cst_4 = arith.constant dense<0.000000e+00> : vector<48x1536xf32>
    %8 = tpu.matmul %7, %0, %cst_4 {dimension_numbers = #tpu.dot_dimension_numbers<[1], [0], [0], [1], [0, 0, 1, 1], [], []>} : vector<48x768xbf16>, vector<768x1536xbf16>, vector<48x1536xf32> -> vector<48x1536xf32>
    %c0_i32 = arith.constant 0 : i32
    %9 = vector.broadcast %c0_i32 : i32 to vector<24x128xi32>
    %10 = arith.addi %1, %9 : vector<24x128xi32>
    %11 = vector.extract_strided_slice %8 {offsets = [0, 0], sizes = [48, 128], strides = [1, 1]} : vector<48x1536xf32> to vector<48x128xf32>
    %12 = vector.extract_strided_slice %8 {offsets = [0, 128], sizes = [48, 128], strides = [1, 1]} : vector<48x1536xf32> to vector<48x128xf32>
    %c47_i32 = arith.constant 47 : i32
    %13 = tpu.dynamic_rotate %12 by %c47_i32 dim 0 : vector<48x128xf32>, i32 -> vector<48x128xf32>
    %14 = arith.addf %11, %13 : vector<48x128xf32>
    %15 = vector.extract_strided_slice %8 {offsets = [0, 256], sizes = [48, 128], strides = [1, 1]} : vector<48x1536xf32> to vector<48x128xf32>
    %c46_i32 = arith.constant 46 : i32
    %16 = tpu.dynamic_rotate %15 by %c46_i32 dim 0 : vector<48x128xf32>, i32 -> vector<48x128xf32>
    %17 = arith.addf %14, %16 : vector<48x128xf32>
    %18 = vector.shape_cast %17 : vector<48x128xf32> to vector<2x24x128xf32>
    %c13_i32 = arith.constant 13 : i32
    %19 = vector.broadcast %c13_i32 : i32 to vector<24x128xi32>
    %20 = arith.cmpi sle, %10, %19 : vector<24x128xi32>
    %21 = arith.andi %3, %20 : vector<24x128xi1>
    %cst_5 = arith.constant 0xFF800000 : f32
    %22 = vector.shape_cast %21 : vector<24x128xi1> to vector<1x24x128xi1>
    %23 = vector.broadcast %22 : vector<1x24x128xi1> to vector<2x24x128xi1>
    %24 = vector.broadcast %cst_5 : f32 to vector<2x24x128xf32>
    %25 = arith.select %23, %18, %24 : vector<2x24x128xi1>, vector<2x24x128xf32>
    %cst_6 = arith.constant dense<0xFF800000> : vector<2x128xf32>
    %26 = vector.multi_reduction <maximumf>, %25, %cst_6 [1] : vector<2x24x128xf32> to vector<2x128xf32>
    %27 = vector.extract_strided_slice %8 {offsets = [0, 384], sizes = [48, 128], strides = [1, 1]} : vector<48x1536xf32> to vector<48x128xf32>
    %28 = vector.extract_strided_slice %8 {offsets = [0, 512], sizes = [48, 128], strides = [1, 1]} : vector<48x1536xf32> to vector<48x128xf32>
    %c47_i32_7 = arith.constant 47 : i32
    %29 = tpu.dynamic_rotate %28 by %c47_i32_7 dim 0 : vector<48x128xf32>, i32 -> vector<48x128xf32>
    %30 = arith.addf %27, %29 : vector<48x128xf32>
    %31 = vector.extract_strided_slice %8 {offsets = [0, 640], sizes = [48, 128], strides = [1, 1]} : vector<48x1536xf32> to vector<48x128xf32>
    %c46_i32_8 = arith.constant 46 : i32
    %32 = tpu.dynamic_rotate %31 by %c46_i32_8 dim 0 : vector<48x128xf32>, i32 -> vector<48x128xf32>
    %33 = arith.addf %30, %32 : vector<48x128xf32>
    %34 = vector.extract_strided_slice %8 {offsets = [0, 768], sizes = [48, 128], strides = [1, 1]} : vector<48x1536xf32> to vector<48x128xf32>
    %c45_i32 = arith.constant 45 : i32
    %35 = tpu.dynamic_rotate %34 by %c45_i32 dim 0 : vector<48x128xf32>, i32 -> vector<48x128xf32>
    %36 = arith.addf %33, %35 : vector<48x128xf32>
    %37 = vector.shape_cast %36 : vector<48x128xf32> to vector<2x24x128xf32>
    %c12_i32 = arith.constant 12 : i32
    %38 = vector.broadcast %c12_i32 : i32 to vector<24x128xi32>
    %39 = arith.cmpi sle, %10, %38 : vector<24x128xi32>
    %40 = arith.andi %3, %39 : vector<24x128xi1>
    %cst_9 = arith.constant 0xFF800000 : f32
    %41 = vector.shape_cast %40 : vector<24x128xi1> to vector<1x24x128xi1>
    %42 = vector.broadcast %41 : vector<1x24x128xi1> to vector<2x24x128xi1>
    %43 = vector.broadcast %cst_9 : f32 to vector<2x24x128xf32>
    %44 = arith.select %42, %37, %43 : vector<2x24x128xi1>, vector<2x24x128xf32>
    %cst_10 = arith.constant dense<0xFF800000> : vector<2x128xf32>
    %45 = vector.multi_reduction <maximumf>, %44, %cst_10 [1] : vector<2x24x128xf32> to vector<2x128xf32>
    %46 = vector.extract_strided_slice %8 {offsets = [0, 896], sizes = [48, 128], strides = [1, 1]} : vector<48x1536xf32> to vector<48x128xf32>
    %47 = vector.extract_strided_slice %8 {offsets = [0, 1024], sizes = [48, 128], strides = [1, 1]} : vector<48x1536xf32> to vector<48x128xf32>
    %c47_i32_11 = arith.constant 47 : i32
    %48 = tpu.dynamic_rotate %47 by %c47_i32_11 dim 0 : vector<48x128xf32>, i32 -> vector<48x128xf32>
    %49 = arith.addf %46, %48 : vector<48x128xf32>
    %50 = vector.extract_strided_slice %8 {offsets = [0, 1152], sizes = [48, 128], strides = [1, 1]} : vector<48x1536xf32> to vector<48x128xf32>
    %c46_i32_12 = arith.constant 46 : i32
    %51 = tpu.dynamic_rotate %50 by %c46_i32_12 dim 0 : vector<48x128xf32>, i32 -> vector<48x128xf32>
    %52 = arith.addf %49, %51 : vector<48x128xf32>
    %53 = vector.extract_strided_slice %8 {offsets = [0, 1280], sizes = [48, 128], strides = [1, 1]} : vector<48x1536xf32> to vector<48x128xf32>
    %c45_i32_13 = arith.constant 45 : i32
    %54 = tpu.dynamic_rotate %53 by %c45_i32_13 dim 0 : vector<48x128xf32>, i32 -> vector<48x128xf32>
    %55 = arith.addf %52, %54 : vector<48x128xf32>
    %56 = vector.extract_strided_slice %8 {offsets = [0, 1408], sizes = [48, 128], strides = [1, 1]} : vector<48x1536xf32> to vector<48x128xf32>
    %c44_i32 = arith.constant 44 : i32
    %57 = tpu.dynamic_rotate %56 by %c44_i32 dim 0 : vector<48x128xf32>, i32 -> vector<48x128xf32>
    %58 = arith.addf %55, %57 : vector<48x128xf32>
    %59 = vector.shape_cast %58 : vector<48x128xf32> to vector<2x24x128xf32>
    %c11_i32 = arith.constant 11 : i32
    %60 = vector.broadcast %c11_i32 : i32 to vector<24x128xi32>
    %61 = arith.cmpi sle, %10, %60 : vector<24x128xi32>
    %62 = arith.andi %3, %61 : vector<24x128xi1>
    %cst_14 = arith.constant 0xFF800000 : f32
    %63 = vector.shape_cast %62 : vector<24x128xi1> to vector<1x24x128xi1>
    %64 = vector.broadcast %63 : vector<1x24x128xi1> to vector<2x24x128xi1>
    %65 = vector.broadcast %cst_14 : f32 to vector<2x24x128xf32>
    %66 = arith.select %64, %59, %65 : vector<2x24x128xi1>, vector<2x24x128xf32>
    %cst_15 = arith.constant dense<0xFF800000> : vector<2x128xf32>
    %67 = vector.multi_reduction <maximumf>, %66, %cst_15 [1] : vector<2x24x128xf32> to vector<2x128xf32>
    %68 = tpu.concatenate %26, %45, %67 in 1 : vector<2x128xf32>, vector<2x128xf32>, vector<2x128xf32> -> vector<2x384xf32>
    %69 = arith.maximumf %4, %68 : vector<2x384xf32>
    %c0_16 = arith.constant 0 : index
    %c0_17 = arith.constant 0 : index
    %70 = vector.load %arg3[%c0_16, %c0_17] : memref<1x384xf32, #tpu.memory_space<vmem>>, vector<1x384xf32>
    %71 = vector.broadcast %70 : vector<1x384xf32> to vector<2x384xf32>
    %72 = arith.addf %69, %71 : vector<2x384xf32>
    %cst_18 = arith.constant 0.000000e+00 : f32
    %73 = vector.broadcast %cst_18 : f32 to vector<2x384xf32>
    %74 = arith.maximumf %72, %73 : vector<2x384xf32>
    %75 = arith.truncf %74 : vector<2x384xf32> to vector<2x384xbf16>
    %c0_19 = arith.constant 0 : index
    %c0_20 = arith.constant 0 : index
    %76 = vector.load %arg4[%c0_19, %c0_20] : memref<384x128xbf16, #tpu.memory_space<vmem>>, vector<384x128xbf16>
    %cst_21 = arith.constant dense<0.000000e+00> : vector<2x128xf32>
    %77 = tpu.matmul %75, %76, %cst_21 {dimension_numbers = #tpu.dot_dimension_numbers<[1], [0], [0], [1], [0, 0, 1, 1], [], []>} : vector<2x384xbf16>, vector<384x128xbf16>, vector<2x128xf32> -> vector<2x128xf32>
    %c0_22 = arith.constant 0 : index
    %c0_23 = arith.constant 0 : index
    %78 = vector.load %arg5[%c0_22, %c0_23] : memref<1x128xf32, #tpu.memory_space<vmem>>, vector<1x128xf32>
    %79 = vector.broadcast %78 : vector<1x128xf32> to vector<2x128xf32>
    %80 = arith.addf %77, %79 : vector<2x128xf32>
    %cst_24 = arith.constant 0.000000e+00 : f32
    %81 = vector.broadcast %cst_24 : f32 to vector<2x128xf32>
    %82 = arith.maximumf %80, %81 : vector<2x128xf32>
    %83 = arith.truncf %82 : vector<2x128xf32> to vector<2x128xbf16>
    %c0_25 = arith.constant 0 : index
    %c0_26 = arith.constant 0 : index
    %84 = vector.load %arg6[%c0_25, %c0_26] : memref<128x128xbf16, #tpu.memory_space<vmem>>, vector<128x128xbf16>
    %cst_27 = arith.constant dense<0.000000e+00> : vector<2x128xf32>
    %85 = tpu.matmul %83, %84, %cst_27 {dimension_numbers = #tpu.dot_dimension_numbers<[1], [0], [0], [1], [0, 0, 1, 1], [], []>} : vector<2x128xbf16>, vector<128x128xbf16>, vector<2x128xf32> -> vector<2x128xf32>
    %c0_28 = arith.constant 0 : index
    %c0_29 = arith.constant 0 : index
    %86 = vector.load %arg7[%c0_28, %c0_29] : memref<1x128xf32, #tpu.memory_space<vmem>>, vector<1x128xf32>
    %87 = vector.broadcast %86 : vector<1x128xf32> to vector<2x128xf32>
    %88 = arith.addf %85, %87 : vector<2x128xf32>
    %c0_30 = arith.constant 0 : index
    %c0_31 = arith.constant 0 : index
    %89 = vector.load %arg8[%c0_30, %c0_31] : memref<2x128xf32, #tpu.memory_space<vmem>>, vector<2x128xf32>
    tpu.vector_store %arg8[%c0_30, %c0_31], %88 {strides = array<i32>} : memref<2x128xf32, #tpu.memory_space<vmem>>, vector<2x128xf32>,
    return
  }
  func.func @transform_0(%arg0: i32) -> (i32, i32, i32) {
    %c0_i32 = arith.constant 0 : i32
    %c0_i32_0 = arith.constant 0 : i32
    %c0_i32_1 = arith.constant 0 : i32
    return %arg0, %c0_i32, %c0_i32_0 : i32, i32, i32
  }
  func.func @transform_1(%arg0: i32) -> (i32, i32) {
    %c0_i32 = arith.constant 0 : i32
    %c0_i32_0 = arith.constant 0 : i32
    %c0_i32_1 = arith.constant 0 : i32
    return %c0_i32, %c0_i32_0 : i32, i32
  }
  func.func @transform_2(%arg0: i32) -> (i32, i32) {
    %c0_i32 = arith.constant 0 : i32
    %c0_i32_0 = arith.constant 0 : i32
    %c0_i32_1 = arith.constant 0 : i32
    return %c0_i32, %c0_i32_0 : i32, i32
  }
  func.func @transform_3(%arg0: i32) -> (i32, i32) {
    %c0_i32 = arith.constant 0 : i32
    %c0_i32_0 = arith.constant 0 : i32
    %c0_i32_1 = arith.constant 0 : i32
    return %c0_i32, %c0_i32_0 : i32, i32
  }
  func.func @transform_4(%arg0: i32) -> (i32, i32) {
    %c0_i32 = arith.constant 0 : i32
    %c0_i32_0 = arith.constant 0 : i32
    %c0_i32_1 = arith.constant 0 : i32
    return %c0_i32, %c0_i32_0 : i32, i32
  }
  func.func @transform_5(%arg0: i32) -> (i32, i32) {
    %c0_i32 = arith.constant 0 : i32
    %c0_i32_0 = arith.constant 0 : i32
    %c0_i32_1 = arith.constant 0 : i32
    return %c0_i32, %c0_i32_0 : i32, i32
  }
  func.func @transform_6(%arg0: i32) -> (i32, i32) {
    %c0_i32 = arith.constant 0 : i32
    %c0_i32_0 = arith.constant 0 : i32
    %c0_i32_1 = arith.constant 0 : i32
    return %c0_i32, %c0_i32_0 : i32, i32
  }
  func.func @transform_7(%arg0: i32) -> (i32, i32) {
    %c0_i32 = arith.constant 0 : i32
    %c0_i32_0 = arith.constant 0 : i32
    return %arg0, %c0_i32 : i32, i32
  }
}

</mosaic_0001>

<bundles_post_ra>
// kernel: cnn_model_forward.1
= control target key start
LH: loop header
LB: loop body
LE: loop exit
PB: predicated region body
PF: predicated region fallthrough
CT: control target
= control target key end

     0   :  { %s9616_s0 = inlined_call_operand.vmem [shape: f32[2,24,768], index: 0, kind: input, shape index: {}]   ;;  %s9617_s1 = inlined_call_operand.vmem [shape: bf16[768,1536], index: 1, kind: input, shape index: {}]   ;;  %s9618_s2 = inlined_call_operand.vmem [shape: f32[1,384], index: 2, kind: input, shape index: {}]   ;;  %s9619_s3 = inlined_call_operand.vmem [shape: bf16[384,128], index: 3, kind: input, shape index: {}]   ;;  %s9620_s4 = inlined_call_operand.vmem [shape: f32[1,128], index: 4, kind: input, shape index: {}]   ;;  %s9621_s5 = inlined_call_operand.vmem [shape: bf16[128,128], index: 5, kind: input, shape index: {}]   ;;  %s9622_s6 = inlined_call_operand.vmem [shape: f32[1,128], index: 6, kind: input, shape index: {}]   ;;  %s9623_s7 = inlined_call_operand.hbm [shape: f32[2,128], index: 7, kind: output, shape index: {}]  }
   0x1   :  { %v6296_v0 = vld [vmem:[%s9617_s1 + $0x4] ss:$48 sps:$4 sm:$0xff]   ;;  %v6298_v1 = vld [vmem:[%s9617_s1 + $0xc] ss:$48 sps:$4 sm:$0xff]   ;;  %v6300_v2 = vld [vmem:[%s9617_s1] ss:$48 sps:$4 sm:$0xff]  }
   0x2   :  { %3647 = vmatprep.subr.bf16.mxu0 %v6296_v0  ;;  %v6301_v3 = vld [vmem:[%s9617_s1 + $0x8] ss:$48 sps:$4 sm:$0xff]   ;;  %3836 = vmatprep.subr.bf16.mxu1 %v6298_v1  ;;  %v6302_v4 = vld [vmem:[%s9617_s1 + $0x64] ss:$48 sps:$4 sm:$0xff]   ;;  %v6304_v5 = vld [vmem:[%s9617_s1 + $0x6c] ss:$48 sps:$4 sm:$0xff]  }
   0x3   :  { %3648 = vmatpush1.bf16.msra.mxu0 %v6300_v2  ;;  %3837 = vmatpush1.bf16.msra.mxu1 %v6301_v3  ;;  %v6306_v6 = vld [vmem:[%s9617_s1 + $0x60] ss:$48 sps:$4 sm:$0xff]   ;;  %v6307_v7 = vld [vmem:[%s9617_s1 + $0x68] ss:$48 sps:$4 sm:$0xff]   ;;  %v6308_v8 = vld [vmem:[%s9617_s1 + $0xc4] ss:$48 sps:$4 sm:$0xff]  }
   0x4   :  { %3649 = vmatprep.subr.bf16.mxu0 %v6302_v4  ;;  %3838 = vmatprep.subr.bf16.mxu1 %v6304_v5  ;;  %v6310_v9 = vld [vmem:[%s9617_s1 + $0xcc] ss:$48 sps:$4 sm:$0xff]   ;;  %v6312_v10 = vld [vmem:[%s9617_s1 + $0xc0] ss:$48 sps:$4 sm:$0xff]   ;;  %v6313_v11 = vld [vmem:[%s9617_s1 + $0xc8] ss:$48 sps:$4 sm:$0xff]  }
   0x5   :  { %v6314_v12 = vld [vmem:[%s9617_s1 + $0x124] ss:$48 sps:$4 sm:$0xff]   ;;  %v6316_v13 = vld [vmem:[%s9617_s1 + $0x12c] ss:$48 sps:$4 sm:$0xff]   ;;  %v6318_v14 = vld [vmem:[%s9617_s1 + $0x120] ss:$48 sps:$4 sm:$0xff]  }
   0x6   :  { %v6319_v15 = vld [vmem:[%s9617_s1 + $0x128] ss:$48 sps:$4 sm:$0xff]   ;;  %v6320_v16 = vld [vmem:[%s9617_s1 + $0x184] ss:$48 sps:$4 sm:$0xff]   ;;  %v6322_v17 = vld [vmem:[%s9617_s1 + $0x18c] ss:$48 sps:$4 sm:$0xff]  }
   0x7   :  { %3650 = vmatpush1.bf16.msra.mxu0 %v6306_v6  ;;  %3839 = vmatpush1.bf16.msra.mxu1 %v6307_v7  ;;  %v6324_v18 = vld [vmem:[%s9617_s1 + $0x180] ss:$48 sps:$4 sm:$0xff]   ;;  %v6325_v19 = vld [vmem:[%s9617_s1 + $0x188] ss:$48 sps:$4 sm:$0xff]   ;;  %v6326_v20 = vld [vmem:[%s9617_s1 + $0x1e4] ss:$48 sps:$4 sm:$0xff]  }
   0x8   :  { %3651 = vmatprep.subr.bf16.mxu0 %v6308_v8  ;;  %3840 = vmatprep.subr.bf16.mxu1 %v6310_v9  ;;  %v6328_v21 = vld [vmem:[%s9617_s1 + $0x1ec] ss:$48 sps:$4 sm:$0xff]   ;;  %v6330_v22 = vld [vmem:[%s9617_s1 + $0x1e0] ss:$48 sps:$4 sm:$0xff]   ;;  %v6331_v23 = vld [vmem:[%s9617_s1 + $0x1e8] ss:$48 sps:$4 sm:$0xff]  }
   0x9   :  { %v6332_v24 = vld [vmem:[%s9617_s1 + $0x244] ss:$48 sps:$4 sm:$0xff]   ;;  %v6334_v25 = vld [vmem:[%s9617_s1 + $0x24c] ss:$48 sps:$4 sm:$0xff]   ;;  %v6336_v26 = vld [vmem:[%s9617_s1 + $0x240] ss:$48 sps:$4 sm:$0xff]  }
   0xa   :  { %v6337_v27 = vld [vmem:[%s9617_s1 + $0x248] ss:$48 sps:$4 sm:$0xff]   ;;  %v6338_v28 = vld [vmem:[%s9617_s1 + $0x2a4] ss:$48 sps:$4 sm:$0xff]   ;;  %v6340_v29 = vld [vmem:[%s9617_s1 + $0x2ac] ss:$48 sps:$4 sm:$0xff]  }
   0xb   :  { %3652 = vmatpush1.bf16.msra.mxu0 %v6312_v10  ;;  %3841 = vmatpush1.bf16.msra.mxu1 %v6313_v11  ;;  %v6342_v30 = vld [vmem:[%s9617_s1 + $0x2a0] ss:$48 sps:$4 sm:$0xff]   ;;  %v6343_v31 = vld [vmem:[%s9617_s1 + $0x2a8] ss:$48 sps:$4 sm:$0xff]   ;;  %v6344_v32 = vld [vmem:[%s9617_s1 + $0x304] ss:$48 sps:$4 sm:$0xff]  }
   0xc   :  { %3653 = vmatprep.subr.bf16.mxu0 %v6314_v12  ;;  %3842 = vmatprep.subr.bf16.mxu1 %v6316_v13  ;;  %v6346_v33 = vld [vmem:[%s9617_s1 + $0x30c] ss:$48 sps:$4 sm:$0xff]   ;;  %v6348_v34 = vld [vmem:[%s9617_s1 + $0x300] ss:$48 sps:$4 sm:$0xff]   ;;  %v6349_v35 = vld [vmem:[%s9617_s1 + $0x308] ss:$48 sps:$4 sm:$0xff]  }
   0xd   :  { %v6350_v36 = vld [vmem:[%s9617_s1 + $0x364] ss:$48 sps:$4 sm:$0xff]   ;;  %v6352_v37 = vld [vmem:[%s9617_s1 + $0x36c] ss:$48 sps:$4 sm:$0xff]   ;;  %v6354_v38 = vld [vmem:[%s9617_s1 + $0x360] ss:$48 sps:$4 sm:$0xff]  }
   0xe   :  { %v6355_v39 = vld [vmem:[%s9617_s1 + $0x368] ss:$48 sps:$4 sm:$0xff]   ;;  %v6356_v40 = vld [vmem:[%s9617_s1 + $0x3c4] ss:$48 sps:$4 sm:$0xff]   ;;  %v6358_v41 = vld [vmem:[%s9617_s1 + $0x3cc] ss:$48 sps:$4 sm:$0xff]  }
   0xf   :  { %3654 = vmatpush1.bf16.msra.mxu0 %v6318_v14  ;;  %3843 = vmatpush1.bf16.msra.mxu1 %v6319_v15  ;;  %v6360_v42 = vld [vmem:[%s9617_s1 + $0x3c0] ss:$48 sps:$4 sm:$0xff]   ;;  %v6361_v43 = vld [vmem:[%s9617_s1 + $0x3c8] ss:$48 sps:$4 sm:$0xff]   ;;  %v6362_v44 = vld [vmem:[%s9617_s1 + $0x424] ss:$48 sps:$4 sm:$0xff]  }
  0x10   :  { %3655 = vmatprep.subr.bf16.mxu0 %v6320_v16  ;;  %3844 = vmatprep.subr.bf16.mxu1 %v6322_v17  ;;  %v6364_v45 = vld [vmem:[%s9617_s1 + $0x42c] ss:$48 sps:$4 sm:$0xff]   ;;  %v6366_v48 = vld [vmem:[%s9617_s1 + $0x420] ss:$48 sps:$4 sm:$0xff]   ;;  %v6367_v49 = vld [vmem:[%s9617_s1 + $0x428] ss:$48 sps:$4 sm:$0xff]  }
  0x11   :  { %v612_v46 = vld [vmem:[%s9616_s0 + $0x8] sm:$0xff]  ;;  %v618_v47 = vld [vmem:[%s9616_s0 + $0x38] sm:$0xff]  ;;  %v6368_v51 = vld [vmem:[%s9617_s1 + $0x484] ss:$48 sps:$4 sm:$0xff]  }
  0x12   :  { %v7409_v50 = vpack.c.bf16 %v618_v47, %v612_v46  ;;  %v6370_v52 = vld [vmem:[%s9617_s1 + $0x48c] ss:$48 sps:$4 sm:$0xff]   ;;  %v6372_v53 = vld [vmem:[%s9617_s1 + $0x480] ss:$48 sps:$4 sm:$0xff]   ;;  %v6373_v54 = vld [vmem:[%s9617_s1 + $0x488] ss:$48 sps:$4 sm:$0xff]  }
  0x13   :  { %3656 = vmatpush1.bf16.msra.mxu0 %v6324_v18  ;;  %3845 = vmatpush1.bf16.msra.mxu1 %v6325_v19  ;;  %v6374_v55 = vld [vmem:[%s9617_s1 + $0x4e4] ss:$48 sps:$4 sm:$0xff]   ;;  %v6376_v56 = vld [vmem:[%s9617_s1 + $0x4ec] ss:$48 sps:$4 sm:$0xff]   ;;  %v6378_v57 = vld [vmem:[%s9617_s1 + $0x4e0] ss:$48 sps:$4 sm:$0xff]  }
  0x14   :  { %3657 = vmatprep.subr.bf16.mxu0 %v6326_v20  ;;  %3846 = vmatprep.subr.bf16.mxu1 %v6328_v21  ;;  %v6379_v58 = vld [vmem:[%s9617_s1 + $0x4e8] ss:$48 sps:$4 sm:$0xff]   ;;  %v6380_v59 = vld [vmem:[%s9617_s1 + $0x544] ss:$48 sps:$4 sm:$0xff]   ;;  %v6382_v60 = vld [vmem:[%s9617_s1 + $0x54c] ss:$48 sps:$4 sm:$0xff]  }
  0x15   :  { %3679 = vmatprep.mubr.bf16.mxu0 %v7409_v50  ;;  %3868 = vmatprep.mubr.bf16.mxu1 %v7409_v50  ;;  %v6384_v61 = vld [vmem:[%s9617_s1 + $0x540] ss:$48 sps:$4 sm:$0xff]   ;;  %v6385_v62 = vld [vmem:[%s9617_s1 + $0x548] ss:$48 sps:$4 sm:$0xff]   ;;  %v6386_v63 = vld [vmem:[%s9617_s1 + $0x5a4] ss:$48 sps:$4 sm:$0xff]  }
  0x16   :  { %v6388_v0 = vld [vmem:[%s9617_s1 + $0x5ac] ss:$48 sps:$4 sm:$0xff]   ;;  %v6390_v1 = vld [vmem:[%s9617_s1 + $0x5a0] ss:$48 sps:$4 sm:$0xff]   ;;  %v6391_v2 = vld [vmem:[%s9617_s1 + $0x5a8] ss:$48 sps:$4 sm:$0xff]  }
  0x17   :  { %3658 = vmatpush1.bf16.msra.mxu0 %v6330_v22  ;;  %3847 = vmatpush1.bf16.msra.mxu1 %v6331_v23  ;;  %v6394_v3 = vld [vmem:[%s9617_s1 + $0x604] ss:$48 sps:$4 sm:$0xff]   ;;  %v6397_v6 = vld [vmem:[%s9617_s1 + $0x60c] ss:$48 sps:$4 sm:$0xff]   ;;  %v6392_v7 = vld [vmem:[%s9617_s1 + $0x600] ss:$48 sps:$4 sm:$0xff]  }
  0x18   :  { %3659 = vmatprep.subr.bf16.mxu0 %v6332_v24  ;;  %3848 = vmatprep.subr.bf16.mxu1 %v6334_v25  ;;  %v611_v4 = vld [vmem:[%s9616_s0] sm:$0xff]  ;;  %v617_v5 = vld [vmem:[%s9616_s0 + $0x30] sm:$0xff]  ;;  %v6395_v8 = vld [vmem:[%s9617_s1 + $0x608] ss:$48 sps:$4 sm:$0xff]  }
  0x19   :  { %v7479_v9 = vpack.c.bf16 %v617_v5, %v611_v4  ;;  %v6400_v10 = vld [vmem:[%s9617_s1 + $0x664] ss:$48 sps:$4 sm:$0xff]   ;;  %v6403_v11 = vld [vmem:[%s9617_s1 + $0x66c] ss:$48 sps:$4 sm:$0xff]   ;;  %v6398_v12 = vld [vmem:[%s9617_s1 + $0x660] ss:$48 sps:$4 sm:$0xff]  }
  0x1a   :  { %v6401_v13 = vld [vmem:[%s9617_s1 + $0x668] ss:$48 sps:$4 sm:$0xff]   ;;  %v6406_v14 = vld [vmem:[%s9617_s1 + $0x6c4] ss:$48 sps:$4 sm:$0xff]   ;;  %v6409_v15 = vld [vmem:[%s9617_s1 + $0x6cc] ss:$48 sps:$4 sm:$0xff]  }
  0x1b   :  { %3660 = vmatpush1.bf16.msra.mxu0 %v6336_v26  ;;  %3849 = vmatpush1.bf16.msra.mxu1 %v6337_v27  ;;  %v6404_v16 = vld [vmem:[%s9617_s1 + $0x6c0] ss:$48 sps:$4 sm:$0xff]   ;;  %v6407_v17 = vld [vmem:[%s9617_s1 + $0x6c8] ss:$48 sps:$4 sm:$0xff]   ;;  %v6412_v18 = vld [vmem:[%s9617_s1 + $0x724] ss:$48 sps:$4 sm:$0xff]  }
  0x1c   :  { %3661 = vmatprep.subr.bf16.mxu0 %v6338_v28  ;;  %3850 = vmatprep.subr.bf16.mxu1 %v6340_v29  ;;  %v6415_v19 = vld [vmem:[%s9617_s1 + $0x72c] ss:$48 sps:$4 sm:$0xff]   ;;  %v6410_v20 = vld [vmem:[%s9617_s1 + $0x720] ss:$48 sps:$4 sm:$0xff]   ;;  %v6413_v21 = vld [vmem:[%s9617_s1 + $0x728] ss:$48 sps:$4 sm:$0xff]  }
  0x1d   :  { %v6418_v22 = vld [vmem:[%s9617_s1 + $0x784] ss:$48 sps:$4 sm:$0xff]   ;;  %v6421_v23 = vld [vmem:[%s9617_s1 + $0x78c] ss:$48 sps:$4 sm:$0xff]   ;;  %v6446_v4 = vld [vmem:[%s9617_s1 + $0x960] ss:$48 sps:$4 sm:$0xff]  }
  0x1e   :  { %v624_v24 = vld [vmem:[%s9616_s0 + $0x68] sm:$0xff]  ;;  %v630_v25 = vld [vmem:[%s9616_s0 + $0x98] sm:$0xff]  ;;  %v623_v28 = vld [vmem:[%s9616_s0 + $0x60] sm:$0xff] }
  0x1f   :  { %3662 = vmatpush1.bf16.msra.mxu0 %v6342_v30  ;;  %3851 = vmatpush1.bf16.msra.mxu1 %v6343_v31  ;;  %v636_v26 = vld [vmem:[%s9616_s0 + $0xc8] sm:$0xff]  ;;  %v7534_v27 = vpack.c.bf16 %v630_v25, %v624_v24  ;;  %v629_v29 = vld [vmem:[%s9616_s0 + $0x90] sm:$0xff]  ;;  %v635_v30 = vld [vmem:[%s9616_s0 + $0xc0] sm:$0xff] }
  0x20   :  { %3663 = vmatprep.subr.bf16.mxu0 %v6344_v32  ;;  %3852 = vmatprep.subr.bf16.mxu1 %v6346_v33  ;;  %v7545_v31 = vpack.c.bf16 %v629_v29, %v623_v28  ;;  %v6416_v32 = vld [vmem:[%s9617_s1 + $0x780] ss:$48 sps:$4 sm:$0xff]   ;;  %v6419_v33 = vld [vmem:[%s9617_s1 + $0x788] ss:$48 sps:$4 sm:$0xff]   ;;  %v6433_v47 = vld [vmem:[%s9617_s1 + $0x84c] ss:$48 sps:$4 sm:$0xff]  }
  0x21   :  { %v6449_v5 = vld [vmem:[%s9617_s1 + $0x968] ss:$48 sps:$4 sm:$0xff]   ;;  %v6481_v24 = vld [vmem:[%s9617_s1 + $0xb4c] ss:$48 sps:$4 sm:$0xff]   ;;  %v6484_v28 = vld [vmem:[%s9617_s1 + $0xba4] ss:$48 sps:$4 sm:$0xff]  }
  0x23   :  { %3664 = vmatpush1.bf16.msra.mxu0 %v6348_v34  ;;  %3853 = vmatpush1.bf16.msra.mxu1 %v6349_v35  ;;  %v660_v34 = vpack.c.bf16 %v636_v26, %v630_v25  ;;  %v659_v35 = vpack.c.bf16 %v635_v30, %v629_v29  ;;  %v6476_v25 = vld [vmem:[%s9617_s1 + $0xb40] ss:$48 sps:$4 sm:$0xff]   ;;  %v6479_v26 = vld [vmem:[%s9617_s1 + $0xb48] ss:$48 sps:$4 sm:$0xff]   ;;  %v6487_v29 = vld [vmem:[%s9617_s1 + $0xbac] ss:$48 sps:$4 sm:$0xff]  }
  0x24   :  { %3665 = vmatprep.subr.bf16.mxu0 %v6350_v36  ;;  %3854 = vmatprep.subr.bf16.mxu1 %v6352_v37  ;;  %v6424_v36 = vld [vmem:[%s9617_s1 + $0x7e4] ss:$48 sps:$4 sm:$0xff]   ;;  %v6427_v37 = vld [vmem:[%s9617_s1 + $0x7ec] ss:$48 sps:$4 sm:$0xff]   ;;  %v6482_v30 = vld [vmem:[%s9617_s1 + $0xba0] ss:$48 sps:$4 sm:$0xff]  }
  0x25   :  { %v719_v46 = vunpack.c.h.b16 %v659_v35  ;;  %v6490_v35 = vld [vmem:[%s9617_s1 + $0xc04] ss:$48 sps:$4 sm:$0xff]  }
  0x27   :  { %3666 = vmatpush1.bf16.msra.mxu0 %v6354_v38  ;;  %3855 = vmatpush1.bf16.msra.mxu1 %v6355_v39  ;;  %v6422_v38 = vld [vmem:[%s9617_s1 + $0x7e0] ss:$48 sps:$4 sm:$0xff]   ;;  %v6425_v39 = vld [vmem:[%s9617_s1 + $0x7e8] ss:$48 sps:$4 sm:$0xff]  }
  0x28   :  { %3667 = vmatprep.subr.bf16.mxu0 %v6356_v40  ;;  %3856 = vmatprep.subr.bf16.mxu1 %v6358_v41  ;;  %v642_v40 = vld [vmem:[%s9616_s0 + $0xf8] sm:$0xff]  ;;  %v641_v41 = vld [vmem:[%s9616_s0 + $0xf0] sm:$0xff] }
  0x2b   :  { %3668 = vmatpush1.bf16.msra.mxu0 %v6360_v42  ;;  %3857 = vmatpush1.bf16.msra.mxu1 %v6361_v43  ;;  %v6430_v42 = vld [vmem:[%s9617_s1 + $0x844] ss:$48 sps:$4 sm:$0xff]   ;;  %v666_v43 = vpack.c.bf16 %v642_v40, %v642_v40  ;;  %v632_v40 = vld [vmem:[%s9616_s0 + $0xa8] sm:$0xff] }
  0x2c   :  { %3669 = vmatprep.subr.bf16.mxu0 %v6362_v44  ;;  %3858 = vmatprep.subr.bf16.mxu1 %v6364_v45  ;;  %v720_v44 = vunpack.c.h.b16 %v660_v34  ;;  %v665_v45 = vpack.c.bf16 %v641_v41, %v641_v41  ;;  %v619_v34 = vld [vmem:[%s9616_s0 + $0x40] sm:$0xff] }
  0x2f   :  { %3670 = vmatpush1.bf16.msra.mxu0 %v6366_v48  ;;  %3859 = vmatpush1.bf16.msra.mxu1 %v6367_v49  ;;  %v726_v48 = vunpack.c.l.b16 %v666_v43  ;;  %v725_v49 = vunpack.c.l.b16 %v665_v45  ;;  %v644_v43 = vld [vmem:[%s9616_s0 + $0x108] sm:$0xff] }
  0x30   :  { %3671 = vmatprep.subr.bf16.mxu0 %v6368_v51  ;;  %3860 = vmatprep.subr.bf16.mxu1 %v6370_v52  ;;  %v6428_v51 = vld [vmem:[%s9617_s1 + $0x840] ss:$48 sps:$4 sm:$0xff]   ;;  %v6431_v52 = vld [vmem:[%s9617_s1 + $0x848] ss:$48 sps:$4 sm:$0xff]   ;;  %v6499_v45 = vld [vmem:[%s9617_s1 + $0xc6c] ss:$48 sps:$4 sm:$0xff]  }
  0x33   :  { %3672 = vmatpush1.bf16.msra.mxu0 %v6372_v53  ;;  %3861 = vmatpush1.bf16.msra.mxu1 %v6373_v54  ;;  %v6436_v53 = vld [vmem:[%s9617_s1 + $0x8a4] ss:$48 sps:$4 sm:$0xff]   ;;  %v7590_v54 = vpack.c.b16 %v726_v48, %v720_v44 }
  0x34   :  { %3673 = vmatprep.subr.bf16.mxu0 %v6374_v55  ;;  %3862 = vmatprep.subr.bf16.mxu1 %v6376_v56  ;;  %v7592_v55 = vpack.c.b16 %v725_v49, %v719_v46  ;;  %v6439_v56 = vld [vmem:[%s9617_s1 + $0x8ac] ss:$48 sps:$4 sm:$0xff]   ;;  %v6496_v44 = vld [vmem:[%s9617_s1 + $0xc64] ss:$48 sps:$4 sm:$0xff]   ;;  %v6494_v46 = vld [vmem:[%s9617_s1 + $0xc60] ss:$48 sps:$4 sm:$0xff]  }
  0x37   :  { %3674 = vmatpush1.bf16.msra.mxu0 %v6378_v57  ;;  %3863 = vmatpush1.bf16.msra.mxu1 %v6379_v58  ;;  %v614_v57 = vld [vmem:[%s9616_s0 + $0x18] sm:$0xff]  ;;  %v620_v58 = vld [vmem:[%s9616_s0 + $0x48] sm:$0xff] }
  0x38   :  { %3675 = vmatprep.subr.bf16.mxu0 %v6380_v59  ;;  %3864 = vmatprep.subr.bf16.mxu1 %v6382_v60  ;;  %v7605_v59 = vpack.c.bf16 %v620_v58, %v614_v57  ;;  %v6434_v60 = vld [vmem:[%s9617_s1 + $0x8a0] ss:$48 sps:$4 sm:$0xff]   ;;  %v6502_v57 = vld [vmem:[%s9617_s1 + $0xcc4] ss:$48 sps:$4 sm:$0xff]  }
  0x39   :  { %v643_v58 = vld [vmem:[%s9616_s0 + $0x100] sm:$0xff] }
  0x3b   :  { %3676 = vmatpush1.bf16.msra.mxu0 %v6384_v61  ;;  %3865 = vmatpush1.bf16.msra.mxu1 %v6385_v62  ;;  %v6437_v61 = vld [vmem:[%s9617_s1 + $0x8a8] ss:$48 sps:$4 sm:$0xff]   ;;  %v6442_v62 = vld [vmem:[%s9617_s1 + $0x904] ss:$48 sps:$4 sm:$0xff]  }
  0x3c   :  { %3677 = vmatprep.subr.bf16.mxu0 %v6386_v63  ;;  %3866 = vmatprep.subr.bf16.mxu1 %v6388_v0  ;;  %v6445_v63 = vld [vmem:[%s9617_s1 + $0x90c] ss:$48 sps:$4 sm:$0xff]   ;;  %v6440_v0 = vld [vmem:[%s9617_s1 + $0x900] ss:$48 sps:$4 sm:$0xff]  }
  0x3f   :  { %3678 = vmatpush1.bf16.msra.mxu0 %v6390_v1  ;;  %3867 = vmatpush1.bf16.msra.mxu1 %v6391_v2  ;;  %v6443_v1 = vld [vmem:[%s9617_s1 + $0x908] ss:$48 sps:$4 sm:$0xff]   ;;  %v6448_v2 = vld [vmem:[%s9617_s1 + $0x964] ss:$48 sps:$4 sm:$0xff]  }
  0x40   :  { %3710 = vmatprep.subr.bf16.mxu0 %v6394_v3  ;;  %3899 = vmatprep.subr.bf16.mxu1 %v6397_v6  ;;  %v6451_v3 = vld [vmem:[%s9617_s1 + $0x96c] ss:$48 sps:$4 sm:$0xff]   ;;  %v6454_v6 = vld [vmem:[%s9617_s1 + $0x9c4] ss:$48 sps:$4 sm:$0xff]  }
  0x42   :  { %3680 = vmatmul.mubr.bf16.vlgmr.msra.gmra.mrb[0].mxu0 %v7479_v9  ;;  %3869 = vmatmul.mubr.bf16.vlgmr.msra.gmra.mrb[0].mxu1 %v7479_v9 }
  0x43   :  { %3711 = vmatpush1.bf16.msra.mxu0 %v6392_v7  ;;  %3900 = vmatpush1.bf16.msra.mxu1 %v6395_v8  ;;  %v6457_v7 = vld [vmem:[%s9617_s1 + $0x9cc] ss:$48 sps:$4 sm:$0xff]   ;;  %v6452_v8 = vld [vmem:[%s9617_s1 + $0x9c0] ss:$48 sps:$4 sm:$0xff]  }
  0x44   :  { %3712 = vmatprep.subr.bf16.mxu0 %v6400_v10  ;;  %3901 = vmatprep.subr.bf16.mxu1 %v6403_v11  ;;  %v6455_v10 = vld [vmem:[%s9617_s1 + $0x9c8] ss:$48 sps:$4 sm:$0xff]   ;;  %v6460_v11 = vld [vmem:[%s9617_s1 + $0xa24] ss:$48 sps:$4 sm:$0xff]  }
  0x45   :  { %3689 = vmatprep.mubr.bf16.mxu0 %v7534_v27  ;;  %3878 = vmatprep.mubr.bf16.mxu1 %v7534_v27 }
  0x47   :  { %3713 = vmatpush1.bf16.msra.mxu0 %v6398_v12  ;;  %3902 = vmatpush1.bf16.msra.mxu1 %v6401_v13  ;;  %v6463_v12 = vld [vmem:[%s9617_s1 + $0xa2c] ss:$48 sps:$4 sm:$0xff]   ;;  %v6458_v13 = vld [vmem:[%s9617_s1 + $0xa20] ss:$48 sps:$4 sm:$0xff]  }
  0x48   :  { %3714 = vmatprep.subr.bf16.mxu0 %v6406_v14  ;;  %3903 = vmatprep.subr.bf16.mxu1 %v6409_v15  ;;  %v6461_v14 = vld [vmem:[%s9617_s1 + $0xa28] ss:$48 sps:$4 sm:$0xff]   ;;  %v6466_v15 = vld [vmem:[%s9617_s1 + $0xa84] ss:$48 sps:$4 sm:$0xff]  }
  0x4a   :  { %3690 = vmatmul.mubr.bf16.gmra.mrb[4].mxu0 %v7545_v31  ;;  %3879 = vmatmul.mubr.bf16.gmra.mrb[4].mxu1 %v7545_v31 }
  0x4b   :  { %3715 = vmatpush1.bf16.msra.mxu0 %v6404_v16  ;;  %3904 = vmatpush1.bf16.msra.mxu1 %v6407_v17  ;;  %v6469_v16 = vld [vmem:[%s9617_s1 + $0xa8c] ss:$48 sps:$4 sm:$0xff]   ;;  %v6464_v17 = vld [vmem:[%s9617_s1 + $0xa80] ss:$48 sps:$4 sm:$0xff]  }
  0x4c   :  { %3716 = vmatprep.subr.bf16.mxu0 %v6412_v18  ;;  %3905 = vmatprep.subr.bf16.mxu1 %v6415_v19  ;;  %v6467_v18 = vld [vmem:[%s9617_s1 + $0xa88] ss:$48 sps:$4 sm:$0xff]   ;;  %v6472_v19 = vld [vmem:[%s9617_s1 + $0xae4] ss:$48 sps:$4 sm:$0xff]  }
  0x4d   :  { %3699 = vmatprep.mubr.bf16.mxu0 %v7590_v54  ;;  %3888 = vmatprep.mubr.bf16.mxu1 %v7590_v54 }
  0x4f   :  { %3717 = vmatpush1.bf16.msra.mxu0 %v6410_v20  ;;  %3906 = vmatpush1.bf16.msra.mxu1 %v6413_v21  ;;  %v6475_v20 = vld [vmem:[%s9617_s1 + $0xaec] ss:$48 sps:$4 sm:$0xff]   ;;  %v6470_v21 = vld [vmem:[%s9617_s1 + $0xae0] ss:$48 sps:$4 sm:$0xff]  }
  0x50   :  { %3718 = vmatprep.subr.bf16.mxu0 %v6418_v22  ;;  %3907 = vmatprep.subr.bf16.mxu1 %v6421_v23  ;;  %v6473_v22 = vld [vmem:[%s9617_s1 + $0xae8] ss:$48 sps:$4 sm:$0xff]   ;;  %v6478_v23 = vld [vmem:[%s9617_s1 + $0xb44] ss:$48 sps:$4 sm:$0xff]  }
  0x52   :  { %3700 = vmatmul.mubr.bf16.gmra.mrb[8].mxu0 %v7592_v55  ;;  %3889 = vmatmul.mubr.bf16.gmra.mrb[8].mxu1 %v7592_v55 }
  0x53   :  { %3719 = vmatpush1.bf16.msra.mxu0 %v6416_v32  ;;  %3908 = vmatpush1.bf16.msra.mxu1 %v6419_v33  ;;  %v6485_v32 = vld [vmem:[%s9617_s1 + $0xba8] ss:$48 sps:$4 sm:$0xff]   ;;  %v613_v33 = vld [vmem:[%s9616_s0 + $0x10] sm:$0xff] }
  0x54   :  { %3720 = vmatprep.subr.bf16.mxu0 %v6424_v36  ;;  %3909 = vmatprep.subr.bf16.mxu1 %v6427_v37  ;;  %v6493_v36 = vld [vmem:[%s9617_s1 + $0xc0c] ss:$48 sps:$4 sm:$0xff]   ;;  %v6488_v37 = vld [vmem:[%s9617_s1 + $0xc00] ss:$48 sps:$4 sm:$0xff]   ;;  %v7737_v41 = vpack.c.bf16 %v619_v34, %v613_v33  ;;  %v6533_v33 = vld [vmem:[%s9617_s1 + $0xea8] ss:$48 sps:$4 sm:$0xff]  }
  0x55   :  { %3742 = vmatprep.mubr.bf16.mxu0 %v7605_v59  ;;  %3931 = vmatprep.mubr.bf16.mxu1 %v7605_v59  ;;  %v6538_v34 = vld [vmem:[%s9617_s1 + $0xf04] ss:$48 sps:$4 sm:$0xff]  }
  0x57   :  { %3721 = vmatpush1.bf16.msra.mxu0 %v6422_v38  ;;  %3910 = vmatpush1.bf16.msra.mxu1 %v6425_v39  ;;  %v6491_v38 = vld [vmem:[%s9617_s1 + $0xc08] ss:$48 sps:$4 sm:$0xff]  }
  0x58   :  { %3722 = vmatprep.subr.bf16.mxu0 %v6430_v42  ;;  %3911 = vmatprep.subr.bf16.mxu1 %v6433_v47  ;;  %v626_v39 = vld [vmem:[%s9616_s0 + $0x78] sm:$0xff] }
  0x59   :  { %v638_v42 = vld [vmem:[%s9616_s0 + $0xd8] sm:$0xff]  ;;  %v7757_v49 = vpack.c.bf16 %v632_v40, %v626_v39 }
  0x5a   :  { %v6497_v47 = vld [vmem:[%s9617_s1 + $0xc68] ss:$48 sps:$4 sm:$0xff]   ;;  %v662_v48 = vpack.c.bf16 %v638_v42, %v632_v40  ;;  %v6547_v39 = vld [vmem:[%s9617_s1 + $0xf6c] ss:$48 sps:$4 sm:$0xff]   ;;  %v6542_v40 = vld [vmem:[%s9617_s1 + $0xf60] ss:$48 sps:$4 sm:$0xff]  }
  0x5b   :  { %3723 = vmatpush1.bf16.msra.mxu0 %v6428_v51  ;;  %3912 = vmatpush1.bf16.msra.mxu1 %v6431_v52  ;;  %v625_v51 = vld [vmem:[%s9616_s0 + $0x70] sm:$0xff]  ;;  %v631_v52 = vld [vmem:[%s9616_s0 + $0xa0] sm:$0xff]  ;;  %v6545_v42 = vld [vmem:[%s9617_s1 + $0xf68] ss:$48 sps:$4 sm:$0xff]  }
  0x5c   :  { %3724 = vmatprep.subr.bf16.mxu0 %v6436_v53  ;;  %3913 = vmatprep.subr.bf16.mxu1 %v6439_v56  ;;  %v668_v53 = vpack.c.bf16 %v644_v43, %v644_v43  ;;  %v637_v56 = vld [vmem:[%s9616_s0 + $0xd0] sm:$0xff] }
  0x5d   :  { %v6550_v43 = vld [vmem:[%s9617_s1 + $0xfc4] ss:$48 sps:$4 sm:$0xff]  }
  0x5f   :  { %3725 = vmatpush1.bf16.msra.mxu0 %v6434_v60  ;;  %3914 = vmatpush1.bf16.msra.mxu1 %v6437_v61  ;;  %v6505_v60 = vld [vmem:[%s9617_s1 + $0xccc] ss:$48 sps:$4 sm:$0xff]   ;;  %v722_v61 = vunpack.c.h.b16 %v662_v48 }
  0x60   :  { %3726 = vmatprep.subr.bf16.mxu0 %v6442_v62  ;;  %3915 = vmatprep.subr.bf16.mxu1 %v6445_v63  ;;  %v728_v62 = vunpack.c.l.b16 %v668_v53  ;;  %v661_v63 = vpack.c.bf16 %v637_v56, %v631_v52  ;;  %v6559_v48 = vld [vmem:[%s9617_s1 + $0x102c] ss:$48 sps:$4 sm:$0xff]   ;;  %v6562_v53 = vld [vmem:[%s9617_s1 + $0x1084] ss:$48 sps:$4 sm:$0xff]  }
  0x61   :  { %v6565_v56 = vld [vmem:[%s9617_s1 + $0x108c] ss:$48 sps:$4 sm:$0xff]  }
  0x63   :  { %3727 = vmatpush1.bf16.msra.mxu0 %v6440_v0  ;;  %3916 = vmatpush1.bf16.msra.mxu1 %v6443_v1  ;;  %v7781_v0 = vpack.c.bf16 %v631_v52, %v625_v51  ;;  %v667_v1 = vpack.c.bf16 %v643_v58, %v643_v58  ;;  %v6554_v51 = vld [vmem:[%s9617_s1 + $0x1020] ss:$48 sps:$4 sm:$0xff]   ;;  %v6557_v52 = vld [vmem:[%s9617_s1 + $0x1028] ss:$48 sps:$4 sm:$0xff]  }
  0x64   :  { %3728 = vmatprep.subr.bf16.mxu0 %v6448_v2  ;;  %3917 = vmatprep.subr.bf16.mxu1 %v6451_v3  ;;  %v6500_v2 = vld [vmem:[%s9617_s1 + $0xcc0] ss:$48 sps:$4 sm:$0xff]   ;;  %v6503_v3 = vld [vmem:[%s9617_s1 + $0xcc8] ss:$48 sps:$4 sm:$0xff]  }
  0x65   :  { %v6563_v58 = vld [vmem:[%s9617_s1 + $0x1088] ss:$48 sps:$4 sm:$0xff]  }
  0x67   :  { %3729 = vmatpush1.bf16.msra.mxu0 %v6446_v4  ;;  %3918 = vmatpush1.bf16.msra.mxu1 %v6449_v5  ;;  %v6508_v4 = vld [vmem:[%s9617_s1 + $0xd24] ss:$48 sps:$4 sm:$0xff]   ;;  %v6511_v5 = vld [vmem:[%s9617_s1 + $0xd2c] ss:$48 sps:$4 sm:$0xff]  }
  0x68   :  { %3730 = vmatprep.subr.bf16.mxu0 %v6454_v6  ;;  %3919 = vmatprep.subr.bf16.mxu1 %v6457_v7  ;;  %v7795_v6 = vpack.c.b16 %v728_v62, %v722_v61  ;;  %v6506_v7 = vld [vmem:[%s9617_s1 + $0xd20] ss:$48 sps:$4 sm:$0xff]   ;;  %v6571_v61 = vld [vmem:[%s9617_s1 + $0x10ec] ss:$48 sps:$4 sm:$0xff]  }
  0x69   :  { %v6566_v62 = vld [vmem:[%s9617_s1 + $0x10e0] ss:$48 sps:$4 sm:$0xff]  }
  0x6b   :  { %3731 = vmatpush1.bf16.msra.mxu0 %v6452_v8  ;;  %3920 = vmatpush1.bf16.msra.mxu1 %v6455_v10  ;;  %v6509_v8 = vld [vmem:[%s9617_s1 + $0xd28] ss:$48 sps:$4 sm:$0xff]   ;;  %v721_v10 = vunpack.c.h.b16 %v661_v63 }
  0x6c   :  { %3732 = vmatprep.subr.bf16.mxu0 %v6460_v11  ;;  %3921 = vmatprep.subr.bf16.mxu1 %v6463_v12  ;;  %v727_v11 = vunpack.c.l.b16 %v667_v1  ;;  %v6514_v12 = vld [vmem:[%s9617_s1 + $0xd84] ss:$48 sps:$4 sm:$0xff]   ;;  %v6569_v63 = vld [vmem:[%s9617_s1 + $0x10e8] ss:$48 sps:$4 sm:$0xff]  }
  0x6d   :  { %v6574_v1 = vld [vmem:[%s9617_s1 + $0x1144] ss:$48 sps:$4 sm:$0xff]  }
  0x6f   :  { %3733 = vmatpush1.bf16.msra.mxu0 %v6458_v13  ;;  %3922 = vmatpush1.bf16.msra.mxu1 %v6461_v14  ;;  %v6517_v13 = vld [vmem:[%s9617_s1 + $0xd8c] ss:$48 sps:$4 sm:$0xff]   ;;  %v7813_v14 = vpack.c.b16 %v727_v11, %v721_v10  ;;  %v6581_v10 = vld [vmem:[%s9617_s1 + $0x11a8] ss:$48 sps:$4 sm:$0xff]   ;;  %v615_v11 = vld [vmem:[%s9616_s0 + $0x20] sm:$0xff] }
  0x70   :  { %3734 = vmatprep.subr.bf16.mxu0 %v6466_v15  ;;  %3923 = vmatprep.subr.bf16.mxu1 %v6469_v16  ;;  %v616_v15 = vld [vmem:[%s9616_s0 + $0x28] sm:$0xff]  ;;  %v622_v16 = vld [vmem:[%s9616_s0 + $0x58] sm:$0xff] }
  0x73   :  { %3735 = vmatpush1.bf16.msra.mxu0 %v6464_v17  ;;  %3924 = vmatpush1.bf16.msra.mxu1 %v6467_v18  ;;  %v6512_v17 = vld [vmem:[%s9617_s1 + $0xd80] ss:$48 sps:$4 sm:$0xff]   ;;  %v6515_v18 = vld [vmem:[%s9617_s1 + $0xd88] ss:$48 sps:$4 sm:$0xff]  }
  0x74   :  { %3736 = vmatprep.subr.bf16.mxu0 %v6472_v19  ;;  %3925 = vmatprep.subr.bf16.mxu1 %v6475_v20  ;;  %v6520_v19 = vld [vmem:[%s9617_s1 + $0xde4] ss:$48 sps:$4 sm:$0xff]   ;;  %v6523_v20 = vld [vmem:[%s9617_s1 + $0xdec] ss:$48 sps:$4 sm:$0xff]  }
  0x77   :  { %3737 = vmatpush1.bf16.msra.mxu0 %v6470_v21  ;;  %3926 = vmatpush1.bf16.msra.mxu1 %v6473_v22  ;;  %v7833_v21 = vpack.c.bf16 %v622_v16, %v616_v15  ;;  %v6518_v22 = vld [vmem:[%s9617_s1 + $0xde0] ss:$48 sps:$4 sm:$0xff]   ;;  %v6589_v15 = vld [vmem:[%s9617_s1 + $0x1c] ss:$48 sps:$4 sm:$0xff]  }
  0x78   :  { %3738 = vmatprep.subr.bf16.mxu0 %v6478_v23  ;;  %3927 = vmatprep.subr.bf16.mxu1 %v6481_v24  ;;  %v6521_v23 = vld [vmem:[%s9617_s1 + $0xde8] ss:$48 sps:$4 sm:$0xff]   ;;  %v6526_v24 = vld [vmem:[%s9617_s1 + $0xe44] ss:$48 sps:$4 sm:$0xff]   ;;  %v6584_v16 = vld [vmem:[%s9617_s1 + $0x10] ss:$48 sps:$4 sm:$0xff]  }
  0x7b   :  { %3739 = vmatpush1.bf16.msra.mxu0 %v6476_v25  ;;  %3928 = vmatpush1.bf16.msra.mxu1 %v6479_v26  ;;  %v6529_v25 = vld [vmem:[%s9617_s1 + $0xe4c] ss:$48 sps:$4 sm:$0xff]   ;;  %v6524_v26 = vld [vmem:[%s9617_s1 + $0xe40] ss:$48 sps:$4 sm:$0xff]  }
  0x7c   :  { %3740 = vmatprep.subr.bf16.mxu0 %v6484_v28  ;;  %3929 = vmatprep.subr.bf16.mxu1 %v6487_v29  ;;  %v6527_v28 = vld [vmem:[%s9617_s1 + $0xe48] ss:$48 sps:$4 sm:$0xff]   ;;  %v6532_v29 = vld [vmem:[%s9617_s1 + $0xea4] ss:$48 sps:$4 sm:$0xff]  }
  0x7f   :  { %3741 = vmatpush1.bf16.msra.mxu0 %v6482_v30  ;;  %3930 = vmatpush1.bf16.msra.mxu1 %v6485_v32  ;;  %v6535_v30 = vld [vmem:[%s9617_s1 + $0xeac] ss:$48 sps:$4 sm:$0xff]   ;;  %v6530_v32 = vld [vmem:[%s9617_s1 + $0xea0] ss:$48 sps:$4 sm:$0xff]  }
  0x80   :  { %3773 = vmatprep.subr.bf16.mxu0 %v6490_v35  ;;  %3962 = vmatprep.subr.bf16.mxu1 %v6493_v36  ;;  %v6541_v35 = vld [vmem:[%s9617_s1 + $0xf0c] ss:$48 sps:$4 sm:$0xff]   ;;  %v6536_v36 = vld [vmem:[%s9617_s1 + $0xf00] ss:$48 sps:$4 sm:$0xff]  }
  0x82   :  { %3743 = vmatmul.mubr.bf16.vlgmr.msra.gmra.mrb[0].mxu0 %v7737_v41  ;;  %3932 = vmatmul.mubr.bf16.vlgmr.msra.gmra.mrb[0].mxu1 %v7737_v41 }
  0x83   :  { %3774 = vmatpush1.bf16.msra.mxu0 %v6488_v37  ;;  %3963 = vmatpush1.bf16.msra.mxu1 %v6491_v38  ;;  %v6539_v37 = vld [vmem:[%s9617_s1 + $0xf08] ss:$48 sps:$4 sm:$0xff]   ;;  %v6544_v38 = vld [vmem:[%s9617_s1 + $0xf64] ss:$48 sps:$4 sm:$0xff]  }
  0x84   :  { %3775 = vmatprep.subr.bf16.mxu0 %v6496_v44  ;;  %3964 = vmatprep.subr.bf16.mxu1 %v6499_v45  ;;  %v6553_v44 = vld [vmem:[%s9617_s1 + $0xfcc] ss:$48 sps:$4 sm:$0xff]   ;;  %v6548_v45 = vld [vmem:[%s9617_s1 + $0xfc0] ss:$48 sps:$4 sm:$0xff]  }
  0x85   :  { %3752 = vmatprep.mubr.bf16.mxu0 %v7757_v49  ;;  %3941 = vmatprep.mubr.bf16.mxu1 %v7757_v49 }
  0x87   :  { %3776 = vmatpush1.bf16.msra.mxu0 %v6494_v46  ;;  %3965 = vmatpush1.bf16.msra.mxu1 %v6497_v47  ;;  %v6551_v46 = vld [vmem:[%s9617_s1 + $0xfc8] ss:$48 sps:$4 sm:$0xff]   ;;  %v6556_v47 = vld [vmem:[%s9617_s1 + $0x1024] ss:$48 sps:$4 sm:$0xff]  }
  0x88   :  { %3777 = vmatprep.subr.bf16.mxu0 %v6502_v57  ;;  %3966 = vmatprep.subr.bf16.mxu1 %v6505_v60  ;;  %v6560_v57 = vld [vmem:[%s9617_s1 + $0x1080] ss:$48 sps:$4 sm:$0xff]   ;;  %v6568_v60 = vld [vmem:[%s9617_s1 + $0x10e4] ss:$48 sps:$4 sm:$0xff]  }
  0x8a   :  { %3753 = vmatmul.mubr.bf16.gmra.mrb[12].mxu0 %v7781_v0  ;;  %3942 = vmatmul.mubr.bf16.gmra.mrb[12].mxu1 %v7781_v0 }
  0x8b   :  { %3778 = vmatpush1.bf16.msra.mxu0 %v6500_v2  ;;  %3967 = vmatpush1.bf16.msra.mxu1 %v6503_v3  ;;  %v6577_v2 = vld [vmem:[%s9617_s1 + $0x114c] ss:$48 sps:$4 sm:$0xff]   ;;  %v6572_v3 = vld [vmem:[%s9617_s1 + $0x1140] ss:$48 sps:$4 sm:$0xff]  }
  0x8c   :  { %3779 = vmatprep.subr.bf16.mxu0 %v6508_v4  ;;  %3968 = vmatprep.subr.bf16.mxu1 %v6511_v5  ;;  %v6575_v4 = vld [vmem:[%s9617_s1 + $0x1148] ss:$48 sps:$4 sm:$0xff]   ;;  %v6580_v5 = vld [vmem:[%s9617_s1 + $0x11a4] ss:$48 sps:$4 sm:$0xff]  }
  0x8d   :  { %3762 = vmatprep.mubr.bf16.mxu0 %v7795_v6  ;;  %3951 = vmatprep.mubr.bf16.mxu1 %v7795_v6 }
  0x8f   :  { %3780 = vmatpush1.bf16.msra.mxu0 %v6506_v7  ;;  %3969 = vmatpush1.bf16.msra.mxu1 %v6509_v8  ;;  %v6583_v7 = vld [vmem:[%s9617_s1 + $0x11ac] ss:$48 sps:$4 sm:$0xff]   ;;  %v6578_v8 = vld [vmem:[%s9617_s1 + $0x11a0] ss:$48 sps:$4 sm:$0xff]  }
  0x90   :  { %3781 = vmatprep.subr.bf16.mxu0 %v6514_v12  ;;  %3970 = vmatprep.subr.bf16.mxu1 %v6517_v13  ;;  %v621_v12 = vld [vmem:[%s9616_s0 + $0x50] sm:$0xff] }
  0x91   :  { %v6586_v13 = vld [vmem:[%s9617_s1 + $0x14] ss:$48 sps:$4 sm:$0xff]  }
  0x92   :  { %3763 = vmatmul.mubr.bf16.gmra.mrb[16].mxu0 %v7813_v14  ;;  %3952 = vmatmul.mubr.bf16.gmra.mrb[16].mxu1 %v7813_v14 }
  0x93   :  { %3782 = vmatpush1.bf16.msra.mxu0 %v6512_v17  ;;  %3971 = vmatpush1.bf16.msra.mxu1 %v6515_v18  ;;  %v6587_v17 = vld [vmem:[%s9617_s1 + $0x18] ss:$48 sps:$4 sm:$0xff]  }
  0x94   :  { %3783 = vmatprep.subr.bf16.mxu0 %v6520_v19  ;;  %3972 = vmatprep.subr.bf16.mxu1 %v6523_v20  ;;  %v628_v18 = vld [vmem:[%s9616_s0 + $0x88] sm:$0xff]  ;;  %v634_v19 = vld [vmem:[%s9616_s0 + $0xb8] sm:$0xff]  ;;  %v7989_v20 = vpack.c.bf16 %v621_v12, %v615_v11  ;;  %v6628_v11 = vld [vmem:[%s9617_s1 + $0x2b4] ss:$48 sps:$4 sm:$0xff]  }
  0x95   :  { %3805 = vmatprep.mubr.bf16.mxu0 %v7833_v21  ;;  %3994 = vmatprep.mubr.bf16.mxu1 %v7833_v21  ;;  %v6631_v12 = vld [vmem:[%s9617_s1 + $0x2bc] ss:$48 sps:$4 sm:$0xff]  }
  0x97   :  { %3784 = vmatpush1.bf16.msra.mxu0 %v6518_v22  ;;  %3973 = vmatpush1.bf16.msra.mxu1 %v6521_v23  ;;  %v640_v22 = vld [vmem:[%s9616_s0 + $0xe8] sm:$0xff]  ;;  %v646_v23 = vld [vmem:[%s9616_s0 + $0x118] sm:$0xff] }
  0x98   :  { %3785 = vmatprep.subr.bf16.mxu0 %v6526_v24  ;;  %3974 = vmatprep.subr.bf16.mxu1 %v6529_v25  ;;  %v6592_v24 = vld [vmem:[%s9617_s1 + $0x74] ss:$48 sps:$4 sm:$0xff]   ;;  %v6595_v25 = vld [vmem:[%s9617_s1 + $0x7c] ss:$48 sps:$4 sm:$0xff]  }
  0x9b   :  { %3786 = vmatpush1.bf16.msra.mxu0 %v6524_v26  ;;  %3975 = vmatpush1.bf16.msra.mxu1 %v6527_v28  ;;  %v6590_v26 = vld [vmem:[%s9617_s1 + $0x70] ss:$48 sps:$4 sm:$0xff]   ;;  %v6593_v28 = vld [vmem:[%s9617_s1 + $0x78] ss:$48 sps:$4 sm:$0xff]  }
  0x9c   :  { %3787 = vmatprep.subr.bf16.mxu0 %v6532_v29  ;;  %3976 = vmatprep.subr.bf16.mxu1 %v6535_v30  ;;  %v664_v29 = vpack.c.bf16 %v640_v22, %v634_v19  ;;  %v8009_v30 = vpack.c.bf16 %v634_v19, %v628_v18  ;;  %v6632_v18 = vld [vmem:[%s9617_s1 + $0x310] ss:$48 sps:$4 sm:$0xff]   ;;  %v6635_v19 = vld [vmem:[%s9617_s1 + $0x318] ss:$48 sps:$4 sm:$0xff]   ;;  %v6640_v22 = vld [vmem:[%s9617_s1 + $0x374] ss:$48 sps:$4 sm:$0xff]  }
  0x9f   :  { %3788 = vmatpush1.bf16.msra.mxu0 %v6530_v32  ;;  %3977 = vmatpush1.bf16.msra.mxu1 %v6533_v33  ;;  %v627_v32 = vld [vmem:[%s9616_s0 + $0x80] sm:$0xff]  ;;  %v633_v33 = vld [vmem:[%s9616_s0 + $0xb0] sm:$0xff] }
  0xa0   :  { %3789 = vmatprep.subr.bf16.mxu0 %v6538_v34  ;;  %3978 = vmatprep.subr.bf16.mxu1 %v6541_v35  ;;  %v670_v34 = vpack.c.bf16 %v646_v23, %v646_v23  ;;  %v639_v35 = vld [vmem:[%s9616_s0 + $0xe0] sm:$0xff]  ;;  %v6643_v23 = vld [vmem:[%s9617_s1 + $0x37c] ss:$48 sps:$4 sm:$0xff]  }
  0xa3   :  { %3790 = vmatpush1.bf16.msra.mxu0 %v6536_v36  ;;  %3979 = vmatpush1.bf16.msra.mxu1 %v6539_v37  ;;  %v6598_v36 = vld [vmem:[%s9617_s1 + $0xd4] ss:$48 sps:$4 sm:$0xff]  }
  0xa4   :  { %3791 = vmatprep.subr.bf16.mxu0 %v6544_v38  ;;  %3980 = vmatprep.subr.bf16.mxu1 %v6547_v39  ;;  %v645_v37 = vld [vmem:[%s9616_s0 + $0x110] sm:$0xff]  ;;  %v6601_v38 = vld [vmem:[%s9617_s1 + $0xdc] ss:$48 sps:$4 sm:$0xff]   ;;  %v724_v39 = vunpack.c.h.b16 %v664_v29 }
  0xa5   :  { %v6644_v29 = vld [vmem:[%s9617_s1 + $0x3d0] ss:$48 sps:$4 sm:$0xff]  }
  0xa7   :  { %3792 = vmatpush1.bf16.msra.mxu0 %v6542_v40  ;;  %3981 = vmatpush1.bf16.msra.mxu1 %v6545_v42  ;;  %v730_v40 = vunpack.c.l.b16 %v670_v34  ;;  %v663_v42 = vpack.c.bf16 %v639_v35, %v633_v33  ;;  %v6655_v34 = vld [vmem:[%s9617_s1 + $0x43c] ss:$48 sps:$4 sm:$0xff]   ;;  %v6650_v35 = vld [vmem:[%s9617_s1 + $0x430] ss:$48 sps:$4 sm:$0xff]  }
  0xa8   :  { %3793 = vmatprep.subr.bf16.mxu0 %v6550_v43  ;;  %3982 = vmatprep.subr.bf16.mxu1 %v6553_v44  ;;  %v8033_v43 = vpack.c.bf16 %v633_v33, %v627_v32  ;;  %v6596_v44 = vld [vmem:[%s9617_s1 + $0xd0] ss:$48 sps:$4 sm:$0xff]   ;;  %v6647_v32 = vld [vmem:[%s9617_s1 + $0x3d8] ss:$48 sps:$4 sm:$0xff]   ;;  %v6652_v33 = vld [vmem:[%s9617_s1 + $0x434] ss:$48 sps:$4 sm:$0xff]  }
  0xab   :  { %3794 = vmatpush1.bf16.msra.mxu0 %v6548_v45  ;;  %3983 = vmatpush1.bf16.msra.mxu1 %v6551_v46  ;;  %v6599_v45 = vld [vmem:[%s9617_s1 + $0xd8] ss:$48 sps:$4 sm:$0xff]   ;;  %v669_v46 = vpack.c.bf16 %v645_v37, %v645_v37  ;;  %v6658_v37 = vld [vmem:[%s9617_s1 + $0x494] ss:$48 sps:$4 sm:$0xff]  }
  0xac   :  { %3795 = vmatprep.subr.bf16.mxu0 %v6556_v47  ;;  %3984 = vmatprep.subr.bf16.mxu1 %v6559_v48  ;;  %v6604_v47 = vld [vmem:[%s9617_s1 + $0x134] ss:$48 sps:$4 sm:$0xff]   ;;  %v6607_v48 = vld [vmem:[%s9617_s1 + $0x13c] ss:$48 sps:$4 sm:$0xff]  }
  0xaf   :  { %3796 = vmatpush1.bf16.msra.mxu0 %v6554_v51  ;;  %3985 = vmatpush1.bf16.msra.mxu1 %v6557_v52  ;;  %v8047_v51 = vpack.c.b16 %v730_v40, %v724_v39  ;;  %v6602_v52 = vld [vmem:[%s9617_s1 + $0x130] ss:$48 sps:$4 sm:$0xff]   ;;  %v6659_v40 = vld [vmem:[%s9617_s1 + $0x498] ss:$48 sps:$4 sm:$0xff]  }
  0xb0   :  { %3797 = vmatprep.subr.bf16.mxu0 %v6562_v53  ;;  %3986 = vmatprep.subr.bf16.mxu1 %v6565_v56  ;;  %v6605_v53 = vld [vmem:[%s9617_s1 + $0x138] ss:$48 sps:$4 sm:$0xff]   ;;  %v723_v56 = vunpack.c.h.b16 %v663_v42  ;;  %v6656_v39 = vld [vmem:[%s9617_s1 + $0x490] ss:$48 sps:$4 sm:$0xff]   ;;  %v6664_v42 = vld [vmem:[%s9617_s1 + $0x4f4] ss:$48 sps:$4 sm:$0xff]  }
  0xb3   :  { %3798 = vmatpush1.bf16.msra.mxu0 %v6560_v57  ;;  %3987 = vmatpush1.bf16.msra.mxu1 %v6563_v58  ;;  %v729_v57 = vunpack.c.l.b16 %v669_v46  ;;  %v6610_v58 = vld [vmem:[%s9617_s1 + $0x194] ss:$48 sps:$4 sm:$0xff]   ;;  %v6665_v46 = vld [vmem:[%s9617_s1 + $0x4f8] ss:$48 sps:$4 sm:$0xff]  }
  0xb4   :  { %3799 = vmatprep.subr.bf16.mxu0 %v6568_v60  ;;  %3988 = vmatprep.subr.bf16.mxu1 %v6571_v61  ;;  %v6613_v60 = vld [vmem:[%s9617_s1 + $0x19c] ss:$48 sps:$4 sm:$0xff]  }
  0xb5   :  { %v8065_v61 = vpack.c.b16 %v729_v57, %v723_v56  ;;  %v6676_v56 = vld [vmem:[%s9617_s1 + $0x5b4] ss:$48 sps:$4 sm:$0xff]   ;;  %v6679_v57 = vld [vmem:[%s9617_s1 + $0x5bc] ss:$48 sps:$4 sm:$0xff]  }
  0xb7   :  { %3800 = vmatpush1.bf16.msra.mxu0 %v6566_v62  ;;  %3989 = vmatpush1.bf16.msra.mxu1 %v6569_v63  ;;  %v6608_v62 = vld [vmem:[%s9617_s1 + $0x190] ss:$48 sps:$4 sm:$0xff]   ;;  %v6611_v63 = vld [vmem:[%s9617_s1 + $0x198] ss:$48 sps:$4 sm:$0xff]  }
  0xb8   :  { %3801 = vmatprep.subr.bf16.mxu0 %v6574_v1  ;;  %3990 = vmatprep.subr.bf16.mxu1 %v6577_v2  ;;  %v6616_v1 = vld [vmem:[%s9617_s1 + $0x1f4] ss:$48 sps:$4 sm:$0xff]   ;;  %v6619_v2 = vld [vmem:[%s9617_s1 + $0x1fc] ss:$48 sps:$4 sm:$0xff]  }
  0xbb   :  { %3802 = vmatpush1.bf16.msra.mxu0 %v6572_v3  ;;  %3991 = vmatpush1.bf16.msra.mxu1 %v6575_v4  ;;  %v6614_v3 = vld [vmem:[%s9617_s1 + $0x1f0] ss:$48 sps:$4 sm:$0xff]   ;;  %v6617_v4 = vld [vmem:[%s9617_s1 + $0x1f8] ss:$48 sps:$4 sm:$0xff]  }
  0xbc   :  { %3803 = vmatprep.subr.bf16.mxu0 %v6580_v5  ;;  %3992 = vmatprep.subr.bf16.mxu1 %v6583_v7  ;;  %v6622_v5 = vld [vmem:[%s9617_s1 + $0x254] ss:$48 sps:$4 sm:$0xff]   ;;  %v6625_v7 = vld [vmem:[%s9617_s1 + $0x25c] ss:$48 sps:$4 sm:$0xff]  }
  0xbf   :  { %3804 = vmatpush1.bf16.msra.mxu0 %v6578_v8  ;;  %3993 = vmatpush1.bf16.msra.mxu1 %v6581_v10  ;;  %v6620_v8 = vld [vmem:[%s9617_s1 + $0x250] ss:$48 sps:$4 sm:$0xff]   ;;  %v6623_v10 = vld [vmem:[%s9617_s1 + $0x258] ss:$48 sps:$4 sm:$0xff]  }
  0xc0   :  { %4025 = vmatprep.subr.bf16.mxu0 %v6586_v13  ;;  %4214 = vmatprep.subr.bf16.mxu1 %v6589_v15  ;;  %v6626_v13 = vld [vmem:[%s9617_s1 + $0x2b0] ss:$48 sps:$4 sm:$0xff]   ;;  %v6629_v15 = vld [vmem:[%s9617_s1 + $0x2b8] ss:$48 sps:$4 sm:$0xff]  }
  0xc2   :  { %3806 = vmatmul.mubr.bf16.vlgmr.msra.gmra.mrb[0].mxu0 %v7989_v20  ;;  %3995 = vmatmul.mubr.bf16.vlgmr.msra.gmra.mrb[0].mxu1 %v7989_v20 }
  0xc3   :  { %4026 = vmatpush1.bf16.msra.mxu0 %v6584_v16  ;;  %4215 = vmatpush1.bf16.msra.mxu1 %v6587_v17  ;;  %v6634_v16 = vld [vmem:[%s9617_s1 + $0x314] ss:$48 sps:$4 sm:$0xff]   ;;  %v6637_v17 = vld [vmem:[%s9617_s1 + $0x31c] ss:$48 sps:$4 sm:$0xff]  }
  0xc4   :  { %4027 = vmatprep.subr.bf16.mxu0 %v6592_v24  ;;  %4216 = vmatprep.subr.bf16.mxu1 %v6595_v25  ;;  %v6638_v24 = vld [vmem:[%s9617_s1 + $0x370] ss:$48 sps:$4 sm:$0xff]   ;;  %v6641_v25 = vld [vmem:[%s9617_s1 + $0x378] ss:$48 sps:$4 sm:$0xff]  }
  0xc5   :  { %3815 = vmatprep.mubr.bf16.mxu0 %v8009_v30  ;;  %4004 = vmatprep.mubr.bf16.mxu1 %v8009_v30 }
  0xc7   :  { %4028 = vmatpush1.bf16.msra.mxu0 %v6590_v26  ;;  %4217 = vmatpush1.bf16.msra.mxu1 %v6593_v28  ;;  %v6646_v26 = vld [vmem:[%s9617_s1 + $0x3d4] ss:$48 sps:$4 sm:$0xff]   ;;  %v6649_v28 = vld [vmem:[%s9617_s1 + $0x3dc] ss:$48 sps:$4 sm:$0xff]  }
  0xc8   :  { %4029 = vmatprep.subr.bf16.mxu0 %v6598_v36  ;;  %4218 = vmatprep.subr.bf16.mxu1 %v6601_v38  ;;  %v6653_v36 = vld [vmem:[%s9617_s1 + $0x438] ss:$48 sps:$4 sm:$0xff]   ;;  %v6661_v38 = vld [vmem:[%s9617_s1 + $0x49c] ss:$48 sps:$4 sm:$0xff]  }
  0xca   :  { %3816 = vmatmul.mubr.bf16.gmra.mrb[20].mxu0 %v8033_v43  ;;  %4005 = vmatmul.mubr.bf16.gmra.mrb[20].mxu1 %v8033_v43 }
  0xcb   :  { %4030 = vmatpush1.bf16.msra.mxu0 %v6596_v44  ;;  %4219 = vmatpush1.bf16.msra.mxu1 %v6599_v45  ;;  %v6667_v44 = vld [vmem:[%s9617_s1 + $0x4fc] ss:$48 sps:$4 sm:$0xff]   ;;  %v6662_v45 = vld [vmem:[%s9617_s1 + $0x4f0] ss:$48 sps:$4 sm:$0xff]  }
  0xcc   :  { %4031 = vmatprep.subr.bf16.mxu0 %v6604_v47  ;;  %4220 = vmatprep.subr.bf16.mxu1 %v6607_v48  ;;  %v6670_v47 = vld [vmem:[%s9617_s1 + $0x554] ss:$48 sps:$4 sm:$0xff]   ;;  %v6673_v48 = vld [vmem:[%s9617_s1 + $0x55c] ss:$48 sps:$4 sm:$0xff]  }
  0xcd   :  { %3825 = vmatprep.mubr.bf16.mxu0 %v8047_v51  ;;  %4014 = vmatprep.mubr.bf16.mxu1 %v8047_v51 }
  0xcf   :  { %4032 = vmatpush1.bf16.msra.mxu0 %v6602_v52  ;;  %4221 = vmatpush1.bf16.msra.mxu1 %v6605_v53  ;;  %v6668_v52 = vld [vmem:[%s9617_s1 + $0x550] ss:$48 sps:$4 sm:$0xff]   ;;  %v6671_v53 = vld [vmem:[%s9617_s1 + $0x558] ss:$48 sps:$4 sm:$0xff]  }
  0xd0   :  { %4033 = vmatprep.subr.bf16.mxu0 %v6610_v58  ;;  %4222 = vmatprep.subr.bf16.mxu1 %v6613_v60  ;;  %v6674_v58 = vld [vmem:[%s9617_s1 + $0x5b0] ss:$48 sps:$4 sm:$0xff]   ;;  %v6677_v60 = vld [vmem:[%s9617_s1 + $0x5b8] ss:$48 sps:$4 sm:$0xff]  }
  0xd2   :  { %3826 = vmatmul.mubr.bf16.gmra.mrb[24].mxu0 %v8065_v61  ;;  %4015 = vmatmul.mubr.bf16.gmra.mrb[24].mxu1 %v8065_v61 }
  0xd3   :  { %4034 = vmatpush1.bf16.msra.mxu0 %v6608_v62  ;;  %4223 = vmatpush1.bf16.msra.mxu1 %v6611_v63  ;;  %v6682_v62 = vld [vmem:[%s9617_s1 + $0x614] ss:$48 sps:$4 sm:$0xff]   ;;  %v6685_v63 = vld [vmem:[%s9617_s1 + $0x61c] ss:$48 sps:$4 sm:$0xff]  }
  0xd4   :  { %4035 = vmatprep.subr.bf16.mxu0 %v6616_v1  ;;  %4224 = vmatprep.subr.bf16.mxu1 %v6619_v2  ;;  %v6680_v1 = vld [vmem:[%s9617_s1 + $0x610] ss:$48 sps:$4 sm:$0xff]   ;;  %v6683_v2 = vld [vmem:[%s9617_s1 + $0x618] ss:$48 sps:$4 sm:$0xff]  }
  0xd5   :  { %4057 = vmatprep.mubr.bf16.mxu0 %v7409_v50  ;;  %4246 = vmatprep.mubr.bf16.mxu1 %v7409_v50 }
  0xd7   :  { %4036 = vmatpush1.bf16.msra.mxu0 %v6614_v3  ;;  %4225 = vmatpush1.bf16.msra.mxu1 %v6617_v4  ;;  %v6688_v3 = vld [vmem:[%s9617_s1 + $0x674] ss:$48 sps:$4 sm:$0xff]   ;;  %v6691_v4 = vld [vmem:[%s9617_s1 + $0x67c] ss:$48 sps:$4 sm:$0xff]  }
  0xd8   :  { %4037 = vmatprep.subr.bf16.mxu0 %v6622_v5  ;;  %4226 = vmatprep.subr.bf16.mxu1 %v6625_v7  ;;  %v6686_v5 = vld [vmem:[%s9617_s1 + $0x670] ss:$48 sps:$4 sm:$0xff]   ;;  %v6689_v7 = vld [vmem:[%s9617_s1 + $0x678] ss:$48 sps:$4 sm:$0xff]  }
  0xdb   :  { %4038 = vmatpush1.bf16.msra.mxu0 %v6620_v8  ;;  %4227 = vmatpush1.bf16.msra.mxu1 %v6623_v10  ;;  %v6694_v8 = vld [vmem:[%s9617_s1 + $0x6d4] ss:$48 sps:$4 sm:$0xff]   ;;  %v6697_v10 = vld [vmem:[%s9617_s1 + $0x6dc] ss:$48 sps:$4 sm:$0xff]  }
  0xdc   :  { %4039 = vmatprep.subr.bf16.mxu0 %v6628_v11  ;;  %4228 = vmatprep.subr.bf16.mxu1 %v6631_v12  ;;  %v6692_v11 = vld [vmem:[%s9617_s1 + $0x6d0] ss:$48 sps:$4 sm:$0xff]   ;;  %v6695_v12 = vld [vmem:[%s9617_s1 + $0x6d8] ss:$48 sps:$4 sm:$0xff]  }
  0xdf   :  { %4040 = vmatpush1.bf16.msra.mxu0 %v6626_v13  ;;  %4229 = vmatpush1.bf16.msra.mxu1 %v6629_v15  ;;  %v6700_v13 = vld [vmem:[%s9617_s1 + $0x734] ss:$48 sps:$4 sm:$0xff]   ;;  %v6703_v15 = vld [vmem:[%s9617_s1 + $0x73c] ss:$48 sps:$4 sm:$0xff]  }
  0xe0   :  { %4041 = vmatprep.subr.bf16.mxu0 %v6634_v16  ;;  %4230 = vmatprep.subr.bf16.mxu1 %v6637_v17  ;;  %v6698_v16 = vld [vmem:[%s9617_s1 + $0x730] ss:$48 sps:$4 sm:$0xff]   ;;  %v6701_v17 = vld [vmem:[%s9617_s1 + $0x738] ss:$48 sps:$4 sm:$0xff]  }
  0xe3   :  { %4042 = vmatpush1.bf16.msra.mxu0 %v6632_v18  ;;  %4231 = vmatpush1.bf16.msra.mxu1 %v6635_v19  ;;  %v6706_v18 = vld [vmem:[%s9617_s1 + $0x794] ss:$48 sps:$4 sm:$0xff]   ;;  %v6709_v19 = vld [vmem:[%s9617_s1 + $0x79c] ss:$48 sps:$4 sm:$0xff]  }
  0xe4   :  { %4043 = vmatprep.subr.bf16.mxu0 %v6640_v22  ;;  %4232 = vmatprep.subr.bf16.mxu1 %v6643_v23  ;;  %v6704_v22 = vld [vmem:[%s9617_s1 + $0x790] ss:$48 sps:$4 sm:$0xff]   ;;  %v6707_v23 = vld [vmem:[%s9617_s1 + $0x798] ss:$48 sps:$4 sm:$0xff]  }
  0xe7   :  { %4044 = vmatpush1.bf16.msra.mxu0 %v6638_v24  ;;  %4233 = vmatpush1.bf16.msra.mxu1 %v6641_v25  ;;  %v6712_v24 = vld [vmem:[%s9617_s1 + $0x7f4] ss:$48 sps:$4 sm:$0xff]   ;;  %v6715_v25 = vld [vmem:[%s9617_s1 + $0x7fc] ss:$48 sps:$4 sm:$0xff]  }
  0xe8   :  { %4045 = vmatprep.subr.bf16.mxu0 %v6646_v26  ;;  %4234 = vmatprep.subr.bf16.mxu1 %v6649_v28  ;;  %v6710_v26 = vld [vmem:[%s9617_s1 + $0x7f0] ss:$48 sps:$4 sm:$0xff]   ;;  %v6713_v28 = vld [vmem:[%s9617_s1 + $0x7f8] ss:$48 sps:$4 sm:$0xff]  }
  0xeb   :  { %4046 = vmatpush1.bf16.msra.mxu0 %v6644_v29  ;;  %4235 = vmatpush1.bf16.msra.mxu1 %v6647_v32  ;;  %v6718_v29 = vld [vmem:[%s9617_s1 + $0x854] ss:$48 sps:$4 sm:$0xff]   ;;  %v6721_v32 = vld [vmem:[%s9617_s1 + $0x85c] ss:$48 sps:$4 sm:$0xff]  }
  0xec   :  { %4047 = vmatprep.subr.bf16.mxu0 %v6652_v33  ;;  %4236 = vmatprep.subr.bf16.mxu1 %v6655_v34  ;;  %v6716_v33 = vld [vmem:[%s9617_s1 + $0x850] ss:$48 sps:$4 sm:$0xff]   ;;  %v6719_v34 = vld [vmem:[%s9617_s1 + $0x858] ss:$48 sps:$4 sm:$0xff]  }
  0xef   :  { %4048 = vmatpush1.bf16.msra.mxu0 %v6650_v35  ;;  %4237 = vmatpush1.bf16.msra.mxu1 %v6653_v36  ;;  %v6724_v35 = vld [vmem:[%s9617_s1 + $0x8b4] ss:$48 sps:$4 sm:$0xff]   ;;  %v6727_v36 = vld [vmem:[%s9617_s1 + $0x8bc] ss:$48 sps:$4 sm:$0xff]  }
  0xf0   :  { %4049 = vmatprep.subr.bf16.mxu0 %v6658_v37  ;;  %4238 = vmatprep.subr.bf16.mxu1 %v6661_v38  ;;  %v6722_v37 = vld [vmem:[%s9617_s1 + $0x8b0] ss:$48 sps:$4 sm:$0xff]   ;;  %v6725_v38 = vld [vmem:[%s9617_s1 + $0x8b8] ss:$48 sps:$4 sm:$0xff]  }
  0xf3   :  { %4050 = vmatpush1.bf16.msra.mxu0 %v6656_v39  ;;  %4239 = vmatpush1.bf16.msra.mxu1 %v6659_v40  ;;  %v6730_v39 = vld [vmem:[%s9617_s1 + $0x914] ss:$48 sps:$4 sm:$0xff]   ;;  %v6733_v40 = vld [vmem:[%s9617_s1 + $0x91c] ss:$48 sps:$4 sm:$0xff]  }
  0xf4   :  { %4051 = vmatprep.subr.bf16.mxu0 %v6664_v42  ;;  %4240 = vmatprep.subr.bf16.mxu1 %v6667_v44  ;;  %v6728_v42 = vld [vmem:[%s9617_s1 + $0x910] ss:$48 sps:$4 sm:$0xff]   ;;  %v6731_v44 = vld [vmem:[%s9617_s1 + $0x918] ss:$48 sps:$4 sm:$0xff]  }
  0xf7   :  { %4052 = vmatpush1.bf16.msra.mxu0 %v6662_v45  ;;  %4241 = vmatpush1.bf16.msra.mxu1 %v6665_v46  ;;  %v6736_v45 = vld [vmem:[%s9617_s1 + $0x974] ss:$48 sps:$4 sm:$0xff]   ;;  %v6739_v46 = vld [vmem:[%s9617_s1 + $0x97c] ss:$48 sps:$4 sm:$0xff]  }
  0xf8   :  { %4053 = vmatprep.subr.bf16.mxu0 %v6670_v47  ;;  %4242 = vmatprep.subr.bf16.mxu1 %v6673_v48  ;;  %v6734_v47 = vld [vmem:[%s9617_s1 + $0x970] ss:$48 sps:$4 sm:$0xff]   ;;  %v6737_v48 = vld [vmem:[%s9617_s1 + $0x978] ss:$48 sps:$4 sm:$0xff]  }
  0xfb   :  { %4054 = vmatpush1.bf16.msra.mxu0 %v6668_v52  ;;  %4243 = vmatpush1.bf16.msra.mxu1 %v6671_v53  ;;  %v6742_v52 = vld [vmem:[%s9617_s1 + $0x9d4] ss:$48 sps:$4 sm:$0xff]   ;;  %v6745_v53 = vld [vmem:[%s9617_s1 + $0x9dc] ss:$48 sps:$4 sm:$0xff]  }
  0xfc   :  { %4055 = vmatprep.subr.bf16.mxu0 %v6676_v56  ;;  %4244 = vmatprep.subr.bf16.mxu1 %v6679_v57 }
  0xff   :  { %4056 = vmatpush1.bf16.msra.mxu0 %v6674_v58  ;;  %4245 = vmatpush1.bf16.msra.mxu1 %v6677_v60  ;;  %v6740_v58 = vld [vmem:[%s9617_s1 + $0x9d0] ss:$48 sps:$4 sm:$0xff]  }
 0x100   :  { %4088 = vmatprep.subr.bf16.mxu0 %v6682_v62  ;;  %4277 = vmatprep.subr.bf16.mxu1 %v6685_v63  ;;  %v6743_v63 = vld [vmem:[%s9617_s1 + $0x9d8] ss:$48 sps:$4 sm:$0xff]  }
 0x102   :  { %4058 = vmatmul.mubr.bf16.vlgmr.msra.gmra.mrb[28].mxu0 %v7479_v9  ;;  %4247 = vmatmul.mubr.bf16.vlgmr.msra.gmra.mrb[28].mxu1 %v7479_v9 }
 0x103   :  { %4089 = vmatpush1.bf16.msra.mxu0 %v6680_v1  ;;  %4278 = vmatpush1.bf16.msra.mxu1 %v6683_v2 }
 0x104   :  { %4090 = vmatprep.subr.bf16.mxu0 %v6688_v3  ;;  %4279 = vmatprep.subr.bf16.mxu1 %v6691_v4 }
 0x105   :  { %4256 = vmatprep.mubr.bf16.mxu1 %v7534_v27  ;;  %4067 = vmatprep.mubr.bf16.mxu0 %v7534_v27 }
 0x107   :  { %4091 = vmatpush1.bf16.msra.mxu0 %v6686_v5  ;;  %4280 = vmatpush1.bf16.msra.mxu1 %v6689_v7  ;;  %v6748_v5 = vld [vmem:[%s9617_s1 + $0xa34] ss:$48 sps:$4 sm:$0xff]   ;;  %v6751_v7 = vld [vmem:[%s9617_s1 + $0xa3c] ss:$48 sps:$4 sm:$0xff]  }
 0x108   :  { %4092 = vmatprep.subr.bf16.mxu0 %v6694_v8  ;;  %4281 = vmatprep.subr.bf16.mxu1 %v6697_v10  ;;  %v6746_v8 = vld [vmem:[%s9617_s1 + $0xa30] ss:$48 sps:$4 sm:$0xff]   ;;  %v6749_v10 = vld [vmem:[%s9617_s1 + $0xa38] ss:$48 sps:$4 sm:$0xff]  }
 0x10a   :  { %4257 = vmatmul.mubr.bf16.gmra.mrb[32].mxu1 %v7545_v31  ;;  %4068 = vmatmul.mubr.bf16.gmra.mrb[32].mxu0 %v7545_v31 }
 0x10b   :  { %4093 = vmatpush1.bf16.msra.mxu0 %v6692_v11  ;;  %4282 = vmatpush1.bf16.msra.mxu1 %v6695_v12  ;;  %v6754_v11 = vld [vmem:[%s9617_s1 + $0xa94] ss:$48 sps:$4 sm:$0xff]   ;;  %v6757_v12 = vld [vmem:[%s9617_s1 + $0xa9c] ss:$48 sps:$4 sm:$0xff]  }
 0x10c   :  { %4094 = vmatprep.subr.bf16.mxu0 %v6700_v13  ;;  %4283 = vmatprep.subr.bf16.mxu1 %v6703_v15  ;;  %v6752_v13 = vld [vmem:[%s9617_s1 + $0xa90] ss:$48 sps:$4 sm:$0xff]   ;;  %v6755_v15 = vld [vmem:[%s9617_s1 + $0xa98] ss:$48 sps:$4 sm:$0xff]  }
 0x10d   :  { %4266 = vmatprep.mubr.bf16.mxu1 %v7590_v54  ;;  %4077 = vmatprep.mubr.bf16.mxu0 %v7590_v54 }
 0x10f   :  { %4095 = vmatpush1.bf16.msra.mxu0 %v6698_v16  ;;  %4284 = vmatpush1.bf16.msra.mxu1 %v6701_v17 }
 0x110   :  { %4096 = vmatprep.subr.bf16.mxu0 %v6706_v18  ;;  %4285 = vmatprep.subr.bf16.mxu1 %v6709_v19 }
 0x112   :  { %4267 = vmatmul.mubr.bf16.gmra.mrb[36].mxu1 %v7592_v55  ;;  %4078 = vmatmul.mubr.bf16.gmra.mrb[36].mxu0 %v7592_v55 }
 0x113   :  { %4097 = vmatpush1.bf16.msra.mxu0 %v6704_v22  ;;  %4286 = vmatpush1.bf16.msra.mxu1 %v6707_v23 }
 0x114   :  { %4098 = vmatprep.subr.bf16.mxu0 %v6712_v24  ;;  %4287 = vmatprep.subr.bf16.mxu1 %v6715_v25  ;;  %v6760_v24 = vld [vmem:[%s9617_s1 + $0xaf4] ss:$48 sps:$4 sm:$0xff]   ;;  %v6763_v25 = vld [vmem:[%s9617_s1 + $0xafc] ss:$48 sps:$4 sm:$0xff]  }
 0x115   :  { %4309 = vmatprep.mubr.bf16.mxu1 %v7605_v59  ;;  %4120 = vmatprep.mubr.bf16.mxu0 %v7605_v59 }
 0x117   :  { %4099 = vmatpush1.bf16.msra.mxu0 %v6710_v26  ;;  %4288 = vmatpush1.bf16.msra.mxu1 %v6713_v28 }
 0x118   :  { %4100 = vmatprep.subr.bf16.mxu0 %v6718_v29  ;;  %4289 = vmatprep.subr.bf16.mxu1 %v6721_v32  ;;  %v6758_v29 = vld [vmem:[%s9617_s1 + $0xaf0] ss:$48 sps:$4 sm:$0xff]   ;;  %v6761_v32 = vld [vmem:[%s9617_s1 + $0xaf8] ss:$48 sps:$4 sm:$0xff]  }
 0x11b   :  { %4101 = vmatpush1.bf16.msra.mxu0 %v6716_v33  ;;  %4290 = vmatpush1.bf16.msra.mxu1 %v6719_v34  ;;  %v6766_v33 = vld [vmem:[%s9617_s1 + $0xb54] ss:$48 sps:$4 sm:$0xff]   ;;  %v6769_v34 = vld [vmem:[%s9617_s1 + $0xb5c] ss:$48 sps:$4 sm:$0xff]  }
 0x11c   :  { %4102 = vmatprep.subr.bf16.mxu0 %v6724_v35  ;;  %4291 = vmatprep.subr.bf16.mxu1 %v6727_v36  ;;  %v6764_v35 = vld [vmem:[%s9617_s1 + $0xb50] ss:$48 sps:$4 sm:$0xff]   ;;  %v6767_v36 = vld [vmem:[%s9617_s1 + $0xb58] ss:$48 sps:$4 sm:$0xff]  }
 0x11d   :  { %v3691_v56 = vpop.f32.mrb[4].mxu0  ;;  %v8347_v57 = vpop.f32.mrb[4].mxu1 }
 0x11e   :  { %v8352_v60 = vpop.f32.mrb[5].mxu0  ;;  %v3882_v62 = vpop.f32.mrb[5].mxu1  ;;  %v6790_v56 = vld [vmem:[%s9617_s1 + $0xcd4] ss:$48 sps:$4 sm:$0xff]  }
 0x11f   :  { %4103 = vmatpush1.bf16.msra.mxu0 %v6722_v37  ;;  %4292 = vmatpush1.bf16.msra.mxu1 %v6725_v38  ;;  %v8357_v1 = vpop.f32.mrb[6].mxu0  ;;  %v8359_v2 = vpop.f32.mrb[6].mxu1  ;;  %v6772_v37 = vld [vmem:[%s9617_s1 + $0xbb4] ss:$48 sps:$4 sm:$0xff]   ;;  %v6775_v38 = vld [vmem:[%s9617_s1 + $0xbbc] ss:$48 sps:$4 sm:$0xff]  }
 0x120   :  { %4104 = vmatprep.subr.bf16.mxu0 %v6730_v39  ;;  %4293 = vmatprep.subr.bf16.mxu1 %v6733_v40  ;;  %v8361_v3 = vpop.f32.mrb[7].mxu0  ;;  %v8363_v4 = vpop.f32.mrb[7].mxu1  ;;  %v6770_v39 = vld [vmem:[%s9617_s1 + $0xbb0] ss:$48 sps:$4 sm:$0xff]   ;;  %v6773_v40 = vld [vmem:[%s9617_s1 + $0xbb8] ss:$48 sps:$4 sm:$0xff]  }
 0x121   :  { %v6788_v62 = vld [vmem:[%s9617_s1 + $0xcd0] ss:$48 sps:$4 sm:$0xff]  }
 0x123   :  { %4105 = vmatpush1.bf16.msra.mxu0 %v6728_v42  ;;  %4294 = vmatpush1.bf16.msra.mxu1 %v6731_v44  ;;  %v6778_v42 = vld [vmem:[%s9617_s1 + $0xc14] ss:$48 sps:$4 sm:$0xff]   ;;  %v6781_v44 = vld [vmem:[%s9617_s1 + $0xc1c] ss:$48 sps:$4 sm:$0xff]  }
 0x124   :  { %4106 = vmatprep.subr.bf16.mxu0 %v6736_v45  ;;  %4295 = vmatprep.subr.bf16.mxu1 %v6739_v46  ;;  %v6776_v45 = vld [vmem:[%s9617_s1 + $0xc10] ss:$48 sps:$4 sm:$0xff]   ;;  %v6779_v46 = vld [vmem:[%s9617_s1 + $0xc18] ss:$48 sps:$4 sm:$0xff]  }
 0x125   :  { %v8389_v16 = vpop.f32.mrb[8].mxu0  ;;  %v8391_v17 = vpop.f32.mrb[8].mxu1 }
 0x126   :  { %v8393_v18 = vpop.f32.mrb[9].mxu0  ;;  %v8395_v19 = vpop.f32.mrb[9].mxu1 }
 0x127   :  { %4107 = vmatpush1.bf16.msra.mxu0 %v6734_v47  ;;  %4296 = vmatpush1.bf16.msra.mxu1 %v6737_v48  ;;  %v3705_v22 = vpop.f32.mrb[10].mxu0  ;;  %v8397_v23 = vpop.f32.mrb[10].mxu1  ;;  %v6784_v47 = vld [vmem:[%s9617_s1 + $0xc74] ss:$48 sps:$4 sm:$0xff]   ;;  %v6787_v48 = vld [vmem:[%s9617_s1 + $0xc7c] ss:$48 sps:$4 sm:$0xff]  }
 0x128   :  { %4108 = vmatprep.subr.bf16.mxu0 %v6742_v52  ;;  %4297 = vmatprep.subr.bf16.mxu1 %v6745_v53  ;;  %v8405_v26 = vpop.f32.mrb[11].mxu0  ;;  %v3896_v28 = vpop.f32.mrb[11].mxu1  ;;  %v6782_v52 = vld [vmem:[%s9617_s1 + $0xc70] ss:$48 sps:$4 sm:$0xff]   ;;  %v6785_v53 = vld [vmem:[%s9617_s1 + $0xc78] ss:$48 sps:$4 sm:$0xff]  }
 0x129   :  { %v6808_v22 = vld [vmem:[%s9617_s1 + $0xdf4] ss:$48 sps:$4 sm:$0xff]   ;;  %v6809_v28 = vld [vmem:[%s9617_s1 + $0xdf8] ss:$48 sps:$4 sm:$0xff]  }
 0x12b   :  { %4109 = vmatpush1.bf16.msra.mxu0 %v6740_v58  ;;  %4298 = vmatpush1.bf16.msra.mxu1 %v6743_v63  ;;  %v6793_v58 = vld [vmem:[%s9617_s1 + $0xcdc] ss:$48 sps:$4 sm:$0xff]   ;;  %v6791_v63 = vld [vmem:[%s9617_s1 + $0xcd8] ss:$48 sps:$4 sm:$0xff]  }
 0x12c   :  { %4110 = vmatprep.subr.bf16.mxu0 %v6748_v5  ;;  %4299 = vmatprep.subr.bf16.mxu1 %v6751_v7  ;;  %v6796_v5 = vld [vmem:[%s9617_s1 + $0xd34] ss:$48 sps:$4 sm:$0xff]   ;;  %v6799_v7 = vld [vmem:[%s9617_s1 + $0xd3c] ss:$48 sps:$4 sm:$0xff]  }
 0x12f   :  { %4111 = vmatpush1.bf16.msra.mxu0 %v6746_v8  ;;  %4300 = vmatpush1.bf16.msra.mxu1 %v6749_v10  ;;  %v6794_v8 = vld [vmem:[%s9617_s1 + $0xd30] ss:$48 sps:$4 sm:$0xff]   ;;  %v6797_v10 = vld [vmem:[%s9617_s1 + $0xd38] ss:$48 sps:$4 sm:$0xff]  }
 0x130   :  { %4112 = vmatprep.subr.bf16.mxu0 %v6754_v11  ;;  %4301 = vmatprep.subr.bf16.mxu1 %v6757_v12  ;;  %v6802_v11 = vld [vmem:[%s9617_s1 + $0xd94] ss:$48 sps:$4 sm:$0xff]   ;;  %v6805_v12 = vld [vmem:[%s9617_s1 + $0xd9c] ss:$48 sps:$4 sm:$0xff]  }
 0x133   :  { %4113 = vmatpush1.bf16.msra.mxu0 %v6752_v13  ;;  %4302 = vmatpush1.bf16.msra.mxu1 %v6755_v15  ;;  %v6800_v13 = vld [vmem:[%s9617_s1 + $0xd90] ss:$48 sps:$4 sm:$0xff]   ;;  %v6803_v15 = vld [vmem:[%s9617_s1 + $0xd98] ss:$48 sps:$4 sm:$0xff]  }
 0x134   :  { %4114 = vmatprep.subr.bf16.mxu0 %v6760_v24  ;;  %4303 = vmatprep.subr.bf16.mxu1 %v6763_v25  ;;  %v6811_v24 = vld [vmem:[%s9617_s1 + $0xdfc] ss:$48 sps:$4 sm:$0xff]   ;;  %v6806_v25 = vld [vmem:[%s9617_s1 + $0xdf0] ss:$48 sps:$4 sm:$0xff]  }
 0x137   :  { %4115 = vmatpush1.bf16.msra.mxu0 %v6758_v29  ;;  %4304 = vmatpush1.bf16.msra.mxu1 %v6761_v32  ;;  %v6814_v29 = vld [vmem:[%s9617_s1 + $0xe54] ss:$48 sps:$4 sm:$0xff]   ;;  %v6817_v32 = vld [vmem:[%s9617_s1 + $0xe5c] ss:$48 sps:$4 sm:$0xff]  }
 0x138   :  { %4116 = vmatprep.subr.bf16.mxu0 %v6766_v33  ;;  %4305 = vmatprep.subr.bf16.mxu1 %v6769_v34  ;;  %v6812_v33 = vld [vmem:[%s9617_s1 + $0xe50] ss:$48 sps:$4 sm:$0xff]   ;;  %v6815_v34 = vld [vmem:[%s9617_s1 + $0xe58] ss:$48 sps:$4 sm:$0xff]  }
 0x13b   :  { %4117 = vmatpush1.bf16.msra.mxu0 %v6764_v35  ;;  %4306 = vmatpush1.bf16.msra.mxu1 %v6767_v36  ;;  %v6820_v35 = vld [vmem:[%s9617_s1 + $0xeb4] ss:$48 sps:$4 sm:$0xff]   ;;  %v6823_v36 = vld [vmem:[%s9617_s1 + $0xebc] ss:$48 sps:$4 sm:$0xff]  }
 0x13c   :  { %4118 = vmatprep.subr.bf16.mxu0 %v6772_v37  ;;  %4307 = vmatprep.subr.bf16.mxu1 %v6775_v38  ;;  %v6818_v37 = vld [vmem:[%s9617_s1 + $0xeb0] ss:$48 sps:$4 sm:$0xff]   ;;  %v6821_v38 = vld [vmem:[%s9617_s1 + $0xeb8] ss:$48 sps:$4 sm:$0xff]  }
 0x13f   :  { %4119 = vmatpush1.bf16.msra.mxu0 %v6770_v39  ;;  %4308 = vmatpush1.bf16.msra.mxu1 %v6773_v40  ;;  %v6826_v39 = vld [vmem:[%s9617_s1 + $0xf14] ss:$48 sps:$4 sm:$0xff]   ;;  %v6829_v40 = vld [vmem:[%s9617_s1 + $0xf1c] ss:$48 sps:$4 sm:$0xff]  }
 0x140   :  { %4151 = vmatprep.subr.bf16.mxu0 %v6778_v42  ;;  %4340 = vmatprep.subr.bf16.mxu1 %v6781_v44 }
 0x142   :  { %4310 = vmatmul.mubr.bf16.vlgmr.msra.gmra.mrb[28].mxu1 %v7737_v41  ;;  %4121 = vmatmul.mubr.bf16.vlgmr.msra.gmra.mrb[28].mxu0 %v7737_v41 }
 0x143   :  { %4152 = vmatpush1.bf16.msra.mxu0 %v6776_v45  ;;  %4341 = vmatpush1.bf16.msra.mxu1 %v6779_v46 }
 0x144   :  { %4153 = vmatprep.subr.bf16.mxu0 %v6784_v47  ;;  %4342 = vmatprep.subr.bf16.mxu1 %v6787_v48 }
 0x145   :  { %4319 = vmatprep.mubr.bf16.mxu1 %v7757_v49  ;;  %4130 = vmatprep.mubr.bf16.mxu0 %v7757_v49 }
 0x147   :  { %4154 = vmatpush1.bf16.msra.mxu0 %v6782_v52  ;;  %4343 = vmatpush1.bf16.msra.mxu1 %v6785_v53 }
 0x148   :  { %4155 = vmatprep.subr.bf16.mxu0 %v6790_v56  ;;  %4344 = vmatprep.subr.bf16.mxu1 %v6793_v58  ;;  %v6824_v56 = vld [vmem:[%s9617_s1 + $0xf10] ss:$48 sps:$4 sm:$0xff]   ;;  %v6827_v58 = vld [vmem:[%s9617_s1 + $0xf18] ss:$48 sps:$4 sm:$0xff]  }
 0x14a   :  { %4320 = vmatmul.mubr.bf16.gmra.mrb[40].mxu1 %v7781_v0  ;;  %4131 = vmatmul.mubr.bf16.gmra.mrb[32].mxu0 %v7781_v0 }
 0x14b   :  { %4156 = vmatpush1.bf16.msra.mxu0 %v6788_v62  ;;  %4345 = vmatpush1.bf16.msra.mxu1 %v6791_v63 }
 0x14c   :  { %4157 = vmatprep.subr.bf16.mxu0 %v6796_v5  ;;  %4346 = vmatprep.subr.bf16.mxu1 %v6799_v7  ;;  %v6832_v5 = vld [vmem:[%s9617_s1 + $0xf74] ss:$48 sps:$4 sm:$0xff]   ;;  %v6835_v7 = vld [vmem:[%s9617_s1 + $0xf7c] ss:$48 sps:$4 sm:$0xff]  }
 0x14d   :  { %4329 = vmatprep.mubr.bf16.mxu1 %v7795_v6  ;;  %4140 = vmatprep.mubr.bf16.mxu0 %v7795_v6 }
 0x14f   :  { %4158 = vmatpush1.bf16.msra.mxu0 %v6794_v8  ;;  %4347 = vmatpush1.bf16.msra.mxu1 %v6797_v10  ;;  %v6833_v10 = vld [vmem:[%s9617_s1 + $0xf78] ss:$48 sps:$4 sm:$0xff]  }
 0x150   :  { %4159 = vmatprep.subr.bf16.mxu0 %v6802_v11  ;;  %4348 = vmatprep.subr.bf16.mxu1 %v6805_v12 }
 0x152   :  { %4330 = vmatmul.mubr.bf16.gmra.mrb[44].mxu1 %v7813_v14  ;;  %4141 = vmatmul.mubr.bf16.gmra.mrb[36].mxu0 %v7813_v14 }
 0x153   :  { %4160 = vmatpush1.bf16.msra.mxu0 %v6800_v13  ;;  %4349 = vmatpush1.bf16.msra.mxu1 %v6803_v15 }
 0x154   :  { %4161 = vmatprep.subr.bf16.mxu0 %v6808_v22  ;;  %4350 = vmatprep.subr.bf16.mxu1 %v6811_v24 }
 0x155   :  { %4183 = vmatprep.mubr.bf16.mxu0 %v7833_v21  ;;  %4372 = vmatprep.mubr.bf16.mxu1 %v7833_v21 }
 0x157   :  { %4162 = vmatpush1.bf16.msra.mxu0 %v6806_v25  ;;  %4351 = vmatpush1.bf16.msra.mxu1 %v6809_v28 }
 0x158   :  { %4163 = vmatprep.subr.bf16.mxu0 %v6814_v29  ;;  %4352 = vmatprep.subr.bf16.mxu1 %v6817_v32 }
 0x15b   :  { %4164 = vmatpush1.bf16.msra.mxu0 %v6812_v33  ;;  %4353 = vmatpush1.bf16.msra.mxu1 %v6815_v34  ;;  %v6847_v34 = vld [vmem:[%s9617_s1 + $0x103c] ss:$48 sps:$4 sm:$0xff]  }
 0x15c   :  { %4165 = vmatprep.subr.bf16.mxu0 %v6820_v35  ;;  %4354 = vmatprep.subr.bf16.mxu1 %v6823_v36 }
 0x15d   :  { %v3754_v42 = vpop.f32.mrb[12].mxu0  ;;  %v3943_v44 = vpop.f32.mrb[12].mxu1 }
 0x15e   :  { %v8552_v45 = vadd.f32 %v3943_v44, %v8347_v57  ;;  %v3756_v46 = vpop.f32.mrb[13].mxu0  ;;  %v3945_v47 = vpop.f32.mrb[13].mxu1  ;;  %v6856_v42 = vld [vmem:[%s9617_s1 + $0x10f4] ss:$48 sps:$4 sm:$0xff]   ;;  %v6859_v44 = vld [vmem:[%s9617_s1 + $0x10fc] ss:$48 sps:$4 sm:$0xff]  }
 0x15f   :  { %v8555_v48 = vadd.f32 %v3756_v46, %v8352_v60  ;;  %v3758_v52 = vpop.f32.mrb[14].mxu0  ;;  %v3947_v53 = vpop.f32.mrb[14].mxu1  ;;  %4166 = vmatpush1.bf16.msra.mxu0 %v6818_v37  ;;  %4355 = vmatpush1.bf16.msra.mxu1 %v6821_v38  ;;  %v6845_v37 = vld [vmem:[%s9617_s1 + $0x1038] ss:$48 sps:$4 sm:$0xff]   ;;  %v6850_v38 = vld [vmem:[%s9617_s1 + $0x1094] ss:$48 sps:$4 sm:$0xff]  }
 0x160   :  { %v8564_v57 = vadd.f32 %v3758_v52, %v8357_v1  ;;  %v8567_v62 = vadd.f32 %v3947_v53, %v8359_v2  ;;  %v3760_v60 = vpop.f32.mrb[15].mxu0  ;;  %v3949_v63 = vpop.f32.mrb[15].mxu1  ;;  %4167 = vmatprep.subr.bf16.mxu0 %v6826_v39  ;;  %4356 = vmatprep.subr.bf16.mxu1 %v6829_v40  ;;  %v6830_v2 = vld [vmem:[%s9617_s1 + $0xf70] ss:$48 sps:$4 sm:$0xff]   ;;  %v6851_v40 = vld [vmem:[%s9617_s1 + $0x1098] ss:$48 sps:$4 sm:$0xff]  }
 0x161   :  { %v8576_v8 = vadd.f32 %v3760_v60, %v8361_v3  ;;  %v8579_v1 = vadd.f32 %v3949_v63, %v8363_v4  ;;  %v6838_v3 = vld [vmem:[%s9617_s1 + $0xfd4] ss:$48 sps:$4 sm:$0xff]   ;;  %v6841_v4 = vld [vmem:[%s9617_s1 + $0xfdc] ss:$48 sps:$4 sm:$0xff]   ;;  %v6848_v39 = vld [vmem:[%s9617_s1 + $0x1090] ss:$48 sps:$4 sm:$0xff]  }
 0x162   :  { %v6854_v46 = vld [vmem:[%s9617_s1 + $0x10f0] ss:$48 sps:$4 sm:$0xff]   ;;  %v6857_v47 = vld [vmem:[%s9617_s1 + $0x10f8] ss:$48 sps:$4 sm:$0xff]   ;;  %v6862_v52 = vld [vmem:[%s9617_s1 + $0x1154] ss:$48 sps:$4 sm:$0xff]  }
 0x163   :  { %4168 = vmatpush1.bf16.msra.mxu0 %v6824_v56  ;;  %4357 = vmatpush1.bf16.msra.mxu1 %v6827_v58  ;;  %v6865_v53 = vld [vmem:[%s9617_s1 + $0x115c] ss:$48 sps:$4 sm:$0xff]   ;;  %v6860_v56 = vld [vmem:[%s9617_s1 + $0x1150] ss:$48 sps:$4 sm:$0xff]   ;;  %v6863_v58 = vld [vmem:[%s9617_s1 + $0x1158] ss:$48 sps:$4 sm:$0xff]  }
 0x164   :  { %4169 = vmatprep.subr.bf16.mxu0 %v6832_v5  ;;  %4358 = vmatprep.subr.bf16.mxu1 %v6835_v7  ;;  %v6868_v60 = vld [vmem:[%s9617_s1 + $0x11b4] ss:$48 sps:$4 sm:$0xff]   ;;  %v6871_v63 = vld [vmem:[%s9617_s1 + $0x11bc] ss:$48 sps:$4 sm:$0xff]   ;;  %v6866_v5 = vld [vmem:[%s9617_s1 + $0x11b0] ss:$48 sps:$4 sm:$0xff]  }
 0x165   :  { %v3764_v11 = vpop.f32.mrb[16].mxu0  ;;  %v3953_v12 = vpop.f32.mrb[16].mxu1  ;;  %v6869_v7 = vld [vmem:[%s9617_s1 + $0x11b8] ss:$48 sps:$4 sm:$0xff]  }
 0x166   :  { %v8594_v13 = vadd.f32 %v3764_v11, %v8389_v16  ;;  %v8597_v15 = vadd.f32 %v3953_v12, %v8391_v17  ;;  %v3766_v22 = vpop.f32.mrb[17].mxu0  ;;  %v3955_v24 = vpop.f32.mrb[17].mxu1  ;;  %v6836_v16 = vld [vmem:[%s9617_s1 + $0xfd0] ss:$48 sps:$4 sm:$0xff]   ;;  %v6839_v17 = vld [vmem:[%s9617_s1 + $0xfd8] ss:$48 sps:$4 sm:$0xff]  }
 0x167   :  { %v8600_v25 = vadd.f32 %v3766_v22, %v8393_v18  ;;  %v8603_v28 = vadd.f32 %v3955_v24, %v8395_v19  ;;  %v3768_v29 = vpop.f32.mrb[18].mxu0  ;;  %v3957_v32 = vpop.f32.mrb[18].mxu1  ;;  %4170 = vmatpush1.bf16.msra.mxu0 %v6830_v2  ;;  %4359 = vmatpush1.bf16.msra.mxu1 %v6833_v10  ;;  %v6844_v19 = vld [vmem:[%s9617_s1 + $0x1034] ss:$48 sps:$4 sm:$0xff]   ;;  %v6877_v10 = vld [vmem:[%s9617_s1 + $0x2c] ss:$48 sps:$4 sm:$0xff]  }
 0x168   :  { %v8612_v33 = vadd.f32 %v3957_v32, %v8397_v23  ;;  %v3770_v18 = vpop.f32.mrb[19].mxu0  ;;  %4171 = vmatprep.subr.bf16.mxu0 %v6838_v3  ;;  %4360 = vmatprep.subr.bf16.mxu1 %v6841_v4  ;;  %v3959_v35 = vpop.f32.mrb[19].mxu1  ;;  %v6842_v23 = vld [vmem:[%s9617_s1 + $0x1030] ss:$48 sps:$4 sm:$0xff]   ;;  %v6874_v2 = vld [vmem:[%s9617_s1 + $0x24] ss:$48 sps:$4 sm:$0xff]  }
 0x169   :  { %v8621_v36 = vadd.f32 %v3770_v18, %v8405_v26  ;;  %v6853_v26 = vld [vmem:[%s9617_s1 + $0x109c] ss:$48 sps:$4 sm:$0xff]   ;;  %v6872_v3 = vld [vmem:[%s9617_s1 + $0x20] ss:$48 sps:$4 sm:$0xff]   ;;  %v6875_v4 = vld [vmem:[%s9617_s1 + $0x28] ss:$48 sps:$4 sm:$0xff]  }
 0x16a   :  { %v6880_v11 = vld [vmem:[%s9617_s1 + $0x84] ss:$48 sps:$4 sm:$0xff]   ;;  %v6883_v12 = vld [vmem:[%s9617_s1 + $0x8c] ss:$48 sps:$4 sm:$0xff]   ;;  %v6878_v22 = vld [vmem:[%s9617_s1 + $0x80] ss:$48 sps:$4 sm:$0xff]  }
 0x16b   :  { %4172 = vmatpush1.bf16.msra.mxu0 %v6836_v16  ;;  %4361 = vmatpush1.bf16.msra.mxu1 %v6839_v17  ;;  %v6881_v24 = vld [vmem:[%s9617_s1 + $0x88] ss:$48 sps:$4 sm:$0xff]   ;;  %v6886_v29 = vld [vmem:[%s9617_s1 + $0xe4] ss:$48 sps:$4 sm:$0xff]   ;;  %v6889_v32 = vld [vmem:[%s9617_s1 + $0xec] ss:$48 sps:$4 sm:$0xff]  }
 0x16c   :  { %4173 = vmatprep.subr.bf16.mxu0 %v6844_v19  ;;  %4362 = vmatprep.subr.bf16.mxu1 %v6847_v34  ;;  %v6884_v16 = vld [vmem:[%s9617_s1 + $0xe0] ss:$48 sps:$4 sm:$0xff]   ;;  %v6887_v17 = vld [vmem:[%s9617_s1 + $0xe8] ss:$48 sps:$4 sm:$0xff]   ;;  %v6892_v18 = vld [vmem:[%s9617_s1 + $0x144] ss:$48 sps:$4 sm:$0xff]  }
 0x16d   :  { %v6895_v19 = vld [vmem:[%s9617_s1 + $0x14c] ss:$48 sps:$4 sm:$0xff]   ;;  %v6890_v34 = vld [vmem:[%s9617_s1 + $0x140] ss:$48 sps:$4 sm:$0xff]   ;;  %v6893_v35 = vld [vmem:[%s9617_s1 + $0x148] ss:$48 sps:$4 sm:$0xff]  }
 0x16f   :  { %4174 = vmatpush1.bf16.msra.mxu0 %v6842_v23  ;;  %4363 = vmatpush1.bf16.msra.mxu1 %v6845_v37  ;;  %v604_v23 = vlaneseq  ;;  %v6898_v37 = vld [vmem:[%s9617_s1 + $0x1a4] ss:$48 sps:$4 sm:$0xff]  }
 0x170   :  { %4175 = vmatprep.subr.bf16.mxu0 %v6850_v38  ;;  %4364 = vmatprep.subr.bf16.mxu1 %v6853_v26  ;;  %v6901_v38 = vld [vmem:[%s9617_s1 + $0x1ac] ss:$48 sps:$4 sm:$0xff]   ;;  %v6896_v26 = vld [vmem:[%s9617_s1 + $0x1a0] ss:$48 sps:$4 sm:$0xff]  }
 0x173   :  { %4176 = vmatpush1.bf16.msra.mxu0 %v6848_v39  ;;  %4365 = vmatpush1.bf16.msra.mxu1 %v6851_v40  ;;  %v6899_v39 = vld [vmem:[%s9617_s1 + $0x1a8] ss:$48 sps:$4 sm:$0xff]   ;;  %v8745_v40 = vshrl.u32 %v604_v23, 7 }
 0x174   :  { %4177 = vmatprep.subr.bf16.mxu0 %v6856_v42  ;;  %4366 = vmatprep.subr.bf16.mxu1 %v6859_v44  ;;  %v6904_v42 = vld [vmem:[%s9617_s1 + $0x204] ss:$48 sps:$4 sm:$0xff]   ;;  %v6907_v44 = vld [vmem:[%s9617_s1 + $0x20c] ss:$48 sps:$4 sm:$0xff]  }
 0x175   :  { %vm4806_vm0 = vcmp.lt.s32.totalorder %v8745_v40, 6  ;;  %vm4787_vm1 = vcmp.lt.s32.totalorder %v8745_v40, 7 }
 0x177   :  { %4178 = vmatpush1.bf16.msra.mxu0 %v6854_v46  ;;  %4367 = vmatpush1.bf16.msra.mxu1 %v6857_v47  ;;  %v6902_v46 = vld [vmem:[%s9617_s1 + $0x200] ss:$48 sps:$4 sm:$0xff]   ;;  %v6905_v47 = vld [vmem:[%s9617_s1 + $0x208] ss:$48 sps:$4 sm:$0xff]  }
 0x178   :  { %4179 = vmatprep.subr.bf16.mxu0 %v6862_v52  ;;  %4368 = vmatprep.subr.bf16.mxu1 %v6865_v53  ;;  %v6910_v52 = vld [vmem:[%s9617_s1 + $0x264] ss:$48 sps:$4 sm:$0xff]   ;;  %v6913_v53 = vld [vmem:[%s9617_s1 + $0x26c] ss:$48 sps:$4 sm:$0xff]  }
 0x17b   :  { %4180 = vmatpush1.bf16.msra.mxu0 %v6860_v56  ;;  %4369 = vmatpush1.bf16.msra.mxu1 %v6863_v58 }
 0x17c   :  { %4181 = vmatprep.subr.bf16.mxu0 %v6868_v60  ;;  %4370 = vmatprep.subr.bf16.mxu1 %v6871_v63 }
 0x17f   :  { %4182 = vmatpush1.bf16.msra.mxu0 %v6866_v5  ;;  %4371 = vmatpush1.bf16.msra.mxu1 %v6869_v7  ;;  %v6908_v5 = vld [vmem:[%s9617_s1 + $0x260] ss:$48 sps:$4 sm:$0xff]  }
 0x180   :  { %4403 = vmatprep.subr.bf16.mxu0 %v6874_v2  ;;  %4592 = vmatprep.subr.bf16.mxu1 %v6877_v10  ;;  %v6911_v10 = vld [vmem:[%s9617_s1 + $0x268] ss:$48 sps:$4 sm:$0xff]  }
 0x182   :  { %4184 = vmatmul.mubr.bf16.vlgmr.msra.gmra.mrb[28].mxu0 %v7989_v20  ;;  %4373 = vmatmul.mubr.bf16.vlgmr.msra.gmra.mrb[28].mxu1 %v7989_v20 }
 0x183   :  { %4404 = vmatpush1.bf16.msra.mxu0 %v6872_v3  ;;  %4593 = vmatpush1.bf16.msra.mxu1 %v6875_v4  ;;  %v6916_v3 = vld [vmem:[%s9617_s1 + $0x2c4] ss:$48 sps:$4 sm:$0xff]  }
 0x184   :  { %4405 = vmatprep.subr.bf16.mxu0 %v6880_v11  ;;  %4594 = vmatprep.subr.bf16.mxu1 %v6883_v12 }
 0x185   :  { %4193 = vmatprep.mubr.bf16.mxu0 %v8009_v30  ;;  %4382 = vmatprep.mubr.bf16.mxu1 %v8009_v30 }
 0x187   :  { %4406 = vmatpush1.bf16.msra.mxu0 %v6878_v22  ;;  %4595 = vmatpush1.bf16.msra.mxu1 %v6881_v24  ;;  %v6919_v22 = vld [vmem:[%s9617_s1 + $0x2cc] ss:$48 sps:$4 sm:$0xff]  }
 0x188   :  { %4407 = vmatprep.subr.bf16.mxu0 %v6886_v29  ;;  %4596 = vmatprep.subr.bf16.mxu1 %v6889_v32 }
 0x18a   :  { %4194 = vmatmul.mubr.bf16.gmra.mrb[32].mxu0 %v8033_v43  ;;  %4383 = vmatmul.mubr.bf16.gmra.mrb[48].mxu1 %v8033_v43 }
 0x18b   :  { %4408 = vmatpush1.bf16.msra.mxu0 %v6884_v16  ;;  %4597 = vmatpush1.bf16.msra.mxu1 %v6887_v17 }
 0x18c   :  { %4409 = vmatprep.subr.bf16.mxu0 %v6892_v18  ;;  %4598 = vmatprep.subr.bf16.mxu1 %v6895_v19 }
 0x18d   :  { %4203 = vmatprep.mubr.bf16.mxu0 %v8047_v51  ;;  %4392 = vmatprep.mubr.bf16.mxu1 %v8047_v51 }
 0x18f   :  { %4410 = vmatpush1.bf16.msra.mxu0 %v6890_v34  ;;  %4599 = vmatpush1.bf16.msra.mxu1 %v6893_v35 }
 0x190   :  { %4411 = vmatprep.subr.bf16.mxu0 %v6898_v37  ;;  %4600 = vmatprep.subr.bf16.mxu1 %v6901_v38 }
 0x192   :  { %4204 = vmatmul.mubr.bf16.gmra.mrb[36].mxu0 %v8065_v61  ;;  %4393 = vmatmul.mubr.bf16.gmra.mrb[52].mxu1 %v8065_v61 }
 0x193   :  { %4412 = vmatpush1.bf16.msra.mxu0 %v6896_v26  ;;  %4601 = vmatpush1.bf16.msra.mxu1 %v6899_v39 }
 0x194   :  { %4413 = vmatprep.subr.bf16.mxu0 %v6904_v42  ;;  %4602 = vmatprep.subr.bf16.mxu1 %v6907_v44 }
 0x195   :  { %v3807_v56 = vpop.f32.mrb[0].mxu0  ;;  %v3996_v58 = vpop.f32.mrb[0].mxu1  ;;  %4435 = vmatprep.mubr.bf16.mxu0 %v7409_v50  ;;  %4624 = vmatprep.mubr.bf16.mxu1 %v7409_v50 }
 0x196   :  { %v3809_v60 = vpop.f32.mrb[1].mxu0  ;;  %v8771_v63 = vpop.f32.mrb[1].mxu1  ;;  %v4800_v50 = vrot.slane %v3996_v58, 2 }
 0x197   :  { %v3811_v7 = vpop.f32.mrb[2].mxu0  ;;  %v4000_v2 = vpop.f32.mrb[2].mxu1  ;;  %4414 = vmatpush1.bf16.msra.mxu0 %v6902_v46  ;;  %4603 = vmatpush1.bf16.msra.mxu1 %v6905_v47  ;;  %v4781_v24 = vrot.slane %v3809_v60, 1 }
 0x198   :  { %v4801_v4 = vrot.slane %v4000_v2, 2  ;;  %v3813_v11 = vpop.f32.mrb[3].mxu0  ;;  %v8782_v12 = vpop.f32.mrb[3].mxu1  ;;  %4415 = vmatprep.subr.bf16.mxu0 %v6910_v52  ;;  %4604 = vmatprep.subr.bf16.mxu1 %v6913_v53 }
 0x199   :  { %v4782_v29 = vrot.slane %v3813_v11, 1 }
 0x19a   :  { %v4811_v32 = vsel %vm4806_vm0, %v4800_v50, %v4801_v4 }
 0x19b   :  { %12 = vsyncpa [#allocation3], 0  ;;  %v4792_v16 = vsel %vm4787_vm1, %v4781_v24, %v4782_v29  ;;  %4416 = vmatpush1.bf16.msra.mxu0 %v6908_v5  ;;  %4605 = vmatpush1.bf16.msra.mxu1 %v6911_v10  ;;  %v6914_v17 = vld [vmem:[%s9617_s1 + $0x2c0] ss:$48 sps:$4 sm:$0xff]   ;;  %v6917_v18 = vld [vmem:[%s9617_s1 + $0x2c8] ss:$48 sps:$4 sm:$0xff]  }
 0x19c   :  { %v4794_v19 = vadd.f32 %v4792_v16, %v3807_v56  ;;  %4417 = vmatprep.subr.bf16.mxu0 %v6916_v3  ;;  %4606 = vmatprep.subr.bf16.mxu1 %v6919_v22  ;;  %v6922_v34 = vld [vmem:[%s9617_s1 + $0x324] ss:$48 sps:$4 sm:$0xff]   ;;  %v6925_v35 = vld [vmem:[%s9617_s1 + $0x32c] ss:$48 sps:$4 sm:$0xff]   ;;  %v6920_v44 = vld [vmem:[%s9617_s1 + $0x320] ss:$48 sps:$4 sm:$0xff]  }
 0x19d   :  { %v3817_v23 = vpop.f32.mrb[20].mxu0  ;;  %v4006_v37 = vpop.f32.mrb[20].mxu1  ;;  %v6923_v53 = vld [vmem:[%s9617_s1 + $0x328] ss:$48 sps:$4 sm:$0xff]   ;;  %v8820_v10 = vadd.s32 8, %v8745_v40  ;;  %vm5051_vm3 = vcmask 1041409  }
 0x19e   :  { %v4813_v38 = vadd.f32 %v4811_v32, %v4794_v19  ;;  %v4007_v26 = vadd.f32 %v4006_v37, %v8552_v45  ;;  %v3819_v39 = vpop.f32.mrb[21].mxu0  ;;  %v4008_v42 = vpop.f32.mrb[21].mxu1  ;;  %v6928_v45 = vld [vmem:[%s9617_s1 + $0x384] ss:$48 sps:$4 sm:$0xff]   ;;  %v6926_v22 = vld [vmem:[%s9617_s1 + $0x380] ss:$48 sps:$4 sm:$0xff]  }
 0x19f   :  { %v3820_v46 = vadd.f32 %v3819_v39, %v8555_v48  ;;  %v3821_v47 = vpop.f32.mrb[22].mxu0  ;;  %v4010_v52 = vpop.f32.mrb[22].mxu1  ;;  %4418 = vmatpush1.bf16.msra.mxu0 %v6914_v17  ;;  %4607 = vmatpush1.bf16.msra.mxu1 %v6917_v18  ;;  %v6931_v48 = vld [vmem:[%s9617_s1 + $0x38c] ss:$48 sps:$4 sm:$0xff]   ;;  %v6929_v24 = vld [vmem:[%s9617_s1 + $0x388] ss:$48 sps:$4 sm:$0xff]  }
 0x1a0   :  { %v4802_v56 = vrot.slane %v4007_v26, 2  ;;  %v3822_v58 = vadd.f32 %v3821_v47, %v8564_v57  ;;  %v4011_v60 = vadd.f32 %v4010_v52, %v8567_v62  ;;  %v3823_v5 = vpop.f32.mrb[23].mxu0  ;;  %v4012_v2 = vpop.f32.mrb[23].mxu1  ;;  %4419 = vmatprep.subr.bf16.mxu0 %v6922_v34  ;;  %4608 = vmatprep.subr.bf16.mxu1 %v6925_v35  ;;  %vm4820_vm2 = vcmp.le.s32.totalorder %v8820_v10, 13  ;;  %v6932_v34 = vld [vmem:[%s9617_s1 + $0x3e0] ss:$48 sps:$4 sm:$0xff]  }
 0x1a1   :  { %v4783_v3 = vrot.slane %v3820_v46, 1  ;;  %v3824_v50 = vadd.f32 %v3823_v5, %v8576_v8  ;;  %v8824_v11 = vadd.f32 %v4012_v2, %v8579_v1  ;;  %v6934_v1 = vld [vmem:[%s9617_s1 + $0x3e4] ss:$48 sps:$4 sm:$0xff]   ;;  %v6935_v35 = vld [vmem:[%s9617_s1 + $0x3e8] ss:$48 sps:$4 sm:$0xff]   ;;  %vm4895_vm4 = vcmp.lt.s32.totalorder %v8745_v40, 5 }
 0x1a2   :  { %v4810_v57 = vsel %vm4806_vm0, %v4801_v4, %v4802_v56  ;;  %v6937_v4 = vld [vmem:[%s9617_s1 + $0x3ec] ss:$48 sps:$4 sm:$0xff]   ;;  %vm4909_vm5 = vcmp.le.s32.totalorder %v8820_v10, 12  ;;  %vm7217_vm6 = vmmov 0   ;;  %vm5002_vm7 = vcmp.lt.s32.totalorder %v8745_v40, 4  ;;  %s7218_s13 = smov [#allocation2]  }
 0x1a3   :  { %v4791_v62 = vsel %vm4787_vm1, %v4782_v29, %v4783_v3  ;;  %4420 = vmatpush1.bf16.msra.mxu0 %v6920_v44  ;;  %4609 = vmatpush1.bf16.msra.mxu1 %v6923_v53  ;;  %v4803_v44 = vrot.slane %v4011_v60, 2  ;;  %v4784_v53 = vrot.slane %v3824_v50, 1  ;;  %vm5016_vm8 = vcmp.le.s32.totalorder %v8820_v10, 11 }
 0x1a4   :  { %v4795_v8 = vadd.f32 %v4791_v62, %v3811_v7  ;;  %4421 = vmatprep.subr.bf16.mxu0 %v6928_v45  ;;  %4610 = vmatprep.subr.bf16.mxu1 %v6931_v48  ;;  %v6949_v62 = vld [vmem:[%s9617_s1 + $0x4ac] ss:$48 sps:$4 sm:$0xff]  }
 0x1a5   :  { %v3827_v29 = vpop.f32.mrb[24].mxu0  ;;  %v4016_v32 = vpop.f32.mrb[24].mxu1 }
 0x1a6   :  { %v4814_v16 = vadd.f32 %v4810_v57, %v4795_v8  ;;  %v3828_v17 = vadd.f32 %v3827_v29, %v8594_v13  ;;  %v4017_v18 = vadd.f32 %v4016_v32, %v8597_v15  ;;  %v3829_v7 = vpop.f32.mrb[25].mxu0  ;;  %v4018_v19 = vpop.f32.mrb[25].mxu1  ;;  %v6940_v13 = vld [vmem:[%s9617_s1 + $0x444] ss:$48 sps:$4 sm:$0xff]   ;;  %v6943_v15 = vld [vmem:[%s9617_s1 + $0x44c] ss:$48 sps:$4 sm:$0xff]  }
 0x1a7   :  { %v3830_v23 = vadd.f32 %v3829_v7, %v8600_v25  ;;  %v8853_v37 = vadd.f32 %v4018_v19, %v8603_v28  ;;  %v3831_v26 = vpop.f32.mrb[26].mxu0  ;;  %v4020_v39 = vpop.f32.mrb[26].mxu1  ;;  %4422 = vmatpush1.bf16.msra.mxu0 %v6926_v22  ;;  %4611 = vmatpush1.bf16.msra.mxu1 %v6929_v24  ;;  %v6946_v57 = vld [vmem:[%s9617_s1 + $0x4a4] ss:$48 sps:$4 sm:$0xff]   ;;  %v6950_v19 = vld [vmem:[%s9617_s1 + $0x500] ss:$48 sps:$4 sm:$0xff]  }
 0x1a8   :  { %v4832_v42 = vsel %vm4820_vm2, %v4814_v16, -inf  ;;  %v4804_v25 = vrot.slane %v4017_v18, 2  ;;  %v4021_v28 = vadd.f32 %v4020_v39, %v8612_v33  ;;  %v3833_v46 = vpop.f32.mrb[27].mxu0  ;;  %4423 = vmatprep.subr.bf16.mxu0 %v6934_v1  ;;  %4612 = vmatprep.subr.bf16.mxu1 %v6937_v4  ;;  %v4022_v47 = vpop.f32.mrb[27].mxu1  ;;  %v6938_v33 = vld [vmem:[%s9617_s1 + $0x440] ss:$48 sps:$4 sm:$0xff]  }
 0x1a9   :  { %v4838_v52 = vmax.f32 %v4813_v38, %v4832_v42  ;;  %v4785_v45 = vrot.slane %v3830_v23, 1  ;;  %v3834_v56 = vadd.f32 %v3833_v46, %v8621_v36  ;;  %v6941_v38 = vld [vmem:[%s9617_s1 + $0x448] ss:$48 sps:$4 sm:$0xff]   ;;  %v6952_v32 = vld [vmem:[%s9617_s1 + $0x504] ss:$48 sps:$4 sm:$0xff]  }
 0x1aa   :  { %v4808_v5 = vsel %vm4806_vm0, %v4803_v44, %v4804_v25  ;;  %v4805_v2 = vrot.slane %v4021_v28, 2  ;;  %v6947_v4 = vld [vmem:[%s9617_s1 + $0x4a8] ss:$48 sps:$4 sm:$0xff]   ;;  %v6955_v16 = vld [vmem:[%s9617_s1 + $0x50c] ss:$48 sps:$4 sm:$0xff]  }
 0x1ab   :  { %v4839_v48 = vrot.slane %v4838_v52, 4  ;;  %v4789_v60 = vsel %vm4787_vm1, %v4784_v53, %v4785_v45  ;;  %v4786_v3 = vrot.slane %v3834_v56, 1  ;;  %4424 = vmatpush1.bf16.msra.mxu0 %v6932_v34  ;;  %4613 = vmatpush1.bf16.msra.mxu1 %v6935_v35  ;;  %v6953_v34 = vld [vmem:[%s9617_s1 + $0x508] ss:$48 sps:$4 sm:$0xff]   ;;  %v6958_v35 = vld [vmem:[%s9617_s1 + $0x564] ss:$48 sps:$4 sm:$0xff]  }
 0x1ac   :  { %v4797_v36 = vadd.f32 %v4789_v60, %v3822_v58  ;;  %v4807_v50 = vsel %vm4806_vm0, %v4804_v25, %v4805_v2  ;;  %4425 = vmatprep.subr.bf16.mxu0 %v6940_v13  ;;  %4614 = vmatprep.subr.bf16.mxu1 %v6943_v15  ;;  %v6944_v58 = vld [vmem:[%s9617_s1 + $0x4a0] ss:$48 sps:$4 sm:$0xff]   ;;  %v6961_v23 = vld [vmem:[%s9617_s1 + $0x56c] ss:$48 sps:$4 sm:$0xff]   ;;  %v6959_v42 = vld [vmem:[%s9617_s1 + $0x568] ss:$48 sps:$4 sm:$0xff]  }
 0x1ad   :  { %v4788_v22 = vsel %vm4787_vm1, %v4785_v45, %v4786_v3  ;;  %v4840_v1 = vmax.f32 %v4838_v52, %v4839_v48  ;;  %v6956_v15 = vld [vmem:[%s9617_s1 + $0x560] ss:$48 sps:$4 sm:$0xff]   ;;  %v6964_v44 = vld [vmem:[%s9617_s1 + $0x5c4] ss:$48 sps:$4 sm:$0xff]   ;;  %v6967_v25 = vld [vmem:[%s9617_s1 + $0x5cc] ss:$48 sps:$4 sm:$0xff]  }
 0x1ae   :  { %v4816_v24 = vadd.f32 %v4808_v5, %v4797_v36  ;;  %v4798_v8 = vadd.f32 %v4788_v22, %v3828_v17  ;;  %v6962_v47 = vld [vmem:[%s9617_s1 + $0x5c0] ss:$48 sps:$4 sm:$0xff]   ;;  %v6965_v52 = vld [vmem:[%s9617_s1 + $0x5c8] ss:$48 sps:$4 sm:$0xff]   ;;  %v6970_v45 = vld [vmem:[%s9617_s1 + $0x624] ss:$48 sps:$4 sm:$0xff]  }
 0x1af   :  { %4426 = vmatpush1.bf16.msra.mxu0 %v6938_v33  ;;  %4615 = vmatpush1.bf16.msra.mxu1 %v6941_v38  ;;  %v4841_v18 = vrot.slane %v4840_v1, 2  ;;  %v6973_v56 = vld [vmem:[%s9617_s1 + $0x62c] ss:$48 sps:$4 sm:$0xff]   ;;  %v6968_v2 = vld [vmem:[%s9617_s1 + $0x620] ss:$48 sps:$4 sm:$0xff]  }
 0x1b0   :  { %v4817_v29 = vadd.f32 %v4807_v50, %v4798_v8  ;;  %4427 = vmatprep.subr.bf16.mxu0 %v6946_v57  ;;  %4616 = vmatprep.subr.bf16.mxu1 %v6949_v62  ;;  %v6971_v48 = vld [vmem:[%s9617_s1 + $0x628] ss:$48 sps:$4 sm:$0xff]   ;;  %v6976_v33 = vld [vmem:[%s9617_s1 + $0x684] ss:$48 sps:$4 sm:$0xff]   ;;  %v6979_v38 = vld [vmem:[%s9617_s1 + $0x68c] ss:$48 sps:$4 sm:$0xff]  }
 0x1b1   :  { %v4842_v39 = vmax.f32 %v4840_v1, %v4841_v18  ;;  %v6974_v50 = vld [vmem:[%s9617_s1 + $0x680] ss:$48 sps:$4 sm:$0xff]   ;;  %v6977_v57 = vld [vmem:[%s9617_s1 + $0x688] ss:$48 sps:$4 sm:$0xff]   ;;  %v6982_v62 = vld [vmem:[%s9617_s1 + $0x6e4] ss:$48 sps:$4 sm:$0xff]  }
 0x1b2   :  { %v4835_v17 = vsel %vm4820_vm2, %v4817_v29, -inf  ;;  %v6980_v22 = vld [vmem:[%s9617_s1 + $0x6e0] ss:$48 sps:$4 sm:$0xff]   ;;  %v6988_v8 = vld [vmem:[%s9617_s1 + $0x744] ss:$48 sps:$4 sm:$0xff]  }
 0x1b3   :  { %v4846_v7 = vmax.f32 %v4816_v24, %v4835_v17  ;;  %4428 = vmatpush1.bf16.msra.mxu0 %v6944_v58  ;;  %4617 = vmatpush1.bf16.msra.mxu1 %v6947_v4  ;;  %v4843_v53 = vrot.slane %v4842_v39, 1  ;;  %v6983_v24 = vld [vmem:[%s9617_s1 + $0x6e8] ss:$48 sps:$4 sm:$0xff]   ;;  %v6986_v1 = vld [vmem:[%s9617_s1 + $0x740] ss:$48 sps:$4 sm:$0xff]  }
 0x1b4   :  { %4429 = vmatprep.subr.bf16.mxu0 %v6952_v32  ;;  %4618 = vmatprep.subr.bf16.mxu1 %v6955_v16  ;;  %v6989_v58 = vld [vmem:[%s9617_s1 + $0x748] ss:$48 sps:$4 sm:$0xff]   ;;  %v6994_v4 = vld [vmem:[%s9617_s1 + $0x7a4] ss:$48 sps:$4 sm:$0xff]   ;;  %v6992_v29 = vld [vmem:[%s9617_s1 + $0x7a0] ss:$48 sps:$4 sm:$0xff]  }
 0x1b5   :  { %v4847_v26 = vrot.slane %v4846_v7, 4  ;;  %v4844_v60 = vmax.f32 %v4842_v39, %v4843_v53  ;;  %v6995_v32 = vld [vmem:[%s9617_s1 + $0x7a8] ss:$48 sps:$4 sm:$0xff]   ;;  %v7000_v16 = vld [vmem:[%s9617_s1 + $0x804] ss:$48 sps:$4 sm:$0xff]  }
 0x1b6   :  { %v6998_v17 = vld [vmem:[%s9617_s1 + $0x800] ss:$48 sps:$4 sm:$0xff]   ;;  %v7001_v18 = vld [vmem:[%s9617_s1 + $0x808] ss:$48 sps:$4 sm:$0xff]   ;;  %v7018_v39 = vld [vmem:[%s9617_s1 + $0x924] ss:$48 sps:$4 sm:$0xff]  }
 0x1b7   :  { %v4848_v13 = vmax.f32 %v4846_v7, %v4847_v26  ;;  %4430 = vmatpush1.bf16.msra.mxu0 %v6950_v19  ;;  %4619 = vmatpush1.bf16.msra.mxu1 %v6953_v34  ;;  %v7006_v7 = vld [vmem:[%s9617_s1 + $0x864] ss:$48 sps:$4 sm:$0xff]   ;;  %v7004_v19 = vld [vmem:[%s9617_s1 + $0x860] ss:$48 sps:$4 sm:$0xff]   ;;  %v7007_v34 = vld [vmem:[%s9617_s1 + $0x868] ss:$48 sps:$4 sm:$0xff]  }
 0x1b8   :  { %4431 = vmatprep.subr.bf16.mxu0 %v6958_v35  ;;  %4620 = vmatprep.subr.bf16.mxu1 %v6961_v23  ;;  %v7012_v35 = vld [vmem:[%s9617_s1 + $0x8c4] ss:$48 sps:$4 sm:$0xff]   ;;  %v7010_v23 = vld [vmem:[%s9617_s1 + $0x8c0] ss:$48 sps:$4 sm:$0xff]   ;;  %v7013_v26 = vld [vmem:[%s9617_s1 + $0x8c8] ss:$48 sps:$4 sm:$0xff]  }
 0x1b9   :  { %v4849_v28 = vrot.slane %v4848_v13, 2  ;;  %v7022_v53 = vld [vmem:[%s9617_s1 + $0x980] ss:$48 sps:$4 sm:$0xff]  }
 0x1bb   :  { %v4850_v46 = vmax.f32 %v4848_v13, %v4849_v28  ;;  %4432 = vmatpush1.bf16.msra.mxu0 %v6956_v15  ;;  %4621 = vmatpush1.bf16.msra.mxu1 %v6959_v42  ;;  %v7021_v13 = vld [vmem:[%s9617_s1 + $0x92c] ss:$48 sps:$4 sm:$0xff]  }
 0x1bc   :  { %4433 = vmatprep.subr.bf16.mxu0 %v6964_v44  ;;  %4622 = vmatprep.subr.bf16.mxu1 %v6967_v25  ;;  %v7016_v44 = vld [vmem:[%s9617_s1 + $0x920] ss:$48 sps:$4 sm:$0xff]   ;;  %v7019_v25 = vld [vmem:[%s9617_s1 + $0x928] ss:$48 sps:$4 sm:$0xff]  }
 0x1bd   :  { %v4851_v5 = vrot.slane %v4850_v46, 1 }
 0x1bf   :  { %4434 = vmatpush1.bf16.msra.mxu0 %v6962_v47  ;;  %4623 = vmatpush1.bf16.msra.mxu1 %v6965_v52  ;;  %v4852_v3 = vmax.f32 %v4850_v46, %v4851_v5  ;;  %v7024_v46 = vld [vmem:[%s9617_s1 + $0x984] ss:$48 sps:$4 sm:$0xff]   ;;  %v7027_v47 = vld [vmem:[%s9617_s1 + $0x98c] ss:$48 sps:$4 sm:$0xff]  }
 0x1c0   :  { %4466 = vmatprep.subr.bf16.mxu0 %v6970_v45  ;;  %4655 = vmatprep.subr.bf16.mxu1 %v6973_v56  ;;  %v7025_v45 = vld [vmem:[%s9617_s1 + $0x988] ss:$48 sps:$4 sm:$0xff]   ;;  %v7030_v56 = vld [vmem:[%s9617_s1 + $0x9e4] ss:$48 sps:$4 sm:$0xff]   ;;  %v7033_v5 = vld [vmem:[%s9617_s1 + $0x9ec] ss:$48 sps:$4 sm:$0xff]  }
 0x1c1   :  { %v8948_v36 = vsel %vm5051_vm3, %v4852_v3, %v4844_v60  ;;  %v7028_v60 = vld [vmem:[%s9617_s1 + $0x9e0] ss:$48 sps:$4 sm:$0xff]   ;;  %v7031_v3 = vld [vmem:[%s9617_s1 + $0x9e8] ss:$48 sps:$4 sm:$0xff]  }
 0x1c2   :  { %4436 = vmatmul.mubr.bf16.vlgmr.msra.gmra.mrb[40].mxu0 %v7479_v9  ;;  %4625 = vmatmul.mubr.bf16.vlgmr.msra.gmra.mrb[56].mxu1 %v7479_v9  ;;  %v6985_v9 = vld [vmem:[%s9617_s1 + $0x6ec] ss:$48 sps:$4 sm:$0xff]  }
 0x1c3   :  { %4467 = vmatpush1.bf16.msra.mxu0 %v6968_v2  ;;  %4656 = vmatpush1.bf16.msra.mxu1 %v6971_v48 }
 0x1c4   :  { %4468 = vmatprep.subr.bf16.mxu0 %v6976_v33  ;;  %4657 = vmatprep.subr.bf16.mxu1 %v6979_v38  ;;  %v7036_v38 = vld [vmem:[%s9617_s1 + $0xa44] ss:$48 sps:$4 sm:$0xff]  }
 0x1c5   :  { %4445 = vmatprep.mubr.bf16.mxu0 %v7534_v27  ;;  %4634 = vmatprep.mubr.bf16.mxu1 %v7534_v27  ;;  %v6991_v27 = vld [vmem:[%s9617_s1 + $0x74c] ss:$48 sps:$4 sm:$0xff]  }
 0x1c7   :  { %4469 = vmatpush1.bf16.msra.mxu0 %v6974_v50  ;;  %4658 = vmatpush1.bf16.msra.mxu1 %v6977_v57  ;;  %v7039_v50 = vld [vmem:[%s9617_s1 + $0xa4c] ss:$48 sps:$4 sm:$0xff]  }
 0x1c8   :  { %4470 = vmatprep.subr.bf16.mxu0 %v6982_v62  ;;  %4659 = vmatprep.subr.bf16.mxu1 %v6985_v9  ;;  %v7034_v62 = vld [vmem:[%s9617_s1 + $0xa40] ss:$48 sps:$4 sm:$0xff]   ;;  %v7037_v9 = vld [vmem:[%s9617_s1 + $0xa48] ss:$48 sps:$4 sm:$0xff]  }
 0x1ca   :  { %4446 = vmatmul.mubr.bf16.gmra.mrb[44].mxu0 %v7545_v31  ;;  %4635 = vmatmul.mubr.bf16.gmra.mrb[60].mxu1 %v7545_v31  ;;  %v6997_v31 = vld [vmem:[%s9617_s1 + $0x7ac] ss:$48 sps:$4 sm:$0xff]  }
 0x1cb   :  { %4471 = vmatpush1.bf16.msra.mxu0 %v6980_v22  ;;  %4660 = vmatpush1.bf16.msra.mxu1 %v6983_v24  ;;  %v7042_v22 = vld [vmem:[%s9617_s1 + $0xaa4] ss:$48 sps:$4 sm:$0xff]   ;;  %v7045_v24 = vld [vmem:[%s9617_s1 + $0xaac] ss:$48 sps:$4 sm:$0xff]  }
 0x1cc   :  { %4472 = vmatprep.subr.bf16.mxu0 %v6988_v8  ;;  %4661 = vmatprep.subr.bf16.mxu1 %v6991_v27  ;;  %v7040_v8 = vld [vmem:[%s9617_s1 + $0xaa0] ss:$48 sps:$4 sm:$0xff]   ;;  %v7043_v27 = vld [vmem:[%s9617_s1 + $0xaa8] ss:$48 sps:$4 sm:$0xff]  }
 0x1cd   :  { %4455 = vmatprep.mubr.bf16.mxu0 %v7590_v54  ;;  %4644 = vmatprep.mubr.bf16.mxu1 %v7590_v54  ;;  %v7003_v54 = vld [vmem:[%s9617_s1 + $0x80c] ss:$48 sps:$4 sm:$0xff]  }
 0x1cf   :  { %4473 = vmatpush1.bf16.msra.mxu0 %v6986_v1  ;;  %4662 = vmatpush1.bf16.msra.mxu1 %v6989_v58  ;;  %v7048_v1 = vld [vmem:[%s9617_s1 + $0xb04] ss:$48 sps:$4 sm:$0xff]   ;;  %v7051_v58 = vld [vmem:[%s9617_s1 + $0xb0c] ss:$48 sps:$4 sm:$0xff]  }
 0x1d0   :  { %4474 = vmatprep.subr.bf16.mxu0 %v6994_v4  ;;  %4663 = vmatprep.subr.bf16.mxu1 %v6997_v31  ;;  %v7046_v4 = vld [vmem:[%s9617_s1 + $0xb00] ss:$48 sps:$4 sm:$0xff]   ;;  %v7049_v31 = vld [vmem:[%s9617_s1 + $0xb08] ss:$48 sps:$4 sm:$0xff]  }
 0x1d2   :  { %4456 = vmatmul.mubr.bf16.gmra.mrb[48].mxu0 %v7592_v55  ;;  %4645 = vmatmul.mubr.bf16.gmra.mrb[64].mxu1 %v7592_v55  ;;  %v7009_v55 = vld [vmem:[%s9617_s1 + $0x86c] ss:$48 sps:$4 sm:$0xff]  }
 0x1d3   :  { %4475 = vmatpush1.bf16.msra.mxu0 %v6992_v29  ;;  %4664 = vmatpush1.bf16.msra.mxu1 %v6995_v32  ;;  %v7054_v29 = vld [vmem:[%s9617_s1 + $0xb64] ss:$48 sps:$4 sm:$0xff]   ;;  %v7057_v32 = vld [vmem:[%s9617_s1 + $0xb6c] ss:$48 sps:$4 sm:$0xff]  }
 0x1d4   :  { %4476 = vmatprep.subr.bf16.mxu0 %v7000_v16  ;;  %4665 = vmatprep.subr.bf16.mxu1 %v7003_v54  ;;  %v7052_v16 = vld [vmem:[%s9617_s1 + $0xb60] ss:$48 sps:$4 sm:$0xff]   ;;  %v7055_v54 = vld [vmem:[%s9617_s1 + $0xb68] ss:$48 sps:$4 sm:$0xff]  }
 0x1d5   :  { %4498 = vmatprep.mubr.bf16.mxu0 %v7605_v59  ;;  %4687 = vmatprep.mubr.bf16.mxu1 %v7605_v59  ;;  %v7015_v59 = vld [vmem:[%s9617_s1 + $0x8cc] ss:$48 sps:$4 sm:$0xff]  }
 0x1d7   :  { %4477 = vmatpush1.bf16.msra.mxu0 %v6998_v17  ;;  %4666 = vmatpush1.bf16.msra.mxu1 %v7001_v18  ;;  %v7060_v17 = vld [vmem:[%s9617_s1 + $0xbc4] ss:$48 sps:$4 sm:$0xff]   ;;  %v7063_v18 = vld [vmem:[%s9617_s1 + $0xbcc] ss:$48 sps:$4 sm:$0xff]  }
 0x1d8   :  { %4478 = vmatprep.subr.bf16.mxu0 %v7006_v7  ;;  %4667 = vmatprep.subr.bf16.mxu1 %v7009_v55  ;;  %v7058_v7 = vld [vmem:[%s9617_s1 + $0xbc0] ss:$48 sps:$4 sm:$0xff]   ;;  %v7061_v55 = vld [vmem:[%s9617_s1 + $0xbc8] ss:$48 sps:$4 sm:$0xff]  }
 0x1db   :  { %4479 = vmatpush1.bf16.msra.mxu0 %v7004_v19  ;;  %4668 = vmatpush1.bf16.msra.mxu1 %v7007_v34  ;;  %v7066_v19 = vld [vmem:[%s9617_s1 + $0xc24] ss:$48 sps:$4 sm:$0xff]   ;;  %v7069_v34 = vld [vmem:[%s9617_s1 + $0xc2c] ss:$48 sps:$4 sm:$0xff]  }
 0x1dc   :  { %4480 = vmatprep.subr.bf16.mxu0 %v7012_v35  ;;  %4669 = vmatprep.subr.bf16.mxu1 %v7015_v59  ;;  %v7064_v35 = vld [vmem:[%s9617_s1 + $0xc20] ss:$48 sps:$4 sm:$0xff]   ;;  %v7067_v59 = vld [vmem:[%s9617_s1 + $0xc28] ss:$48 sps:$4 sm:$0xff]  }
 0x1dd   :  { %v9046_v15 = vpop.f32.mrb[32].mxu1 }
 0x1de   :  { %v4260_v42 = vpop.f32.mrb[33].mxu1 }
 0x1df   :  { %4481 = vmatpush1.bf16.msra.mxu0 %v7010_v23  ;;  %4670 = vmatpush1.bf16.msra.mxu1 %v7013_v26  ;;  %v9054_v28 = vpop.f32.mrb[34].mxu1  ;;  %v7072_v23 = vld [vmem:[%s9617_s1 + $0xc84] ss:$48 sps:$4 sm:$0xff]   ;;  %v7075_v26 = vld [vmem:[%s9617_s1 + $0xc8c] ss:$48 sps:$4 sm:$0xff]  }
 0x1e0   :  { %4482 = vmatprep.subr.bf16.mxu0 %v7018_v39  ;;  %4671 = vmatprep.subr.bf16.mxu1 %v7021_v13  ;;  %v9062_v52 = vpop.f32.mrb[35].mxu1  ;;  %v7070_v39 = vld [vmem:[%s9617_s1 + $0xc80] ss:$48 sps:$4 sm:$0xff]   ;;  %v7073_v13 = vld [vmem:[%s9617_s1 + $0xc88] ss:$48 sps:$4 sm:$0xff]  }
 0x1e1   :  { %v7078_v42 = vld [vmem:[%s9617_s1 + $0xce4] ss:$48 sps:$4 sm:$0xff]  }
 0x1e3   :  { %4483 = vmatpush1.bf16.msra.mxu0 %v7016_v44  ;;  %4672 = vmatpush1.bf16.msra.mxu1 %v7019_v25  ;;  %v7076_v44 = vld [vmem:[%s9617_s1 + $0xce0] ss:$48 sps:$4 sm:$0xff]   ;;  %v7079_v25 = vld [vmem:[%s9617_s1 + $0xce8] ss:$48 sps:$4 sm:$0xff]  }
 0x1e4   :  { %4484 = vmatprep.subr.bf16.mxu0 %v7024_v46  ;;  %4673 = vmatprep.subr.bf16.mxu1 %v7027_v47  ;;  %v7084_v46 = vld [vmem:[%s9617_s1 + $0xd44] ss:$48 sps:$4 sm:$0xff]   ;;  %v7082_v47 = vld [vmem:[%s9617_s1 + $0xd40] ss:$48 sps:$4 sm:$0xff]  }
 0x1e5   :  { %v9076_v2 = vpop.f32.mrb[36].mxu1 }
 0x1e6   :  { %v9078_v48 = vpop.f32.mrb[37].mxu1 }
 0x1e7   :  { %4485 = vmatpush1.bf16.msra.mxu0 %v7022_v53  ;;  %4674 = vmatpush1.bf16.msra.mxu1 %v7025_v45  ;;  %v9086_v33 = vpop.f32.mrb[38].mxu1  ;;  %v7085_v53 = vld [vmem:[%s9617_s1 + $0xd48] ss:$48 sps:$4 sm:$0xff]   ;;  %v7090_v45 = vld [vmem:[%s9617_s1 + $0xda4] ss:$48 sps:$4 sm:$0xff]  }
 0x1e8   :  { %4486 = vmatprep.subr.bf16.mxu0 %v7030_v56  ;;  %4675 = vmatprep.subr.bf16.mxu1 %v7033_v5  ;;  %v4274_v57 = vpop.f32.mrb[39].mxu1  ;;  %v7088_v56 = vld [vmem:[%s9617_s1 + $0xda0] ss:$48 sps:$4 sm:$0xff]   ;;  %v7091_v5 = vld [vmem:[%s9617_s1 + $0xda8] ss:$48 sps:$4 sm:$0xff]  }
 0x1e9   :  { %v7100_v57 = vld [vmem:[%s9617_s1 + $0xe60] ss:$48 sps:$4 sm:$0xff]  }
 0x1eb   :  { %4487 = vmatpush1.bf16.msra.mxu0 %v7028_v60  ;;  %4676 = vmatpush1.bf16.msra.mxu1 %v7031_v3  ;;  %v7096_v60 = vld [vmem:[%s9617_s1 + $0xe04] ss:$48 sps:$4 sm:$0xff]   ;;  %v7094_v3 = vld [vmem:[%s9617_s1 + $0xe00] ss:$48 sps:$4 sm:$0xff]  }
 0x1ec   :  { %4488 = vmatprep.subr.bf16.mxu0 %v7036_v38  ;;  %4677 = vmatprep.subr.bf16.mxu1 %v7039_v50  ;;  %v7097_v38 = vld [vmem:[%s9617_s1 + $0xe08] ss:$48 sps:$4 sm:$0xff]   ;;  %v7102_v50 = vld [vmem:[%s9617_s1 + $0xe64] ss:$48 sps:$4 sm:$0xff]  }
 0x1ef   :  { %4489 = vmatpush1.bf16.msra.mxu0 %v7034_v62  ;;  %4678 = vmatpush1.bf16.msra.mxu1 %v7037_v9  ;;  %v7103_v62 = vld [vmem:[%s9617_s1 + $0xe68] ss:$48 sps:$4 sm:$0xff]   ;;  %v7108_v9 = vld [vmem:[%s9617_s1 + $0xec4] ss:$48 sps:$4 sm:$0xff]  }
 0x1f0   :  { %4490 = vmatprep.subr.bf16.mxu0 %v7042_v22  ;;  %4679 = vmatprep.subr.bf16.mxu1 %v7045_v24  ;;  %v7106_v22 = vld [vmem:[%s9617_s1 + $0xec0] ss:$48 sps:$4 sm:$0xff]   ;;  %v7109_v24 = vld [vmem:[%s9617_s1 + $0xec8] ss:$48 sps:$4 sm:$0xff]  }
 0x1f3   :  { %4491 = vmatpush1.bf16.msra.mxu0 %v7040_v8  ;;  %4680 = vmatpush1.bf16.msra.mxu1 %v7043_v27  ;;  %v7114_v8 = vld [vmem:[%s9617_s1 + $0xf24] ss:$48 sps:$4 sm:$0xff]   ;;  %v7117_v27 = vld [vmem:[%s9617_s1 + $0xf2c] ss:$48 sps:$4 sm:$0xff]  }
 0x1f4   :  { %4492 = vmatprep.subr.bf16.mxu0 %v7048_v1  ;;  %4681 = vmatprep.subr.bf16.mxu1 %v7051_v58 }
 0x1f7   :  { %4493 = vmatpush1.bf16.msra.mxu0 %v7046_v4  ;;  %4682 = vmatpush1.bf16.msra.mxu1 %v7049_v31 }
 0x1f8   :  { %4494 = vmatprep.subr.bf16.mxu0 %v7054_v29  ;;  %4683 = vmatprep.subr.bf16.mxu1 %v7057_v32  ;;  %v7112_v29 = vld [vmem:[%s9617_s1 + $0xf20] ss:$48 sps:$4 sm:$0xff]   ;;  %v7115_v32 = vld [vmem:[%s9617_s1 + $0xf28] ss:$48 sps:$4 sm:$0xff]  }
 0x1fb   :  { %4495 = vmatpush1.bf16.msra.mxu0 %v7052_v16  ;;  %4684 = vmatpush1.bf16.msra.mxu1 %v7055_v54 }
 0x1fc   :  { %4496 = vmatprep.subr.bf16.mxu0 %v7060_v17  ;;  %4685 = vmatprep.subr.bf16.mxu1 %v7063_v18  ;;  %v7123_v17 = vld [vmem:[%s9617_s1 + $0xf8c] ss:$48 sps:$4 sm:$0xff]  }
 0x1ff   :  { %4497 = vmatpush1.bf16.msra.mxu0 %v7058_v7  ;;  %4686 = vmatpush1.bf16.msra.mxu1 %v7061_v55  ;;  %v7121_v7 = vld [vmem:[%s9617_s1 + $0xf88] ss:$48 sps:$4 sm:$0xff]   ;;  %v7126_v55 = vld [vmem:[%s9617_s1 + $0xfe4] ss:$48 sps:$4 sm:$0xff]  }
 0x200   :  { %4529 = vmatprep.subr.bf16.mxu0 %v7066_v19  ;;  %4718 = vmatprep.subr.bf16.mxu1 %v7069_v34 }
 0x202   :  { %4499 = vmatmul.mubr.bf16.vlgmr.msra.gmra.mrb[40].mxu0 %v7737_v41  ;;  %4688 = vmatmul.mubr.bf16.vlgmr.msra.gmra.mrb[56].mxu1 %v7737_v41  ;;  %v7081_v41 = vld [vmem:[%s9617_s1 + $0xcec] ss:$48 sps:$4 sm:$0xff]  }
 0x203   :  { %4530 = vmatpush1.bf16.msra.mxu0 %v7064_v35  ;;  %4719 = vmatpush1.bf16.msra.mxu1 %v7067_v59 }
 0x204   :  { %4531 = vmatprep.subr.bf16.mxu0 %v7072_v23  ;;  %4720 = vmatprep.subr.bf16.mxu1 %v7075_v26  ;;  %v7124_v26 = vld [vmem:[%s9617_s1 + $0xfe0] ss:$48 sps:$4 sm:$0xff]  }
 0x205   :  { %4508 = vmatprep.mubr.bf16.mxu0 %v7757_v49  ;;  %4697 = vmatprep.mubr.bf16.mxu1 %v7757_v49  ;;  %v7087_v49 = vld [vmem:[%s9617_s1 + $0xd4c] ss:$48 sps:$4 sm:$0xff]  }
 0x207   :  { %4532 = vmatpush1.bf16.msra.mxu0 %v7070_v39  ;;  %4721 = vmatpush1.bf16.msra.mxu1 %v7073_v13  ;;  %v7127_v39 = vld [vmem:[%s9617_s1 + $0xfe8] ss:$48 sps:$4 sm:$0xff]  }
 0x208   :  { %4533 = vmatprep.subr.bf16.mxu0 %v7078_v42  ;;  %4722 = vmatprep.subr.bf16.mxu1 %v7081_v41  ;;  %v7130_v41 = vld [vmem:[%s9617_s1 + $0x1040] ss:$48 sps:$4 sm:$0xff]  }
 0x20a   :  { %4509 = vmatmul.mubr.bf16.gmra.mrb[44].mxu0 %v7781_v0  ;;  %4698 = vmatmul.mubr.bf16.gmra.mrb[60].mxu1 %v7781_v0  ;;  %v7093_v0 = vld [vmem:[%s9617_s1 + $0xdac] ss:$48 sps:$4 sm:$0xff]  }
 0x20b   :  { %4534 = vmatpush1.bf16.msra.mxu0 %v7076_v44  ;;  %4723 = vmatpush1.bf16.msra.mxu1 %v7079_v25  ;;  %v7138_v44 = vld [vmem:[%s9617_s1 + $0x10a4] ss:$48 sps:$4 sm:$0xff]   ;;  %v7141_v25 = vld [vmem:[%s9617_s1 + $0x10ac] ss:$48 sps:$4 sm:$0xff]  }
 0x20c   :  { %4535 = vmatprep.subr.bf16.mxu0 %v7084_v46  ;;  %4724 = vmatprep.subr.bf16.mxu1 %v7087_v49  ;;  %v7136_v46 = vld [vmem:[%s9617_s1 + $0x10a0] ss:$48 sps:$4 sm:$0xff]   ;;  %v7139_v49 = vld [vmem:[%s9617_s1 + $0x10a8] ss:$48 sps:$4 sm:$0xff]  }
 0x20d   :  { %4518 = vmatprep.mubr.bf16.mxu0 %v7795_v6  ;;  %4707 = vmatprep.mubr.bf16.mxu1 %v7795_v6  ;;  %v7099_v6 = vld [vmem:[%s9617_s1 + $0xe0c] ss:$48 sps:$4 sm:$0xff]  }
 0x20f   :  { %4536 = vmatpush1.bf16.msra.mxu0 %v7082_v47  ;;  %4725 = vmatpush1.bf16.msra.mxu1 %v7085_v53  ;;  %v7144_v47 = vld [vmem:[%s9617_s1 + $0x1104] ss:$48 sps:$4 sm:$0xff]   ;;  %v7147_v53 = vld [vmem:[%s9617_s1 + $0x110c] ss:$48 sps:$4 sm:$0xff]  }
 0x210   :  { %4537 = vmatprep.subr.bf16.mxu0 %v7090_v45  ;;  %4726 = vmatprep.subr.bf16.mxu1 %v7093_v0  ;;  %v7142_v45 = vld [vmem:[%s9617_s1 + $0x1100] ss:$48 sps:$4 sm:$0xff]   ;;  %v7145_v0 = vld [vmem:[%s9617_s1 + $0x1108] ss:$48 sps:$4 sm:$0xff]  }
 0x212   :  { %4519 = vmatmul.mubr.bf16.gmra.mrb[48].mxu0 %v7813_v14  ;;  %4708 = vmatmul.mubr.bf16.gmra.mrb[64].mxu1 %v7813_v14  ;;  %v7105_v14 = vld [vmem:[%s9617_s1 + $0xe6c] ss:$48 sps:$4 sm:$0xff]  }
 0x213   :  { %4538 = vmatpush1.bf16.msra.mxu0 %v7088_v56  ;;  %4727 = vmatpush1.bf16.msra.mxu1 %v7091_v5  ;;  %v7150_v56 = vld [vmem:[%s9617_s1 + $0x1164] ss:$48 sps:$4 sm:$0xff]   ;;  %v7153_v5 = vld [vmem:[%s9617_s1 + $0x116c] ss:$48 sps:$4 sm:$0xff]  }
 0x214   :  { %4539 = vmatprep.subr.bf16.mxu0 %v7096_v60  ;;  %4728 = vmatprep.subr.bf16.mxu1 %v7099_v6  ;;  %v7148_v60 = vld [vmem:[%s9617_s1 + $0x1160] ss:$48 sps:$4 sm:$0xff]   ;;  %v7151_v6 = vld [vmem:[%s9617_s1 + $0x1168] ss:$48 sps:$4 sm:$0xff]  }
 0x215   :  { %4561 = vmatprep.mubr.bf16.mxu0 %v7833_v21  ;;  %4750 = vmatprep.mubr.bf16.mxu1 %v7833_v21  ;;  %v7111_v21 = vld [vmem:[%s9617_s1 + $0xecc] ss:$48 sps:$4 sm:$0xff]  }
 0x217   :  { %4540 = vmatpush1.bf16.msra.mxu0 %v7094_v3  ;;  %4729 = vmatpush1.bf16.msra.mxu1 %v7097_v38  ;;  %v7156_v3 = vld [vmem:[%s9617_s1 + $0x11c4] ss:$48 sps:$4 sm:$0xff]   ;;  %v7159_v38 = vld [vmem:[%s9617_s1 + $0x11cc] ss:$48 sps:$4 sm:$0xff]  }
 0x218   :  { %4541 = vmatprep.subr.bf16.mxu0 %v7102_v50  ;;  %4730 = vmatprep.subr.bf16.mxu1 %v7105_v14  ;;  %v7154_v50 = vld [vmem:[%s9617_s1 + $0x11c0] ss:$48 sps:$4 sm:$0xff]   ;;  %v7157_v14 = vld [vmem:[%s9617_s1 + $0x11c8] ss:$48 sps:$4 sm:$0xff]  }
 0x21b   :  { %4542 = vmatpush1.bf16.msra.mxu0 %v7100_v57  ;;  %4731 = vmatpush1.bf16.msra.mxu1 %v7103_v62  ;;  %v7160_v57 = vld [vmem:[%s9619_s3 + $0x40] sm:$0xff]  }
 0x21c   :  { %4543 = vmatprep.subr.bf16.mxu0 %v7108_v9  ;;  %4732 = vmatprep.subr.bf16.mxu1 %v7111_v21  ;;  %v7161_v62 = vld [vmem:[%s9619_s3] sm:$0xff]   ;;  %v7162_v9 = vld [vmem:[%s9619_s3 + $0x48] sm:$0xff]  }
 0x21d   :  { %v4321_v1 = vpop.f32.mrb[40].mxu1  ;;  %v7163_v21 = vld [vmem:[%s9619_s3 + $0x8] sm:$0xff]  }
 0x21e   :  { %v9263_v58 = vadd.f32 %v4321_v1, %v9046_v15  ;;  %v4323_v4 = vpop.f32.mrb[41].mxu1  ;;  %v7120_v15 = vld [vmem:[%s9617_s1 + $0xf84] ss:$48 sps:$4 sm:$0xff]  }
 0x21f   :  { %v4325_v31 = vpop.f32.mrb[42].mxu1  ;;  %4544 = vmatpush1.bf16.msra.mxu0 %v7106_v22  ;;  %4733 = vmatpush1.bf16.msra.mxu1 %v7109_v24  ;;  %v7164_v22 = vld [vmem:[%s9619_s3 + $0x50] sm:$0xff]  }
 0x220   :  { %v9272_v16 = vadd.f32 %v4325_v31, %v9054_v28  ;;  %v4327_v54 = vpop.f32.mrb[43].mxu1  ;;  %4545 = vmatprep.subr.bf16.mxu0 %v7114_v8  ;;  %4734 = vmatprep.subr.bf16.mxu1 %v7117_v27  ;;  %v7118_v28 = vld [vmem:[%s9617_s1 + $0xf80] ss:$48 sps:$4 sm:$0xff]  }
 0x221   :  { %v9281_v18 = vadd.f32 %v4327_v54, %v9062_v52  ;;  %v7129_v52 = vld [vmem:[%s9617_s1 + $0xfec] ss:$48 sps:$4 sm:$0xff]   ;;  %v7165_v24 = vld [vmem:[%s9619_s3 + $0x10] sm:$0xff]   ;;  %v7168_v8 = vld [vmem:[%s9619_s3 + $0x60] sm:$0xff]  }
 0x222   :  { %v7169_v27 = vld [vmem:[%s9619_s3 + $0x20] sm:$0xff]   ;;  %v7172_v31 = vld [vmem:[%s9619_s3 + $0x70] sm:$0xff]  }
 0x223   :  { %4546 = vmatpush1.bf16.msra.mxu0 %v7112_v29  ;;  %4735 = vmatpush1.bf16.msra.mxu1 %v7115_v32 }
 0x224   :  { %4547 = vmatprep.subr.bf16.mxu0 %v7120_v15  ;;  %4736 = vmatprep.subr.bf16.mxu1 %v7123_v17 }
 0x225   :  { %v4331_v19 = vpop.f32.mrb[44].mxu1 }
 0x226   :  { %v9296_v34 = vadd.f32 %v4331_v19, %v9076_v2  ;;  %v4333_v35 = vpop.f32.mrb[45].mxu1  ;;  %v7132_v2 = vld [vmem:[%s9617_s1 + $0x1044] ss:$48 sps:$4 sm:$0xff]  }
 0x227   :  { %v9299_v59 = vadd.f32 %v4333_v35, %v9078_v48  ;;  %v4335_v23 = vpop.f32.mrb[46].mxu1  ;;  %4548 = vmatpush1.bf16.msra.mxu0 %v7118_v28  ;;  %4737 = vmatpush1.bf16.msra.mxu1 %v7121_v7  ;;  %v7135_v48 = vld [vmem:[%s9617_s1 + $0x104c] ss:$48 sps:$4 sm:$0xff]  }
 0x228   :  { %v9308_v13 = vadd.f32 %v4335_v23, %v9086_v33  ;;  %4549 = vmatprep.subr.bf16.mxu0 %v7126_v55  ;;  %4738 = vmatprep.subr.bf16.mxu1 %v7129_v52  ;;  %v4337_v42 = vpop.f32.mrb[47].mxu1  ;;  %v7133_v33 = vld [vmem:[%s9617_s1 + $0x1048] ss:$48 sps:$4 sm:$0xff]  }
 0x22b   :  { %4550 = vmatpush1.bf16.msra.mxu0 %v7124_v26  ;;  %4739 = vmatpush1.bf16.msra.mxu1 %v7127_v39  ;;  %v7174_v26 = vld [vmem:[%s9619_s3 + $0x78] sm:$0xff]  }
 0x22c   :  { %4551 = vmatprep.subr.bf16.mxu0 %v7132_v2  ;;  %4740 = vmatprep.subr.bf16.mxu1 %v7135_v48 }
 0x22f   :  { %4552 = vmatpush1.bf16.msra.mxu0 %v7130_v41  ;;  %4741 = vmatpush1.bf16.msra.mxu1 %v7133_v33  ;;  %v7175_v41 = vld [vmem:[%s9619_s3 + $0x38] sm:$0xff]  }
 0x230   :  { %4553 = vmatprep.subr.bf16.mxu0 %v7138_v44  ;;  %4742 = vmatprep.subr.bf16.mxu1 %v7141_v25 }
 0x233   :  { %4554 = vmatpush1.bf16.msra.mxu0 %v7136_v46  ;;  %4743 = vmatpush1.bf16.msra.mxu1 %v7139_v49 }
 0x234   :  { %4555 = vmatprep.subr.bf16.mxu0 %v7144_v47  ;;  %4744 = vmatprep.subr.bf16.mxu1 %v7147_v53 }
 0x237   :  { %4556 = vmatpush1.bf16.msra.mxu0 %v7142_v45  ;;  %4745 = vmatpush1.bf16.msra.mxu1 %v7145_v0 }
 0x238   :  { %4557 = vmatprep.subr.bf16.mxu0 %v7150_v56  ;;  %4746 = vmatprep.subr.bf16.mxu1 %v7153_v5 }
 0x23b   :  { %4558 = vmatpush1.bf16.msra.mxu0 %v7148_v60  ;;  %4747 = vmatpush1.bf16.msra.mxu1 %v7151_v6 }
 0x23c   :  { %4559 = vmatprep.subr.bf16.mxu0 %v7156_v3  ;;  %4748 = vmatprep.subr.bf16.mxu1 %v7159_v38 }
 0x23f   :  { %4560 = vmatpush1.bf16.msra.mxu0 %v7154_v50  ;;  %4749 = vmatpush1.bf16.msra.mxu1 %v7157_v14 }
 0x240   :  { %6117 = vmatprep.subr.bf16.mxu0 %v7160_v57 }
 0x242   :  { %4562 = vmatmul.mubr.bf16.vlgmr.msra.gmra.mrb[40].mxu0 %v7989_v20  ;;  %4751 = vmatmul.mubr.bf16.vlgmr.msra.gmra.mrb[56].mxu1 %v7989_v20  ;;  %v7166_v20 = vld [vmem:[%s9619_s3 + $0x58] sm:$0xff]  }
 0x243   :  { %4571 = vmatprep.mubr.bf16.mxu0 %v8009_v30  ;;  %4760 = vmatprep.mubr.bf16.mxu1 %v8009_v30  ;;  %v7167_v30 = vld [vmem:[%s9619_s3 + $0x18] sm:$0xff]  }
 0x244   :  { %6118 = vmatpush3.bf16.msra.mxu0 %v7161_v62 }
 0x245   :  { %6119 = vmatprep.subr.bf16.mxu0 %v7162_v9 }
 0x248   :  { %6120 = vmatpush3.bf16.msra.mxu0 %v7163_v21 }
 0x249   :  { %6121 = vmatprep.subr.bf16.mxu0 %v7164_v22 }
 0x24a   :  { %4572 = vmatmul.mubr.bf16.gmra.mrb[44].mxu0 %v8033_v43  ;;  %4761 = vmatmul.mubr.bf16.gmra.mrb[60].mxu1 %v8033_v43  ;;  %v7170_v43 = vld [vmem:[%s9619_s3 + $0x68] sm:$0xff]  }
 0x24b   :  { %4581 = vmatprep.mubr.bf16.mxu0 %v8047_v51  ;;  %4770 = vmatprep.mubr.bf16.mxu1 %v8047_v51  ;;  %v7171_v51 = vld [vmem:[%s9619_s3 + $0x28] sm:$0xff]  }
 0x24c   :  { %6122 = vmatpush3.bf16.msra.mxu0 %v7165_v24 }
 0x24d   :  { %6123 = vmatprep.subr.bf16.mxu0 %v7166_v20 }
 0x250   :  { %6124 = vmatpush3.bf16.msra.mxu0 %v7167_v30 }
 0x251   :  { %6125 = vmatprep.subr.bf16.mxu0 %v7168_v8 }
 0x252   :  { %4582 = vmatmul.mubr.bf16.gmra.mrb[48].mxu0 %v8065_v61  ;;  %4771 = vmatmul.mubr.bf16.gmra.mrb[64].mxu1 %v8065_v61  ;;  %v7173_v61 = vld [vmem:[%s9619_s3 + $0x30] sm:$0xff]  }
 0x254   :  { %6126 = vmatpush3.bf16.msra.mxu0 %v7169_v27 }
 0x255   :  { %v4185_v1 = vpop.f32.mrb[28].mxu0  ;;  %v4374_v4 = vpop.f32.mrb[28].mxu1  ;;  %6127 = vmatprep.subr.bf16.mxu0 %v7170_v43 }
 0x256   :  { %v4187_v29 = vpop.f32.mrb[29].mxu0  ;;  %v9419_v32 = vpop.f32.mrb[29].mxu1  ;;  %v4853_v17 = vrot.slane %v4185_v1, 1  ;;  %v4889_v28 = vrot.slane %v4374_v4, 3 }
 0x257   :  { %v4189_v54 = vpop.f32.mrb[30].mxu0  ;;  %v4378_v15 = vpop.f32.mrb[30].mxu1  ;;  %v4871_v35 = vrot.slane %v4187_v29, 2 }
 0x258   :  { %v4854_v7 = vrot.slane %v4189_v54, 1  ;;  %v4890_v55 = vrot.slane %v4378_v15, 3  ;;  %v4191_v52 = vpop.f32.mrb[31].mxu0  ;;  %v9425_v19 = vpop.f32.mrb[31].mxu1  ;;  %6128 = vmatpush3.bf16.msra.mxu0 %v7171_v51 }
 0x259   :  { %v4872_v23 = vrot.slane %v4191_v52, 2  ;;  %6129 = vmatprep.subr.bf16.mxu0 %v7172_v31 }
 0x25a   :  { %v4863_v39 = vsel %vm4787_vm1, %v4853_v17, %v4854_v7  ;;  %v4900_v2 = vsel %vm4895_vm4, %v4889_v28, %v4890_v55 }
 0x25b   :  { %v4865_v48 = vadd.f32 %v4863_v39, %v8771_v63  ;;  %v4881_v42 = vsel %vm4806_vm0, %v4871_v35, %v4872_v23 }
 0x25c   :  { %6130 = vmatpush3.bf16.msra.mxu0 %v7173_v61 }
 0x25d   :  { %v4883_v33 = vadd.f32 %v4881_v42, %v4865_v48  ;;  %v4195_v44 = vpop.f32.mrb[32].mxu0  ;;  %v4384_v25 = vpop.f32.mrb[48].mxu1  ;;  %6131 = vmatprep.subr.bf16.mxu0 %v7174_v26 }
 0x25e   :  { %v4855_v46 = vrot.slane %v4195_v44, 1  ;;  %v4385_v49 = vadd.f32 %v4384_v25, %v9263_v58  ;;  %v4197_v47 = vpop.f32.mrb[33].mxu0  ;;  %v4386_v53 = vpop.f32.mrb[49].mxu1 }
 0x25f   :  { %v4902_v45 = vadd.f32 %v4900_v2, %v4883_v33  ;;  %v4873_v0 = vrot.slane %v4197_v47, 2  ;;  %v4199_v63 = vpop.f32.mrb[34].mxu0  ;;  %v4388_v56 = vpop.f32.mrb[50].mxu1  ;;  %v9480_v53 = vld [vmem:[%s9618_s2] sm:$0x7] }
 0x260   :  { %v4862_v5 = vsel %vm4787_vm1, %v4854_v7, %v4855_v46  ;;  %v4891_v60 = vrot.slane %v4385_v49, 3  ;;  %v4389_v6 = vadd.f32 %v4388_v56, %v9272_v16  ;;  %v4201_v3 = vpop.f32.mrb[35].mxu0  ;;  %v4390_v38 = vpop.f32.mrb[51].mxu1  ;;  %6132 = vmatpush3.bf16.msra.mxu0 %v7175_v41  ;;  %v4856_v22 = vrot.slane %v4199_v63, 1 }
 0x261   :  { %v4866_v50 = vadd.f32 %v4862_v5, %v8782_v12  ;;  %v4880_v58 = vsel %vm4806_vm0, %v4872_v23, %v4873_v0  ;;  %v9448_v14 = vadd.f32 %v4390_v38, %v9281_v18  ;;  %v4874_v24 = vrot.slane %v4201_v3, 2 }
 0x262   :  { %v4899_v57 = vsel %vm4895_vm4, %v4890_v55, %v4891_v60  ;;  %v4892_v27 = vrot.slane %v4389_v6, 3  ;;  %v5070_v0 = vsub.s32 1, %v8745_v40 }
 0x263   :  { %v4884_v62 = vadd.f32 %v4880_v58, %v4866_v50 }
 0x264   :  { %v5071_v6 = vrot.slane %v9480_v53, %v5070_v0 }
 0x265   :  { %v4903_v9 = vadd.f32 %v4899_v57, %v4884_v62  ;;  %v4205_v21 = vpop.f32.mrb[36].mxu0  ;;  %v4394_v16 = vpop.f32.mrb[52].mxu1 }
 0x266   :  { %v4857_v20 = vrot.slane %v4205_v21, 1  ;;  %v4395_v12 = vadd.f32 %v4394_v16, %v9296_v34  ;;  %v4207_v30 = vpop.f32.mrb[37].mxu0  ;;  %v4396_v8 = vpop.f32.mrb[53].mxu1 }
 0x267   :  { %v4921_v18 = vsel %vm4909_vm5, %v4903_v9, -inf  ;;  %v4875_v43 = vrot.slane %v4207_v30, 2  ;;  %v9457_v51 = vadd.f32 %v4396_v8, %v9299_v59  ;;  %v4209_v1 = vpop.f32.mrb[38].mxu0  ;;  %v4398_v4 = vpop.f32.mrb[54].mxu1  ;;  %v7180_v30 = vld [vmem:[%s9619_s3 + $0xa0] sm:$0xff]   ;;  %v7181_v8 = vld [vmem:[%s9619_s3 + $0xa8] sm:$0xff]  }
 0x268   :  { %v4927_v31 = vmax.f32 %v4902_v45, %v4921_v18  ;;  %v4860_v29 = vsel %vm4787_vm1, %v4856_v22, %v4857_v20  ;;  %v4893_v54 = vrot.slane %v4395_v12, 3  ;;  %v4858_v15 = vrot.slane %v4209_v1, 1  ;;  %v4211_v61 = vpop.f32.mrb[39].mxu0  ;;  %v4400_v34 = vpop.f32.mrb[55].mxu1  ;;  %v7176_v22 = vld [vmem:[%s9619_s3 + $0x80] sm:$0xff]   ;;  %v7179_v12 = vld [vmem:[%s9619_s3 + $0x98] sm:$0xff]  }
 0x269   :  { %v4868_v17 = vadd.f32 %v4860_v29, %v8824_v11  ;;  %v4878_v28 = vsel %vm4806_vm0, %v4874_v24, %v4875_v43  ;;  %v4399_v7 = vadd.f32 %v4398_v4, %v9308_v13  ;;  %v4876_v55 = vrot.slane %v4211_v61, 2  ;;  %v7182_v18 = vld [vmem:[%s9619_s3 + $0xb0] sm:$0xff]   ;;  %v7185_v1 = vld [vmem:[%s9621_s5 + $0x8] sm:$0xff]   ;;  %v7188_v29 = vld [vmem:[%s9621_s5 + $0x20] sm:$0xff]  }
 0x26a   :  { %v4928_v59 = vrot.slane %v4927_v31, 4  ;;  %v4897_v52 = vsel %vm4895_vm4, %v4892_v27, %v4893_v54  ;;  %v4859_v35 = vsel %vm4787_vm1, %v4857_v20, %v4858_v15  ;;  %v7216_v24 = vmov 0.0   ;;  %v7178_v20 = vld [vmem:[%s9619_s3 + $0x90] sm:$0xff]   ;;  %v7183_v27 = vld [vmem:[%s9619_s3 + $0xb8] sm:$0xff]  }
 0x26b   :  { %v4886_v23 = vadd.f32 %v4878_v28, %v4868_v17  ;;  %v4869_v26 = vadd.f32 %v4859_v35, %v8853_v37  ;;  %v4894_v39 = vrot.slane %v4399_v7, 3  ;;  %v4877_v11 = vsel %vm4806_vm0, %v4875_v43, %v4876_v55  ;;  %6157 = vmatprep.subr.bf16.mxu1 %v7216_v24  ;;  %6177 = vmatprep.subr.bf16.mxu0 %v7216_v24  ;;  %v7184_v43 = vld [vmem:[%s9621_s5] sm:$0xff]   ;;  %v7186_v4 = vld [vmem:[%s9621_s5 + $0x10] sm:$0xff]  }
 0x26c   :  { %v4929_v42 = vmax.f32 %v4927_v31, %v4928_v59  ;;  %v5066_v37 = vsub.s32 0, %v8745_v40  ;;  %6158 = vmatpush3.bf16.msra.mxu1 %v7176_v22  ;;  %6173 = vmatprep.mubr.msk.bf16.mxu1 %vm7217_vm6, %v7216_v24  ;;  %v7187_v31 = vld [vmem:[%s9621_s5 + $0x18] sm:$0xff]  }
 0x26d   :  { %v4905_v2 = vadd.f32 %v4897_v52, %v4886_v23  ;;  %v4896_v48 = vsel %vm4895_vm4, %v4893_v54, %v4894_v39  ;;  %v4887_v13 = vadd.f32 %v4877_v11, %v4869_v26  ;;  %6159 = vmatprep.subr.bf16.mxu1 %v7216_v24  ;;  %v7189_v54 = vld [vmem:[%s9621_s5 + $0x28] sm:$0xff]  }
 0x26e   :  { %v4930_v25 = vrot.slane %v4929_v42, 2  ;;  %v5067_v5 = vrot.slane %v9480_v53, %v5066_v37 }
 0x26f   :  { %v4906_v41 = vadd.f32 %v4896_v48, %v4887_v13 }
 0x270   :  { %v4931_v47 = vmax.f32 %v4929_v42, %v4930_v25  ;;  %v5079_v50 = vadd.f32 %v5067_v5, %v8948_v36  ;;  %v7177_v36 = vld [vmem:[%s9619_s3 + $0x88] sm:$0xff]  }
 0x271   :  { %v4924_v33 = vsel %vm4909_vm5, %v4906_v41, -inf  ;;  %6160 = vmatpush3.bf16.msra.mxu1 %v7177_v36 }
 0x272   :  { %v4935_v44 = vmax.f32 %v4905_v2, %v4924_v33  ;;  %v4932_v63 = vrot.slane %v4931_v47, 1  ;;  %v5082_v62 = vmax.f32 %v5079_v50, 0.0  ;;  %6161 = vmatprep.subr.bf16.mxu1 %v7216_v24 }
 0x274   :  { %v4936_v46 = vrot.slane %v4935_v44, 4  ;;  %v4933_v3 = vmax.f32 %v4931_v47, %v4932_v63  ;;  %v5085_v16 = vpack.c.bf16 %v5082_v62, %v5082_v62 }
 0x275   :  { %6162 = vmatpush3.bf16.msra.mxu1 %v7178_v20 }
 0x276   :  { %v4937_v49 = vmax.f32 %v4935_v44, %v4936_v46  ;;  %6163 = vmatprep.subr.bf16.mxu1 %v7216_v24 }
 0x278   :  { %v4938_v45 = vrot.slane %v4937_v49, 2 }
 0x279   :  { %6164 = vmatpush3.bf16.msra.mxu1 %v7179_v12 }
 0x27a   :  { %v4939_v56 = vmax.f32 %v4937_v49, %v4938_v45  ;;  %6165 = vmatprep.subr.bf16.mxu1 %v7216_v24 }
 0x27c   :  { %v4940_v60 = vrot.slane %v4939_v56, 1 }
 0x27d   :  { %6166 = vmatpush3.bf16.msra.mxu1 %v7180_v30 }
 0x27e   :  { %v4941_v38 = vmax.f32 %v4939_v56, %v4940_v60  ;;  %6167 = vmatprep.subr.bf16.mxu1 %v7216_v24 }
 0x280   :  { %v5056_v58 = vsel %vm5051_vm3, %v4941_v38, %v4933_v3 }
 0x281   :  { %v5080_v57 = vadd.f32 %v5071_v6, %v5056_v58  ;;  %6168 = vmatpush3.bf16.msra.mxu1 %v7181_v8 }
 0x282   :  { %6169 = vmatprep.subr.bf16.mxu1 %v7216_v24 }
 0x283   :  { %v5083_v9 = vmax.f32 %v5080_v57, 0.0 }
 0x285   :  { %v5086_v21 = vpack.c.bf16 %v5083_v9, %v5083_v9  ;;  %6170 = vmatpush3.bf16.msra.mxu1 %v7182_v18 }
 0x286   :  { %6171 = vmatprep.subr.bf16.mxu1 %v7216_v24 }
 0x287   :  { %5319 = vmatprep.mubr.bf16.mxu0 %v5086_v21 }
 0x288   :  { %5320 = vmatmul.mubr.bf16.vlgmr.msra.gmra.mrb[52].mxu0 %v5085_v16 }
 0x289   :  { %6193 = vmatprep.mubr.msk.bf16.mxu0 %vm7217_vm6, %v7216_v24  ;;  %6172 = vmatpush3.bf16.msra.mxu1 %v7183_v27 }
 0x28a   :  { %6178 = vmatpush3.bf16.msra.mxu0 %v7184_v43 }
 0x28b   :  { %6179 = vmatprep.subr.bf16.mxu0 %v7216_v24 }
 0x28e   :  { %6180 = vmatpush3.bf16.msra.mxu0 %v7185_v1 }
 0x28f   :  { %6181 = vmatprep.subr.bf16.mxu0 %v7216_v24 }
 0x292   :  { %6182 = vmatpush3.bf16.msra.mxu0 %v7186_v4 }
 0x293   :  { %6183 = vmatprep.subr.bf16.mxu0 %v7216_v24 }
 0x296   :  { %6184 = vmatpush3.bf16.msra.mxu0 %v7187_v31 }
 0x297   :  { %6185 = vmatprep.subr.bf16.mxu0 %v7216_v24 }
 0x29a   :  { %6186 = vmatpush3.bf16.msra.mxu0 %v7188_v29 }
 0x29b   :  { %6187 = vmatprep.subr.bf16.mxu0 %v7216_v24 }
 0x29e   :  { %6188 = vmatpush3.bf16.msra.mxu0 %v7189_v54 }
 0x29f   :  { %6189 = vmatprep.subr.bf16.mxu0 %v7216_v24 }
 0x315   :  { %v4563_v15 = vpop.f32.mrb[40].mxu0  ;;  %v4752_v61 = vpop.f32.mrb[56].mxu1 }
 0x316   :  { %v4565_v34 = vpop.f32.mrb[41].mxu0  ;;  %v4754_v17 = vpop.f32.mrb[57].mxu1  ;;  %v4942_v55 = vrot.slane %v4563_v15, 1  ;;  %v4978_v59 = vrot.slane %v4752_v61, 3 }
 0x317   :  { %v4567_v28 = vpop.f32.mrb[42].mxu0  ;;  %v4756_v7 = vpop.f32.mrb[58].mxu1  ;;  %v4960_v39 = vrot.slane %v4565_v34, 2  ;;  %v4996_v11 = vrot.slane %v4754_v17, 4 }
 0x318   :  { %v4943_v52 = vrot.slane %v4567_v28, 1  ;;  %v4979_v35 = vrot.slane %v4756_v7, 3  ;;  %v4569_v23 = vpop.f32.mrb[43].mxu0  ;;  %v4758_v26 = vpop.f32.mrb[59].mxu1 }
 0x319   :  { %v4961_v2 = vrot.slane %v4569_v23, 2  ;;  %v4997_v48 = vrot.slane %v4758_v26, 4 }
 0x31a   :  { %v4952_v13 = vsel %vm4787_vm1, %v4942_v55, %v4943_v52  ;;  %v4988_v42 = vsel %vm4895_vm4, %v4978_v59, %v4979_v35 }
 0x31b   :  { %v4954_v41 = vadd.f32 %v4952_v13, %v9419_v32  ;;  %v4970_v33 = vsel %vm4806_vm0, %v4960_v39, %v4961_v2  ;;  %v5007_v44 = vsel %vm5002_vm7, %v4996_v11, %v4997_v48 }
 0x31d   :  { %v4972_v25 = vadd.f32 %v4970_v33, %v4954_v41  ;;  %v4573_v46 = vpop.f32.mrb[44].mxu0  ;;  %v4762_v49 = vpop.f32.mrb[60].mxu1 }
 0x31e   :  { %v4944_v47 = vrot.slane %v4573_v46, 1  ;;  %v4980_v37 = vrot.slane %v4762_v49, 3  ;;  %v4575_v45 = vpop.f32.mrb[45].mxu0  ;;  %v4764_v0 = vpop.f32.mrb[61].mxu1 }
 0x31f   :  { %v4990_v63 = vadd.f32 %v4988_v42, %v4972_v25  ;;  %v4962_v56 = vrot.slane %v4575_v45, 2  ;;  %v4998_v5 = vrot.slane %v4764_v0, 4  ;;  %v4577_v60 = vpop.f32.mrb[46].mxu0  ;;  %v4766_v6 = vpop.f32.mrb[62].mxu1 }
 0x320   :  { %v4951_v32 = vsel %vm4787_vm1, %v4943_v52, %v4944_v47  ;;  %v4987_v3 = vsel %vm4895_vm4, %v4979_v35, %v4980_v37  ;;  %v4579_v38 = vpop.f32.mrb[47].mxu0  ;;  %v4768_v50 = vpop.f32.mrb[63].mxu1  ;;  %v4945_v22 = vrot.slane %v4577_v60, 1  ;;  %v4981_v12 = vrot.slane %v4766_v6, 3 }
 0x321   :  { %v5009_v58 = vadd.f32 %v5007_v44, %v4990_v63  ;;  %v4955_v57 = vadd.f32 %v4951_v32, %v9425_v19  ;;  %v4969_v62 = vsel %vm4806_vm0, %v4961_v2, %v4962_v56  ;;  %v5006_v9 = vsel %vm5002_vm7, %v4997_v48, %v4998_v5 }
 0x322   :  { %v4963_v30 = vrot.slane %v4579_v38, 2  ;;  %v4999_v1 = vrot.slane %v4768_v50, 4  ;;  %v5074_v60 = vsub.s32 2, %v8745_v40  ;;  %v7190_v40 = vld [vmem:[%s9621_s5 + $0x30] sm:$0xff]  }
 0x323   :  { %v4973_v21 = vadd.f32 %v4969_v62, %v4955_v57  ;;  %6190 = vmatpush3.bf16.msra.mxu0 %v7190_v40 }
 0x324   :  { %v5075_v38 = vrot.slane %v9480_v53, %v5074_v60  ;;  %6191 = vmatprep.subr.bf16.mxu0 %v7216_v24  ;;  %v7191_v53 = vld [vmem:[%s9621_s5 + $0x38] sm:$0xff]   ;;  %v6102_v24 = vld [vmem:[%s9622_s6] ss:$0 sm:$0xff]  ;;  %s5487_s5 = sshll.u32 %s7218_s13, 4  ;;  %s5488_s5 = int_to_ptr.vmem [resolvable:$true] %s5487_s5 }
 0x325   :  { %v4991_v16 = vadd.f32 %v4987_v3, %v4973_v21  ;;  %v4583_v36 = vpop.f32.mrb[48].mxu0  ;;  %v4772_v20 = vpop.f32.mrb[64].mxu1  ;;  %p7197_p1 = scmp.lt.s32.totalorder %s5488_s5, %s5488_s5 }
 0x326   :  { %v4946_v8 = vrot.slane %v4583_v36, 1  ;;  %v4982_v18 = vrot.slane %v4772_v20, 3  ;;  %v4585_v27 = vpop.f32.mrb[49].mxu0  ;;  %v4774_v43 = vpop.f32.mrb[65].mxu1 }
 0x327   :  { %v5010_v19 = vadd.f32 %v5006_v9, %v4991_v16  ;;  %v4964_v4 = vrot.slane %v4585_v27, 2  ;;  %v5000_v31 = vrot.slane %v4774_v43, 4  ;;  %v4587_v29 = vpop.f32.mrb[50].mxu0  ;;  %v4776_v54 = vpop.f32.mrb[66].mxu1  ;;  %6192 = vmatpush3.bf16.msra.mxu0 %v7191_v53 }
 0x328   :  { %v4949_v15 = vsel %vm4787_vm1, %v4945_v22, %v4946_v8  ;;  %v4985_v61 = vsel %vm4895_vm4, %v4981_v12, %v4982_v18  ;;  %v4947_v34 = vrot.slane %v4587_v29, 1  ;;  %v4983_v17 = vrot.slane %v4776_v54, 3  ;;  %v4589_v28 = vpop.f32.mrb[51].mxu0  ;;  %v4778_v7 = vpop.f32.mrb[67].mxu1  ;;  %v6077_v12 = vld [vmem:[%s9620_s4] ss:$0 sm:$0xff] }
 0x329   :  { %v5028_v55 = vsel %vm5016_vm8, %v5010_v19, -inf  ;;  %v4957_v59 = vadd.f32 %v4949_v15, %v9448_v14  ;;  %v4967_v52 = vsel %vm4806_vm0, %v4963_v30, %v4964_v4  ;;  %v5004_v35 = vsel %vm5002_vm7, %v4999_v1, %v5000_v31  ;;  %s7192_s4 = scalar_lea.vmem %s5488_s5, 32 }
 0x32a   :  { %v5034_v23 = vmax.f32 %v5009_v58, %v5028_v55  ;;  %v4948_v26 = vsel %vm4787_vm1, %v4946_v8, %v4947_v34  ;;  %v4984_v39 = vsel %vm4895_vm4, %v4982_v18, %v4983_v17  ;;  %v4965_v11 = vrot.slane %v4589_v28, 2  ;;  %p7193_p0 = scmp.ne.s32.totalorder %s5488_s5, %s7192_s4  ;;  %p7198_p2 = scmp.lt.s32.totalorder %s7192_s4, %s7192_s4 }
 0x32b   :  { %v4975_v2 = vadd.f32 %v4967_v52, %v4957_v59  ;;  %v4958_v48 = vadd.f32 %v4948_v26, %v9457_v51  ;;  %v5001_v13 = vrot.slane %v4778_v7, 4 }
 0x32c   :  { %v5035_v42 = vrot.slane %v5034_v23, 4  ;;  %v4966_v14 = vsel %vm4806_vm0, %v4964_v4, %v4965_v11  ;;  %p7199_p3 = por %p7198_p2, %p7197_p1 }
 0x32d   :  { %v4993_v41 = vadd.f32 %v4985_v61, %v4975_v2  ;;  %v4976_v33 = vadd.f32 %v4966_v14, %v4958_v48  ;;  %v5003_v44 = vsel %vm5002_vm7, %v5000_v31, %v5001_v13 }
 0x32e   :  { %v5036_v49 = vmax.f32 %v5034_v23, %v5035_v42  ;;  %p7200_p4 = pnand %p7199_p3, %p7193_p0 }
 0x32f   :  { %v5012_v25 = vadd.f32 %v5004_v35, %v4993_v41  ;;  %v4994_v46 = vadd.f32 %v4984_v39, %v4976_v33 }
 0x330   :  { %v5037_v45 = vrot.slane %v5036_v49, 2 }
 0x331   :  { %v5013_v47 = vadd.f32 %v5003_v44, %v4994_v46 }
 0x332   :  { %v5038_v63 = vmax.f32 %v5036_v49, %v5037_v45 }
 0x333   :  { %v5031_v37 = vsel %vm5016_vm8, %v5013_v47, -inf }
 0x334   :  { %v5042_v0 = vmax.f32 %v5012_v25, %v5031_v37  ;;  %v5039_v6 = vrot.slane %v5038_v63, 1 }
 0x336   :  { %v5043_v51 = vrot.slane %v5042_v0, 4  ;;  %v5040_v50 = vmax.f32 %v5038_v63, %v5039_v6 }
 0x338   :  { %v5044_v56 = vmax.f32 %v5042_v0, %v5043_v51 }
 0x33a   :  { %v5045_v5 = vrot.slane %v5044_v56, 2 }
 0x33c   :  { %v5046_v32 = vmax.f32 %v5044_v56, %v5045_v5 }
 0x33e   :  { %v5047_v3 = vrot.slane %v5046_v32, 1 }
 0x340   :  { %v5048_v58 = vmax.f32 %v5046_v32, %v5047_v3 }
 0x342   :  { %v5060_v57 = vsel %vm5051_vm3, %v5048_v58, %v5040_v50 }
 0x343   :  { %v5081_v62 = vadd.f32 %v5075_v38, %v5060_v57 }
 0x345   :  { %v5084_v10 = vmax.f32 %v5081_v62, 0.0 }
 0x347   :  { %v5087_v9 = vpack.c.bf16 %v5084_v10, %v5084_v10 }
 0x349   :  { %6174 = vmatmul.mubr.bf16.vlgmr.msra.gmra.mrb[68].mxu1 %v5087_v9 }
 0x35b   :  { %v6133_v21 = vpop.f32.mrb[52].mxu0 }
 0x35c   :  { %v6134_v16 = vpop.f32.mrb[53].mxu0 }
 0x35d   :  { %v6135_v22 = vadd.f32 %v6134_v16, %v6133_v21  ;;  %v6136_v36 = vpop.f32.mrb[54].mxu0 }
 0x35e   :  { %v6137_v20 = vpop.f32.mrb[55].mxu0 }
 0x35f   :  { %v5322_v30 = vadd.f32 %v6135_v22, %v6077_v12 }
 0x41c   :  { %v5361_v8 = vpop.f32.mrb[68].mxu1 }
 0x41d   :  { %v5362_v18 = vadd.f32 %v5361_v8, %v5322_v30  ;;  %v6175_v27 = vpop.f32.mrb[69].mxu1 }
 0x41e   :  { %v5364_v43 = vpop.f32.mrb[70].mxu1 }
 0x41f   :  { %v5367_v19 = vmax.f32 %v5362_v18, 0.0  ;;  %v6176_v1 = vpop.f32.mrb[71].mxu1 }
 0x421   :  { %v5368_v4 = vpack.c.bf16 %v5367_v19, %v5367_v19 }
 0x423   :  { %6194 = vmatmul.mubr.bf16.vlgmr.msra.gmra.mrb[56].mxu0 %v5368_v4 }
 0x4f6   :  { %v5474_v31 = vpop.f32.mrb[56].mxu0 }
 0x4f7   :  { %v5475_v29 = vadd.f32 %v6102_v24, %v5474_v31  ;;  %v6195_v54 = vpop.f32.mrb[57].mxu0 }
 0x4f8   :  { %v5477_v15 = vpop.f32.mrb[58].mxu0 }
 0x4f9   :  { %5480 = vst [vmem:[#allocation2] sm:$0x3] %v5475_v29  ;;  %v6196_v61 = vpop.f32.mrb[59].mxu0 }
 0x4fa   :  { %7203 = shalt.err (!%p7200_p4)
}
 0x4fb   :  { %s7204_s6 = scalar_lea.hbm %s9623_s7, 32 }
 0x4fc   :  { %p7205_p5 = scmp.ne.s32.totalorder %s9623_s7, %s7204_s6  ;;  %p7208_p6 = scmp.lt.u32.totalorder %s7204_s6, %s9623_s7 }
 0x4fe   :  { %p7210_p7 = pnand %p7208_p6, %p7205_p5 }
 0x500   :  { %7213 = shalt.err (!%p7210_p7)
}
 0x501   :  { %5490 = dma.vmem_to_hbm [thread:$0]  %s5488_s5, 32, %s9623_s7, [#allocation3]  }
 0x502   :  { %7214 = dma.done.wait [#allocation3], 32  }
 0x503   :  { %7215 = vsyncadd [#allocation3], 4294967264 }
 0x504   :  { %5494 = vsyncpa [#allocation3], 1 }

</bundles_post_ra>
